<compile_context>
chip_gen: v7x
topology: tpu7x:2x2x1
jax: 0.10.0
libtpu: 0.0.40
codegen_flags: <defaults>
</compile_context>

<pallas_src>
import functools
import math

import jax
import jax.numpy as jnp
from jax.experimental import pallas as pl
from jax.experimental.pallas import tpu as pltpu

D_MODEL = 8
NHEAD = 4
HEAD_DIM = D_MODEL // NHEAD          # 2
D_FF = 2048                          # nn.TransformerEncoderLayer default
NUM_LAYERS = 2
LN_EPS = 1e-5


def _layer_norm(x, gamma, beta):
    # x: (T, D), gamma/beta: (1, D)
    mu = jnp.mean(x, axis=-1, keepdims=True)
    var = jnp.mean((x - mu) ** 2, axis=-1, keepdims=True)
    return (x - mu) * jax.lax.rsqrt(var + LN_EPS) * gamma + beta


def _encoder_layer(xf, batch, seq, m_pool, m_exp,
                   w_in, b_in, wo, bo, g1, be1, w1, b1, w2, b2, g2, be2):
    """One post-norm encoder layer on a flattened (T, D) activation."""
    T = batch * seq

    # --- packed QKV projection: one (T,8)@(8,24) matmul ---------------------
    qkv = jnp.dot(xf, w_in, preferred_element_type=jnp.float32) + b_in  # (T,3D)

    scale = 1.0 / math.sqrt(HEAD_DIM)
    q = (qkv[:, :D_MODEL] * scale).reshape(batch, seq, D_MODEL)
    k = qkv[:, D_MODEL:2 * D_MODEL].reshape(batch, seq, D_MODEL)
    v = qkv[:, 2 * D_MODEL:].reshape(batch, seq, D_MODEL)

    # --- scores: VPU broadcast outer product + per-head lane pooling --------
    prod = q[:, :, None, :] * k[:, None, :, :]             # (B,Sq,Sk,D)
    s = jnp.dot(prod.reshape(T * seq, D_MODEL), m_pool,
                preferred_element_type=jnp.float32)         # (B*Sq*Sk, H)
    s = s.reshape(batch, seq, seq, NHEAD)

    # softmax over the key axis (sublane reduce); exact reciprocal
    m = jnp.max(s, axis=2, keepdims=True)
    e = jnp.exp(s - m)
    denom = jnp.sum(e, axis=2, keepdims=True)
    p = e * pl.reciprocal(denom, approx=False)               # (B,Sq,Sk,H)

    # --- expand head probs back to lanes, PV on the VPU ---------------------
    p_exp = jnp.dot(p.reshape(T * seq, NHEAD), m_exp,
                    preferred_element_type=jnp.float32)
    p_exp = p_exp.reshape(batch, seq, seq, D_MODEL)
    o = jnp.sum(p_exp * v[:, None, :, :], axis=2)            # (B,Sq,D)
    o = o.reshape(T, D_MODEL)

    # attention out projection (T,8)@(8,8)
    attn = jnp.dot(o, wo, preferred_element_type=jnp.float32) + bo

    # residual + LayerNorm1 (post-norm; dropout = identity in eval)
    x1 = _layer_norm(xf + attn, g1, be1)

    # --- FFN: bf16 only at the MXU inputs, f32 accumulate / elementwise -----
    h = jnp.dot(x1.astype(jnp.bfloat16), w1,
                preferred_element_type=jnp.float32) + b1     # (T, D_FF) f32
    h = jnp.maximum(h, 0.0).astype(jnp.bfloat16)             # fused ReLU+cast
    ff = jnp.dot(h, w2, preferred_element_type=jnp.float32) + b2

    # residual + LayerNorm2
    return _layer_norm(x1 + ff, g2, be2)


def transformer_kernel(src_ref, pe_ref, mpool_ref, mexp_ref,
                       w_in_ref, b_in_ref, wo_ref, bo_ref,
                       g1_ref, be1_ref, w1_ref, b1_ref, w2_ref, b2_ref,
                       g2_ref, be2_ref, out_ref, *, batch, seq):
    # positional encoding (pre-tiled to (T, D) in the wrapper)
    xf = src_ref[...].astype(jnp.float32) + pe_ref[...]      # (T, D)
    m_pool = mpool_ref[...]
    m_exp = mexp_ref[...]

    # both encoder layers fused: activation never leaves VMEM/vregs
    for layer in range(NUM_LAYERS):
        xf = _encoder_layer(
            xf, batch, seq, m_pool, m_exp,
            w_in_ref[layer], b_in_ref[layer], wo_ref[layer], bo_ref[layer],
            g1_ref[layer], be1_ref[layer], w1_ref[layer], b1_ref[layer],
            w2_ref[layer], b2_ref[layer], g2_ref[layer], be2_ref[layer])

    out_ref[...] = xf.astype(out_ref.dtype)


def positional_encoding(seq_len, d_model):
    position = jnp.arange(seq_len, dtype=jnp.float32)[:, None]
    div_term = jnp.exp(jnp.arange(0, d_model, 2, dtype=jnp.float32)
                       * (-math.log(10000.0) / d_model))
    pe = jnp.zeros((seq_len, d_model), jnp.float32)
    pe = pe.at[:, 0::2].set(jnp.sin(position * div_term))
    pe = pe.at[:, 1::2].set(jnp.cos(position * div_term))
    return pe                                   # (S, D)


def init_params(key):
    """Per-layer params, stacked along a leading NUM_LAYERS axis.

    All weights stored pre-transposed so kernel matmuls are plain (M,K)@(K,N).
    """
    def one_layer(k):
        ks = jax.random.split(k, 6)
        w_in = 0.1 * jax.random.normal(ks[0], (D_MODEL, 3 * D_MODEL), jnp.float32)
        b_in = jnp.zeros((1, 3 * D_MODEL), jnp.float32)
        wo = 0.1 * jax.random.normal(ks[1], (D_MODEL, D_MODEL), jnp.float32)
        bo = jnp.zeros((1, D_MODEL), jnp.float32)
        g1 = jnp.ones((1, D_MODEL), jnp.float32)
        be1 = jnp.zeros((1, D_MODEL), jnp.float32)
        w1 = 0.05 * jax.random.normal(ks[2], (D_MODEL, D_FF), jnp.float32)
        b1 = 0.01 * jax.random.normal(ks[3], (1, D_FF), jnp.float32)
        w2 = 0.05 * jax.random.normal(ks[4], (D_FF, D_MODEL), jnp.float32)
        b2 = 0.01 * jax.random.normal(ks[5], (1, D_MODEL), jnp.float32)
        g2 = jnp.ones((1, D_MODEL), jnp.float32)
        be2 = jnp.zeros((1, D_MODEL), jnp.float32)
        return (w_in, b_in, wo, bo, g1, be1, w1, b1, w2, b2, g2, be2)

    layers = [one_layer(k) for k in jax.random.split(key, NUM_LAYERS)]
    stacked = [jnp.stack(t, axis=0) for t in zip(*layers)]
    # FFN weights in bf16: halves HBM weight traffic, native MXU path.
    # TODO(synk): fp8 weights on v7x if the model is ever scaled up.
    stacked[6] = stacked[6].astype(jnp.bfloat16)   # w1  (L, D, D_FF)
    stacked[8] = stacked[8].astype(jnp.bfloat16)   # w2  (L, D_FF, D)
    return tuple(stacked)


def transformer_forward(src, src_mask, params, pe=True):
    # src: (B, S, D); src_mask is accepted for signature parity but — exactly
    # like the PyTorch module — it is never forwarded to the encoder.
    del src_mask
    B, S, D = src.shape
    T = B * S

    pe_tab = positional_encoding(S, D) if pe else jnp.zeros((S, D), jnp.float32)
    pe_flat = jnp.tile(pe_tab, (B, 1))                          # (T, D)

    # lane -> head pooling / expansion constants (head = lane // HEAD_DIM)
    m_pool = (jnp.arange(D)[:, None] // HEAD_DIM
              == jnp.arange(NHEAD)[None, :]).astype(jnp.float32)  # (D, H)
    m_exp = m_pool.T                                              # (H, D)

    src_flat = src.reshape(T, D)                                  # lane-aligned

    operands = (src_flat, pe_flat, m_pool, m_exp) + tuple(params)

    flops = NUM_LAYERS * (
        2 * T * D * 3 * D            # packed QKV projection
        + 2 * T * S * D              # score outer product (VPU)
        + 2 * T * S * D * NHEAD      # head pooling matmul
        + 2 * T * S * NHEAD * D      # head expansion matmul
        + 2 * T * S * D              # PV multiply-reduce (VPU)
        + 2 * T * D * D              # attention out projection
        + 2 * T * D * D_FF           # FFN up
        + 2 * T * D_FF * D)          # FFN down
    transcendentals = NUM_LAYERS * (B * S * S * NHEAD + 2 * T)   # exp + rsqrt
    bytes_accessed = int(sum(x.size * x.dtype.itemsize for x in operands)
                         + T * D * src.dtype.itemsize)

    kernel = functools.partial(transformer_kernel, batch=B, seq=S)

    out_flat = pl.pallas_call(
        kernel,
        out_shape=jax.ShapeDtypeStruct((T, D), src.dtype),
        in_specs=[pl.BlockSpec(memory_space=pltpu.MemorySpace.VMEM)]
                 * len(operands),
        out_specs=pl.BlockSpec(memory_space=pltpu.MemorySpace.VMEM),
        cost_estimate=pl.CostEstimate(
            flops=flops, transcendentals=transcendentals,
            bytes_accessed=bytes_accessed),
    )(*operands)

    return out_flat.reshape(B, S, D)


if __name__ == "__main__":
    key = jax.random.PRNGKey(0)
    k_src, k_p = jax.random.split(key)

    B, S = 2, 8
    src = jax.random.normal(k_src, (B, S, D_MODEL), jnp.float32)
    src_mask = jnp.zeros((S, S), jnp.float32)       # unused, as in the module

    params = init_params(k_p)

    out = transformer_forward(src, src_mask, params, pe=True)
    out = jax.block_until_ready(out)
    assert out.shape == (B, S, D_MODEL)
    assert bool(jnp.all(jnp.isfinite(out)))
    print("KERNEL_OK")
</pallas_src>

<mosaic_0001>
module attributes {stable_mosaic.version = 11 : i64} {
  func.func @transformer_kernel(%arg0: memref<16x8xf32, #tpu.memory_space<vmem>>, %arg1: memref<16x8xf32, #tpu.memory_space<vmem>>, %arg2: memref<8x4xf32, #tpu.memory_space<vmem>>, %arg3: memref<4x8xf32, #tpu.memory_space<vmem>>, %arg4: memref<2x8x24xf32, #tpu.memory_space<vmem>>, %arg5: memref<2x1x24xf32, #tpu.memory_space<vmem>>, %arg6: memref<2x8x8xf32, #tpu.memory_space<vmem>>, %arg7: memref<2x1x8xf32, #tpu.memory_space<vmem>>, %arg8: memref<2x1x8xf32, #tpu.memory_space<vmem>>, %arg9: memref<2x1x8xf32, #tpu.memory_space<vmem>>, %arg10: memref<2x8x2048xbf16, #tpu.memory_space<vmem>>, %arg11: memref<2x1x2048xf32, #tpu.memory_space<vmem>>, %arg12: memref<2x2048x8xbf16, #tpu.memory_space<vmem>>, %arg13: memref<2x1x8xf32, #tpu.memory_space<vmem>>, %arg14: memref<2x1x8xf32, #tpu.memory_space<vmem>>, %arg15: memref<2x1x8xf32, #tpu.memory_space<vmem>>, %arg16: memref<16x8xf32, #tpu.memory_space<vmem>>) attributes {dimension_semantics = [], scalar_prefetch = 0 : i64, scratch_operands = 0 : i64, tpu.core_type = #tpu.core_type<tc>} {
    %c0 = arith.constant 0 : index
    %c0_0 = arith.constant 0 : index
    %0 = vector.load %arg0[%c0, %c0_0] : memref<16x8xf32, #tpu.memory_space<vmem>>, vector<16x8xf32>
    %c0_1 = arith.constant 0 : index
    %c0_2 = arith.constant 0 : index
    %1 = vector.load %arg1[%c0_1, %c0_2] : memref<16x8xf32, #tpu.memory_space<vmem>>, vector<16x8xf32>
    %2 = arith.addf %0, %1 : vector<16x8xf32>
    %c0_3 = arith.constant 0 : index
    %c0_4 = arith.constant 0 : index
    %3 = vector.load %arg2[%c0_3, %c0_4] : memref<8x4xf32, #tpu.memory_space<vmem>>, vector<8x4xf32>
    %c0_5 = arith.constant 0 : index
    %c0_6 = arith.constant 0 : index
    %4 = vector.load %arg3[%c0_5, %c0_6] : memref<4x8xf32, #tpu.memory_space<vmem>>, vector<4x8xf32>
    %c0_7 = arith.constant 0 : index
    %c0_8 = arith.constant 0 : index
    %c0_9 = arith.constant 0 : index
    %5 = vector.load %arg4[%c0_7, %c0_8, %c0_9] : memref<2x8x24xf32, #tpu.memory_space<vmem>>, vector<1x8x24xf32>
    %6 = vector.shape_cast %5 : vector<1x8x24xf32> to vector<8x24xf32>
    %c0_10 = arith.constant 0 : index
    %c0_11 = arith.constant 0 : index
    %c0_12 = arith.constant 0 : index
    %7 = vector.load %arg5[%c0_10, %c0_11, %c0_12] : memref<2x1x24xf32, #tpu.memory_space<vmem>>, vector<1x1x24xf32>
    %8 = vector.shape_cast %7 : vector<1x1x24xf32> to vector<1x24xf32>
    %c0_13 = arith.constant 0 : index
    %c0_14 = arith.constant 0 : index
    %c0_15 = arith.constant 0 : index
    %9 = vector.load %arg6[%c0_13, %c0_14, %c0_15] : memref<2x8x8xf32, #tpu.memory_space<vmem>>, vector<1x8x8xf32>
    %10 = vector.shape_cast %9 : vector<1x8x8xf32> to vector<8x8xf32>
    %c0_16 = arith.constant 0 : index
    %c0_17 = arith.constant 0 : index
    %c0_18 = arith.constant 0 : index
    %11 = vector.load %arg7[%c0_16, %c0_17, %c0_18] : memref<2x1x8xf32, #tpu.memory_space<vmem>>, vector<1x1x8xf32>
    %12 = vector.shape_cast %11 : vector<1x1x8xf32> to vector<1x8xf32>
    %c0_19 = arith.constant 0 : index
    %c0_20 = arith.constant 0 : index
    %c0_21 = arith.constant 0 : index
    %13 = vector.load %arg8[%c0_19, %c0_20, %c0_21] : memref<2x1x8xf32, #tpu.memory_space<vmem>>, vector<1x1x8xf32>
    %14 = vector.shape_cast %13 : vector<1x1x8xf32> to vector<1x8xf32>
    %c0_22 = arith.constant 0 : index
    %c0_23 = arith.constant 0 : index
    %c0_24 = arith.constant 0 : index
    %15 = vector.load %arg9[%c0_22, %c0_23, %c0_24] : memref<2x1x8xf32, #tpu.memory_space<vmem>>, vector<1x1x8xf32>
    %16 = vector.shape_cast %15 : vector<1x1x8xf32> to vector<1x8xf32>
    %c0_25 = arith.constant 0 : index
    %c0_26 = arith.constant 0 : index
    %c0_27 = arith.constant 0 : index
    %17 = vector.load %arg10[%c0_25, %c0_26, %c0_27] : memref<2x8x2048xbf16, #tpu.memory_space<vmem>>, vector<1x8x2048xbf16>
    %18 = vector.shape_cast %17 : vector<1x8x2048xbf16> to vector<8x2048xbf16>
    %c0_28 = arith.constant 0 : index
    %c0_29 = arith.constant 0 : index
    %c0_30 = arith.constant 0 : index
    %19 = vector.load %arg11[%c0_28, %c0_29, %c0_30] : memref<2x1x2048xf32, #tpu.memory_space<vmem>>, vector<1x1x2048xf32>
    %20 = vector.shape_cast %19 : vector<1x1x2048xf32> to vector<1x2048xf32>
    %c0_31 = arith.constant 0 : index
    %c0_32 = arith.constant 0 : index
    %c0_33 = arith.constant 0 : index
    %21 = vector.load %arg12[%c0_31, %c0_32, %c0_33] : memref<2x2048x8xbf16, #tpu.memory_space<vmem>>, vector<1x2048x8xbf16>
    %22 = vector.shape_cast %21 : vector<1x2048x8xbf16> to vector<2048x8xbf16>
    %c0_34 = arith.constant 0 : index
    %c0_35 = arith.constant 0 : index
    %c0_36 = arith.constant 0 : index
    %23 = vector.load %arg13[%c0_34, %c0_35, %c0_36] : memref<2x1x8xf32, #tpu.memory_space<vmem>>, vector<1x1x8xf32>
    %24 = vector.shape_cast %23 : vector<1x1x8xf32> to vector<1x8xf32>
    %c0_37 = arith.constant 0 : index
    %c0_38 = arith.constant 0 : index
    %c0_39 = arith.constant 0 : index
    %25 = vector.load %arg14[%c0_37, %c0_38, %c0_39] : memref<2x1x8xf32, #tpu.memory_space<vmem>>, vector<1x1x8xf32>
    %26 = vector.shape_cast %25 : vector<1x1x8xf32> to vector<1x8xf32>
    %c0_40 = arith.constant 0 : index
    %c0_41 = arith.constant 0 : index
    %c0_42 = arith.constant 0 : index
    %27 = vector.load %arg15[%c0_40, %c0_41, %c0_42] : memref<2x1x8xf32, #tpu.memory_space<vmem>>, vector<1x1x8xf32>
    %28 = vector.shape_cast %27 : vector<1x1x8xf32> to vector<1x8xf32>
    %cst = arith.constant dense<0.000000e+00> : vector<16x24xf32>
    %29 = tpu.matmul %2, %6, %cst {dimension_numbers = #tpu.dot_dimension_numbers<[1], [0], [0], [1], [0, 0, 1, 1], [], []>} : vector<16x8xf32>, vector<8x24xf32>, vector<16x24xf32> -> vector<16x24xf32>
    %30 = vector.broadcast %8 : vector<1x24xf32> to vector<16x24xf32>
    %31 = arith.addf %29, %30 : vector<16x24xf32>
    %32 = vector.extract_strided_slice %31 {offsets = [0, 0], sizes = [16, 8], strides = [1, 1]} : vector<16x24xf32> to vector<16x8xf32>
    %cst_43 = arith.constant 0.707106769 : f32
    %33 = vector.broadcast %cst_43 : f32 to vector<16x8xf32>
    %34 = arith.mulf %32, %33 : vector<16x8xf32>
    %35 = vector.shape_cast %34 : vector<16x8xf32> to vector<2x8x8xf32>
    %36 = vector.extract_strided_slice %31 {offsets = [0, 8], sizes = [16, 8], strides = [1, 1]} : vector<16x24xf32> to vector<16x8xf32>
    %37 = vector.shape_cast %36 : vector<16x8xf32> to vector<2x8x8xf32>
    %38 = vector.extract_strided_slice %31 {offsets = [0, 16], sizes = [16, 8], strides = [1, 1]} : vector<16x24xf32> to vector<16x8xf32>
    %39 = vector.shape_cast %38 : vector<16x8xf32> to vector<2x8x8xf32>
    %40 = vector.shape_cast %35 : vector<2x8x8xf32> to vector<2x8x1x8xf32>
    %41 = vector.shape_cast %37 : vector<2x8x8xf32> to vector<2x1x8x8xf32>
    %42 = vector.broadcast %40 : vector<2x8x1x8xf32> to vector<2x8x8x8xf32>
    %43 = vector.broadcast %41 : vector<2x1x8x8xf32> to vector<2x8x8x8xf32>
    %44 = arith.mulf %42, %43 : vector<2x8x8x8xf32>
    %45 = vector.shape_cast %44 : vector<2x8x8x8xf32> to vector<128x8xf32>
    %cst_44 = arith.constant dense<0.000000e+00> : vector<128x4xf32>
    %46 = tpu.matmul %45, %3, %cst_44 {dimension_numbers = #tpu.dot_dimension_numbers<[1], [0], [0], [1], [0, 0, 1, 1], [], []>} : vector<128x8xf32>, vector<8x4xf32>, vector<128x4xf32> -> vector<128x4xf32>
    %47 = vector.shape_cast %46 : vector<128x4xf32> to vector<2x8x8x4xf32>
    %cst_45 = arith.constant dense<0xFF800000> : vector<2x8x4xf32>
    %48 = vector.multi_reduction <maximumf>, %47, %cst_45 [2] : vector<2x8x8x4xf32> to vector<2x8x4xf32>
    %49 = vector.shape_cast %48 : vector<2x8x4xf32> to vector<2x8x1x4xf32>
    %50 = vector.broadcast %49 : vector<2x8x1x4xf32> to vector<2x8x8x4xf32>
    %51 = arith.subf %47, %50 : vector<2x8x8x4xf32>
    %52 = math.exp %51 : vector<2x8x8x4xf32>
    %cst_46 = arith.constant dense<0.000000e+00> : vector<2x8x4xf32>
    %53 = vector.multi_reduction <add>, %52, %cst_46 [2] : vector<2x8x8x4xf32> to vector<2x8x4xf32>
    %54 = vector.shape_cast %53 : vector<2x8x4xf32> to vector<2x8x1x4xf32>
    %55 = tpu.reciprocal %54 : vector<2x8x1x4xf32> -> vector<2x8x1x4xf32>
    %56 = vector.broadcast %55 : vector<2x8x1x4xf32> to vector<2x8x8x4xf32>
    %57 = arith.mulf %52, %56 : vector<2x8x8x4xf32>
    %58 = vector.shape_cast %57 : vector<2x8x8x4xf32> to vector<128x4xf32>
    %cst_47 = arith.constant dense<0.000000e+00> : vector<128x8xf32>
    %59 = tpu.matmul %58, %4, %cst_47 {dimension_numbers = #tpu.dot_dimension_numbers<[1], [0], [0], [1], [0, 0, 1, 1], [], []>} : vector<128x4xf32>, vector<4x8xf32>, vector<128x8xf32> -> vector<128x8xf32>
    %60 = vector.shape_cast %59 : vector<128x8xf32> to vector<2x8x8x8xf32>
    %61 = vector.shape_cast %39 : vector<2x8x8xf32> to vector<2x1x8x8xf32>
    %62 = vector.broadcast %61 : vector<2x1x8x8xf32> to vector<2x8x8x8xf32>
    %63 = arith.mulf %60, %62 : vector<2x8x8x8xf32>
    %cst_48 = arith.constant dense<0.000000e+00> : vector<2x8x8xf32>
    %64 = vector.multi_reduction <add>, %63, %cst_48 [2] : vector<2x8x8x8xf32> to vector<2x8x8xf32>
    %65 = vector.shape_cast %64 : vector<2x8x8xf32> to vector<16x8xf32>
    %cst_49 = arith.constant dense<0.000000e+00> : vector<16x8xf32>
    %66 = tpu.matmul %65, %10, %cst_49 {dimension_numbers = #tpu.dot_dimension_numbers<[1], [0], [0], [1], [0, 0, 1, 1], [], []>} : vector<16x8xf32>, vector<8x8xf32>, vector<16x8xf32> -> vector<16x8xf32>
    %67 = vector.broadcast %12 : vector<1x8xf32> to vector<16x8xf32>
    %68 = arith.addf %66, %67 : vector<16x8xf32>
    %69 = arith.addf %2, %68 : vector<16x8xf32>
    %cst_50 = arith.constant dense<0.000000e+00> : vector<16xf32>
    %70 = vector.multi_reduction <add>, %69, %cst_50 [1] : vector<16x8xf32> to vector<16xf32>
    %71 = vector.shape_cast %70 : vector<16xf32> to vector<16x1xf32>
    %cst_51 = arith.constant 8.000000e+00 : f32
    %72 = vector.broadcast %cst_51 : f32 to vector<16x1xf32>
    %73 = arith.divf %71, %72 : vector<16x1xf32>
    %74 = vector.broadcast %73 : vector<16x1xf32> to vector<16x8xf32>
    %75 = arith.subf %69, %74 : vector<16x8xf32>
    %76 = arith.mulf %75, %75 : vector<16x8xf32>
    %cst_52 = arith.constant dense<0.000000e+00> : vector<16xf32>
    %77 = vector.multi_reduction <add>, %76, %cst_52 [1] : vector<16x8xf32> to vector<16xf32>
    %78 = vector.shape_cast %77 : vector<16xf32> to vector<16x1xf32>
    %cst_53 = arith.constant 8.000000e+00 : f32
    %79 = vector.broadcast %cst_53 : f32 to vector<16x1xf32>
    %80 = arith.divf %78, %79 : vector<16x1xf32>
    %81 = vector.broadcast %73 : vector<16x1xf32> to vector<16x8xf32>
    %82 = arith.subf %69, %81 : vector<16x8xf32>
    %cst_54 = arith.constant 9.99999974E-6 : f32
    %83 = vector.broadcast %cst_54 : f32 to vector<16x1xf32>
    %84 = arith.addf %80, %83 : vector<16x1xf32>
    %85 = math.rsqrt %84 : vector<16x1xf32>
    %86 = vector.broadcast %85 : vector<16x1xf32> to vector<16x8xf32>
    %87 = arith.mulf %82, %86 : vector<16x8xf32>
    %88 = vector.broadcast %14 : vector<1x8xf32> to vector<16x8xf32>
    %89 = arith.mulf %87, %88 : vector<16x8xf32>
    %90 = vector.broadcast %16 : vector<1x8xf32> to vector<16x8xf32>
    %91 = arith.addf %89, %90 : vector<16x8xf32>
    %92 = arith.truncf %91 : vector<16x8xf32> to vector<16x8xbf16>
    %cst_55 = arith.constant dense<0.000000e+00> : vector<16x2048xf32>
    %93 = tpu.matmul %92, %18, %cst_55 {dimension_numbers = #tpu.dot_dimension_numbers<[1], [0], [0], [1], [0, 0, 1, 1], [], []>} : vector<16x8xbf16>, vector<8x2048xbf16>, vector<16x2048xf32> -> vector<16x2048xf32>
    %94 = vector.broadcast %20 : vector<1x2048xf32> to vector<16x2048xf32>
    %95 = arith.addf %93, %94 : vector<16x2048xf32>
    %cst_56 = arith.constant 0.000000e+00 : f32
    %96 = vector.broadcast %cst_56 : f32 to vector<16x2048xf32>
    %97 = arith.maximumf %95, %96 : vector<16x2048xf32>
    %98 = arith.truncf %97 : vector<16x2048xf32> to vector<16x2048xbf16>
    %cst_57 = arith.constant dense<0.000000e+00> : vector<16x8xf32>
    %99 = tpu.matmul %98, %22, %cst_57 {dimension_numbers = #tpu.dot_dimension_numbers<[1], [0], [0], [1], [0, 0, 1, 1], [], []>} : vector<16x2048xbf16>, vector<2048x8xbf16>, vector<16x8xf32> -> vector<16x8xf32>
    %100 = vector.broadcast %24 : vector<1x8xf32> to vector<16x8xf32>
    %101 = arith.addf %99, %100 : vector<16x8xf32>
    %102 = arith.addf %91, %101 : vector<16x8xf32>
    %cst_58 = arith.constant dense<0.000000e+00> : vector<16xf32>
    %103 = vector.multi_reduction <add>, %102, %cst_58 [1] : vector<16x8xf32> to vector<16xf32>
    %104 = vector.shape_cast %103 : vector<16xf32> to vector<16x1xf32>
    %cst_59 = arith.constant 8.000000e+00 : f32
    %105 = vector.broadcast %cst_59 : f32 to vector<16x1xf32>
    %106 = arith.divf %104, %105 : vector<16x1xf32>
    %107 = vector.broadcast %106 : vector<16x1xf32> to vector<16x8xf32>
    %108 = arith.subf %102, %107 : vector<16x8xf32>
    %109 = arith.mulf %108, %108 : vector<16x8xf32>
    %cst_60 = arith.constant dense<0.000000e+00> : vector<16xf32>
    %110 = vector.multi_reduction <add>, %109, %cst_60 [1] : vector<16x8xf32> to vector<16xf32>
    %111 = vector.shape_cast %110 : vector<16xf32> to vector<16x1xf32>
    %cst_61 = arith.constant 8.000000e+00 : f32
    %112 = vector.broadcast %cst_61 : f32 to vector<16x1xf32>
    %113 = arith.divf %111, %112 : vector<16x1xf32>
    %114 = vector.broadcast %106 : vector<16x1xf32> to vector<16x8xf32>
    %115 = arith.subf %102, %114 : vector<16x8xf32>
    %cst_62 = arith.constant 9.99999974E-6 : f32
    %116 = vector.broadcast %cst_62 : f32 to vector<16x1xf32>
    %117 = arith.addf %113, %116 : vector<16x1xf32>
    %118 = math.rsqrt %117 : vector<16x1xf32>
    %119 = vector.broadcast %118 : vector<16x1xf32> to vector<16x8xf32>
    %120 = arith.mulf %115, %119 : vector<16x8xf32>
    %121 = vector.broadcast %26 : vector<1x8xf32> to vector<16x8xf32>
    %122 = arith.mulf %120, %121 : vector<16x8xf32>
    %123 = vector.broadcast %28 : vector<1x8xf32> to vector<16x8xf32>
    %124 = arith.addf %122, %123 : vector<16x8xf32>
    %c1 = arith.constant 1 : index
    %c0_63 = arith.constant 0 : index
    %c0_64 = arith.constant 0 : index
    %125 = vector.load %arg4[%c1, %c0_63, %c0_64] : memref<2x8x24xf32, #tpu.memory_space<vmem>>, vector<1x8x24xf32>
    %126 = vector.shape_cast %125 : vector<1x8x24xf32> to vector<8x24xf32>
    %c1_65 = arith.constant 1 : index
    %c0_66 = arith.constant 0 : index
    %c0_67 = arith.constant 0 : index
    %127 = vector.load %arg5[%c1_65, %c0_66, %c0_67] : memref<2x1x24xf32, #tpu.memory_space<vmem>>, vector<1x1x24xf32>
    %128 = vector.shape_cast %127 : vector<1x1x24xf32> to vector<1x24xf32>
    %c1_68 = arith.constant 1 : index
    %c0_69 = arith.constant 0 : index
    %c0_70 = arith.constant 0 : index
    %129 = vector.load %arg6[%c1_68, %c0_69, %c0_70] : memref<2x8x8xf32, #tpu.memory_space<vmem>>, vector<1x8x8xf32>
    %130 = vector.shape_cast %129 : vector<1x8x8xf32> to vector<8x8xf32>
    %c1_71 = arith.constant 1 : index
    %c0_72 = arith.constant 0 : index
    %c0_73 = arith.constant 0 : index
    %131 = vector.load %arg7[%c1_71, %c0_72, %c0_73] : memref<2x1x8xf32, #tpu.memory_space<vmem>>, vector<1x1x8xf32>
    %132 = vector.shape_cast %131 : vector<1x1x8xf32> to vector<1x8xf32>
    %c1_74 = arith.constant 1 : index
    %c0_75 = arith.constant 0 : index
    %c0_76 = arith.constant 0 : index
    %133 = vector.load %arg8[%c1_74, %c0_75, %c0_76] : memref<2x1x8xf32, #tpu.memory_space<vmem>>, vector<1x1x8xf32>
    %134 = vector.shape_cast %133 : vector<1x1x8xf32> to vector<1x8xf32>
    %c1_77 = arith.constant 1 : index
    %c0_78 = arith.constant 0 : index
    %c0_79 = arith.constant 0 : index
    %135 = vector.load %arg9[%c1_77, %c0_78, %c0_79] : memref<2x1x8xf32, #tpu.memory_space<vmem>>, vector<1x1x8xf32>
    %136 = vector.shape_cast %135 : vector<1x1x8xf32> to vector<1x8xf32>
    %c1_80 = arith.constant 1 : index
    %c0_81 = arith.constant 0 : index
    %c0_82 = arith.constant 0 : index
    %137 = vector.load %arg10[%c1_80, %c0_81, %c0_82] : memref<2x8x2048xbf16, #tpu.memory_space<vmem>>, vector<1x8x2048xbf16>
    %138 = vector.shape_cast %137 : vector<1x8x2048xbf16> to vector<8x2048xbf16>
    %c1_83 = arith.constant 1 : index
    %c0_84 = arith.constant 0 : index
    %c0_85 = arith.constant 0 : index
    %139 = vector.load %arg11[%c1_83, %c0_84, %c0_85] : memref<2x1x2048xf32, #tpu.memory_space<vmem>>, vector<1x1x2048xf32>
    %140 = vector.shape_cast %139 : vector<1x1x2048xf32> to vector<1x2048xf32>
    %c1_86 = arith.constant 1 : index
    %c0_87 = arith.constant 0 : index
    %c0_88 = arith.constant 0 : index
    %141 = vector.load %arg12[%c1_86, %c0_87, %c0_88] : memref<2x2048x8xbf16, #tpu.memory_space<vmem>>, vector<1x2048x8xbf16>
    %142 = vector.shape_cast %141 : vector<1x2048x8xbf16> to vector<2048x8xbf16>
    %c1_89 = arith.constant 1 : index
    %c0_90 = arith.constant 0 : index
    %c0_91 = arith.constant 0 : index
    %143 = vector.load %arg13[%c1_89, %c0_90, %c0_91] : memref<2x1x8xf32, #tpu.memory_space<vmem>>, vector<1x1x8xf32>
    %144 = vector.shape_cast %143 : vector<1x1x8xf32> to vector<1x8xf32>
    %c1_92 = arith.constant 1 : index
    %c0_93 = arith.constant 0 : index
    %c0_94 = arith.constant 0 : index
    %145 = vector.load %arg14[%c1_92, %c0_93, %c0_94] : memref<2x1x8xf32, #tpu.memory_space<vmem>>, vector<1x1x8xf32>
    %146 = vector.shape_cast %145 : vector<1x1x8xf32> to vector<1x8xf32>
    %c1_95 = arith.constant 1 : index
    %c0_96 = arith.constant 0 : index
    %c0_97 = arith.constant 0 : index
    %147 = vector.load %arg15[%c1_95, %c0_96, %c0_97] : memref<2x1x8xf32, #tpu.memory_space<vmem>>, vector<1x1x8xf32>
    %148 = vector.shape_cast %147 : vector<1x1x8xf32> to vector<1x8xf32>
    %cst_98 = arith.constant dense<0.000000e+00> : vector<16x24xf32>
    %149 = tpu.matmul %124, %126, %cst_98 {dimension_numbers = #tpu.dot_dimension_numbers<[1], [0], [0], [1], [0, 0, 1, 1], [], []>} : vector<16x8xf32>, vector<8x24xf32>, vector<16x24xf32> -> vector<16x24xf32>
    %150 = vector.broadcast %128 : vector<1x24xf32> to vector<16x24xf32>
    %151 = arith.addf %149, %150 : vector<16x24xf32>
    %152 = vector.extract_strided_slice %151 {offsets = [0, 0], sizes = [16, 8], strides = [1, 1]} : vector<16x24xf32> to vector<16x8xf32>
    %cst_99 = arith.constant 0.707106769 : f32
    %153 = vector.broadcast %cst_99 : f32 to vector<16x8xf32>
    %154 = arith.mulf %152, %153 : vector<16x8xf32>
    %155 = vector.shape_cast %154 : vector<16x8xf32> to vector<2x8x8xf32>
    %156 = vector.extract_strided_slice %151 {offsets = [0, 8], sizes = [16, 8], strides = [1, 1]} : vector<16x24xf32> to vector<16x8xf32>
    %157 = vector.shape_cast %156 : vector<16x8xf32> to vector<2x8x8xf32>
    %158 = vector.extract_strided_slice %151 {offsets = [0, 16], sizes = [16, 8], strides = [1, 1]} : vector<16x24xf32> to vector<16x8xf32>
    %159 = vector.shape_cast %158 : vector<16x8xf32> to vector<2x8x8xf32>
    %160 = vector.shape_cast %155 : vector<2x8x8xf32> to vector<2x8x1x8xf32>
    %161 = vector.shape_cast %157 : vector<2x8x8xf32> to vector<2x1x8x8xf32>
    %162 = vector.broadcast %160 : vector<2x8x1x8xf32> to vector<2x8x8x8xf32>
    %163 = vector.broadcast %161 : vector<2x1x8x8xf32> to vector<2x8x8x8xf32>
    %164 = arith.mulf %162, %163 : vector<2x8x8x8xf32>
    %165 = vector.shape_cast %164 : vector<2x8x8x8xf32> to vector<128x8xf32>
    %cst_100 = arith.constant dense<0.000000e+00> : vector<128x4xf32>
    %166 = tpu.matmul %165, %3, %cst_100 {dimension_numbers = #tpu.dot_dimension_numbers<[1], [0], [0], [1], [0, 0, 1, 1], [], []>} : vector<128x8xf32>, vector<8x4xf32>, vector<128x4xf32> -> vector<128x4xf32>
    %167 = vector.shape_cast %166 : vector<128x4xf32> to vector<2x8x8x4xf32>
    %cst_101 = arith.constant dense<0xFF800000> : vector<2x8x4xf32>
    %168 = vector.multi_reduction <maximumf>, %167, %cst_101 [2] : vector<2x8x8x4xf32> to vector<2x8x4xf32>
    %169 = vector.shape_cast %168 : vector<2x8x4xf32> to vector<2x8x1x4xf32>
    %170 = vector.broadcast %169 : vector<2x8x1x4xf32> to vector<2x8x8x4xf32>
    %171 = arith.subf %167, %170 : vector<2x8x8x4xf32>
    %172 = math.exp %171 : vector<2x8x8x4xf32>
    %cst_102 = arith.constant dense<0.000000e+00> : vector<2x8x4xf32>
    %173 = vector.multi_reduction <add>, %172, %cst_102 [2] : vector<2x8x8x4xf32> to vector<2x8x4xf32>
    %174 = vector.shape_cast %173 : vector<2x8x4xf32> to vector<2x8x1x4xf32>
    %175 = tpu.reciprocal %174 : vector<2x8x1x4xf32> -> vector<2x8x1x4xf32>
    %176 = vector.broadcast %175 : vector<2x8x1x4xf32> to vector<2x8x8x4xf32>
    %177 = arith.mulf %172, %176 : vector<2x8x8x4xf32>
    %178 = vector.shape_cast %177 : vector<2x8x8x4xf32> to vector<128x4xf32>
    %cst_103 = arith.constant dense<0.000000e+00> : vector<128x8xf32>
    %179 = tpu.matmul %178, %4, %cst_103 {dimension_numbers = #tpu.dot_dimension_numbers<[1], [0], [0], [1], [0, 0, 1, 1], [], []>} : vector<128x4xf32>, vector<4x8xf32>, vector<128x8xf32> -> vector<128x8xf32>
    %180 = vector.shape_cast %179 : vector<128x8xf32> to vector<2x8x8x8xf32>
    %181 = vector.shape_cast %159 : vector<2x8x8xf32> to vector<2x1x8x8xf32>
    %182 = vector.broadcast %181 : vector<2x1x8x8xf32> to vector<2x8x8x8xf32>
    %183 = arith.mulf %180, %182 : vector<2x8x8x8xf32>
    %cst_104 = arith.constant dense<0.000000e+00> : vector<2x8x8xf32>
    %184 = vector.multi_reduction <add>, %183, %cst_104 [2] : vector<2x8x8x8xf32> to vector<2x8x8xf32>
    %185 = vector.shape_cast %184 : vector<2x8x8xf32> to vector<16x8xf32>
    %cst_105 = arith.constant dense<0.000000e+00> : vector<16x8xf32>
    %186 = tpu.matmul %185, %130, %cst_105 {dimension_numbers = #tpu.dot_dimension_numbers<[1], [0], [0], [1], [0, 0, 1, 1], [], []>} : vector<16x8xf32>, vector<8x8xf32>, vector<16x8xf32> -> vector<16x8xf32>
    %187 = vector.broadcast %132 : vector<1x8xf32> to vector<16x8xf32>
    %188 = arith.addf %186, %187 : vector<16x8xf32>
    %189 = arith.addf %124, %188 : vector<16x8xf32>
    %cst_106 = arith.constant dense<0.000000e+00> : vector<16xf32>
    %190 = vector.multi_reduction <add>, %189, %cst_106 [1] : vector<16x8xf32> to vector<16xf32>
    %191 = vector.shape_cast %190 : vector<16xf32> to vector<16x1xf32>
    %cst_107 = arith.constant 8.000000e+00 : f32
    %192 = vector.broadcast %cst_107 : f32 to vector<16x1xf32>
    %193 = arith.divf %191, %192 : vector<16x1xf32>
    %194 = vector.broadcast %193 : vector<16x1xf32> to vector<16x8xf32>
    %195 = arith.subf %189, %194 : vector<16x8xf32>
    %196 = arith.mulf %195, %195 : vector<16x8xf32>
    %cst_108 = arith.constant dense<0.000000e+00> : vector<16xf32>
    %197 = vector.multi_reduction <add>, %196, %cst_108 [1] : vector<16x8xf32> to vector<16xf32>
    %198 = vector.shape_cast %197 : vector<16xf32> to vector<16x1xf32>
    %cst_109 = arith.constant 8.000000e+00 : f32
    %199 = vector.broadcast %cst_109 : f32 to vector<16x1xf32>
    %200 = arith.divf %198, %199 : vector<16x1xf32>
    %201 = vector.broadcast %193 : vector<16x1xf32> to vector<16x8xf32>
    %202 = arith.subf %189, %201 : vector<16x8xf32>
    %cst_110 = arith.constant 9.99999974E-6 : f32
    %203 = vector.broadcast %cst_110 : f32 to vector<16x1xf32>
    %204 = arith.addf %200, %203 : vector<16x1xf32>
    %205 = math.rsqrt %204 : vector<16x1xf32>
    %206 = vector.broadcast %205 : vector<16x1xf32> to vector<16x8xf32>
    %207 = arith.mulf %202, %206 : vector<16x8xf32>
    %208 = vector.broadcast %134 : vector<1x8xf32> to vector<16x8xf32>
    %209 = arith.mulf %207, %208 : vector<16x8xf32>
    %210 = vector.broadcast %136 : vector<1x8xf32> to vector<16x8xf32>
    %211 = arith.addf %209, %210 : vector<16x8xf32>
    %212 = arith.truncf %211 : vector<16x8xf32> to vector<16x8xbf16>
    %cst_111 = arith.constant dense<0.000000e+00> : vector<16x2048xf32>
    %213 = tpu.matmul %212, %138, %cst_111 {dimension_numbers = #tpu.dot_dimension_numbers<[1], [0], [0], [1], [0, 0, 1, 1], [], []>} : vector<16x8xbf16>, vector<8x2048xbf16>, vector<16x2048xf32> -> vector<16x2048xf32>
    %214 = vector.broadcast %140 : vector<1x2048xf32> to vector<16x2048xf32>
    %215 = arith.addf %213, %214 : vector<16x2048xf32>
    %cst_112 = arith.constant 0.000000e+00 : f32
    %216 = vector.broadcast %cst_112 : f32 to vector<16x2048xf32>
    %217 = arith.maximumf %215, %216 : vector<16x2048xf32>
    %218 = arith.truncf %217 : vector<16x2048xf32> to vector<16x2048xbf16>
    %cst_113 = arith.constant dense<0.000000e+00> : vector<16x8xf32>
    %219 = tpu.matmul %218, %142, %cst_113 {dimension_numbers = #tpu.dot_dimension_numbers<[1], [0], [0], [1], [0, 0, 1, 1], [], []>} : vector<16x2048xbf16>, vector<2048x8xbf16>, vector<16x8xf32> -> vector<16x8xf32>
    %220 = vector.broadcast %144 : vector<1x8xf32> to vector<16x8xf32>
    %221 = arith.addf %219, %220 : vector<16x8xf32>
    %222 = arith.addf %211, %221 : vector<16x8xf32>
    %cst_114 = arith.constant dense<0.000000e+00> : vector<16xf32>
    %223 = vector.multi_reduction <add>, %222, %cst_114 [1] : vector<16x8xf32> to vector<16xf32>
    %224 = vector.shape_cast %223 : vector<16xf32> to vector<16x1xf32>
    %cst_115 = arith.constant 8.000000e+00 : f32
    %225 = vector.broadcast %cst_115 : f32 to vector<16x1xf32>
    %226 = arith.divf %224, %225 : vector<16x1xf32>
    %227 = vector.broadcast %226 : vector<16x1xf32> to vector<16x8xf32>
    %228 = arith.subf %222, %227 : vector<16x8xf32>
    %229 = arith.mulf %228, %228 : vector<16x8xf32>
    %cst_116 = arith.constant dense<0.000000e+00> : vector<16xf32>
    %230 = vector.multi_reduction <add>, %229, %cst_116 [1] : vector<16x8xf32> to vector<16xf32>
    %231 = vector.shape_cast %230 : vector<16xf32> to vector<16x1xf32>
    %cst_117 = arith.constant 8.000000e+00 : f32
    %232 = vector.broadcast %cst_117 : f32 to vector<16x1xf32>
    %233 = arith.divf %231, %232 : vector<16x1xf32>
    %234 = vector.broadcast %226 : vector<16x1xf32> to vector<16x8xf32>
    %235 = arith.subf %222, %234 : vector<16x8xf32>
    %cst_118 = arith.constant 9.99999974E-6 : f32
    %236 = vector.broadcast %cst_118 : f32 to vector<16x1xf32>
    %237 = arith.addf %233, %236 : vector<16x1xf32>
    %238 = math.rsqrt %237 : vector<16x1xf32>
    %239 = vector.broadcast %238 : vector<16x1xf32> to vector<16x8xf32>
    %240 = arith.mulf %235, %239 : vector<16x8xf32>
    %241 = vector.broadcast %146 : vector<1x8xf32> to vector<16x8xf32>
    %242 = arith.mulf %240, %241 : vector<16x8xf32>
    %243 = vector.broadcast %148 : vector<1x8xf32> to vector<16x8xf32>
    %244 = arith.addf %242, %243 : vector<16x8xf32>
    %c0_119 = arith.constant 0 : index
    %c0_120 = arith.constant 0 : index
    %245 = vector.load %arg16[%c0_119, %c0_120] : memref<16x8xf32, #tpu.memory_space<vmem>>, vector<16x8xf32>
    tpu.vector_store %arg16[%c0_119, %c0_120], %244 {strides = array<i32>} : memref<16x8xf32, #tpu.memory_space<vmem>>, vector<16x8xf32>,
    return
  }
}

</mosaic_0001>

<bundles_post_ra>
// kernel: tpu_custom_call.1
= control target key start
LH: loop header
LB: loop body
LE: loop exit
PB: predicated region body
PF: predicated region fallthrough
CT: control target
= control target key end

     0   :  { %vm343_vm0 = vcmask 64512   ;;  %s8297_s19 = smov 112   ;;  %s8298_s20 = smov 120   ;;  %v8299_v13 = vmov 1966171168   ;;  %v433_v15 = vlaneseq  ;;  %vm1177_vm1 = vcmask 1043456   ;;  %s10037_s4 = inlined_call_operand.vmem [shape: f32[2,8,24], index: 4, kind: input, shape index: {}]   ;;  %s10038_s0 = inlined_call_operand.vmem [shape: f32[16,8], index: 0, kind: input, shape index: {}]   ;;  %s10039_s1 = inlined_call_operand.vmem [shape: f32[16,8], index: 1, kind: input, shape index: {}]   ;;  %s10040_s2 = inlined_call_operand.vmem [shape: f32[8,4], index: 2, kind: input, shape index: {}]   ;;  %s10041_s5 = inlined_call_operand.vmem [shape: f32[2,1,24], index: 5, kind: input, shape index: {}]   ;;  %s10042_s3 = inlined_call_operand.vmem [shape: f32[4,8], index: 3, kind: input, shape index: {}]   ;;  %s10043_s6 = inlined_call_operand.vmem [shape: f32[2,8,8], index: 6, kind: input, shape index: {}]   ;;  %s10044_s7 = inlined_call_operand.vmem [shape: f32[2,1,8], index: 7, kind: input, shape index: {}]   ;;  %s10045_s10 = inlined_call_operand.vmem [shape: bf16[2,8,2048], index: 10, kind: input, shape index: {}]   ;;  %s10046_s12 = inlined_call_operand.vmem [shape: bf16[2,2048,8], index: 12, kind: input, shape index: {}]   ;;  %s10047_s8 = inlined_call_operand.vmem [shape: f32[2,1,8], index: 8, kind: input, shape index: {}]   ;;  %s10048_s9 = inlined_call_operand.vmem [shape: f32[2,1,8], index: 9, kind: input, shape index: {}]   ;;  %s10049_s11 = inlined_call_operand.vmem [shape: f32[2,1,2048], index: 11, kind: input, shape index: {}]   ;;  %s10050_s13 = inlined_call_operand.vmem [shape: f32[2,1,8], index: 13, kind: input, shape index: {}]   ;;  %s10051_s14 = inlined_call_operand.vmem [shape: f32[2,1,8], index: 14, kind: input, shape index: {}]   ;;  %s10052_s15 = inlined_call_operand.vmem [shape: f32[2,1,8], index: 15, kind: input, shape index: {}]   ;;  %s10053_s16 = inlined_call_operand.vmem [shape: f32[16,8], index: 16, kind: output, shape index: {}]  }
   0x1   :  { %10055 = sst [smem:[#allocation2_spill]] %s10037_s4  ;;  %v54_v1 = vld [vmem:[%s10038_s0] sm:$0xff]  ;;  %v55_v2 = vld [vmem:[%s10038_s0 + $0x8] sm:$0xff]  ;;  %v431_v14 = vunpack.c.l.s4 %v8299_v13  ;;  %vm824_vm2 = vcmask 31744   ;;  %vm1482_vm3 = vcmask 1041409   ;;  %vm1484_vm4 = vcmask 1042434  }
   0x2   :  { %s10056_s23 = sld [smem:[#allocation2_spill]]  ;;  %v56_v3 = vld [vmem:[%s10039_s1] sm:$0xff]  ;;  %v57_v4 = vld [vmem:[%s10039_s1 + $0x8] sm:$0xff]  ;;  %v8419_v17 = vshrl.u32 %v433_v15, 7  ;;  %vm1486_vm5 = vcmask 1043459   ;;  %vm1488_vm6 = vcmask 1044484  }
   0x3   :  { %v8401_v5 = vadd.f32 %v56_v3, %v54_v1  ;;  %v8403_v6 = vadd.f32 %v57_v4, %v55_v2  ;;  %v60_v7 = vld [vmem:[%s10040_s2] sm:$0xff]  ;;  %v432_v16 = vunpack.c.0.s8 %v431_v14  ;;  %vm1490_vm7 = vcmask 1045509  }
   0x4   :  { %7740 = vmatprep.subr.mxu1 %v60_v7  ;;  %v6620_v8 = vld [vmem:[%s10041_s5] ss:$0 sm:$0xff]  ;;  %v8427_v24 = vsub.s32 0, %v8419_v17  ;;  %vm1492_vm8 = vcmask 1046534   ;;  %vm1494_vm9 = vcmask 1047559  }
   0x5   :  { %7737 = vmatprep.mubr.msk.f32.mxu0 %vm343_vm0, %v8401_v5  ;;  %7741 = vmatpush3.msra.mxu1 %v60_v7  ;;  %v8422_v18 = vsub.s32 %v432_v16, %v8419_v17 }
   0x8   :  { %v62_v0 = vld [vmem:[%s10056_s23] sm:$0xff] }
   0x9   :  { %7735 = vmatprep.subr.mxu0 %v62_v0 }
   0xa   :  { %7736 = vmatpush3.msra.mxu0 %v62_v0 }
   0xb   :  { %7738 = vmatmul.mubr.msk.f32.vlgmr.msra.gmra.mrb[0].mxu0 %vm343_vm0, %v8403_v6 }
  0xde   :  { %v7739_v9 = vpop.f32.mrb[0].mxu0 }
  0xdf   :  { %v416_v10 = vpop.f32.mrb[1].mxu0  ;;  %v422_v12 = vadd.f32 %v7739_v9, %v6620_v8 }
  0xe0   :  { %v417_v11 = vadd.f32 %v6620_v8, %v416_v10 }
  0xe1   :  { %v426_v30 = vmul.f32 0.70710677, %v422_v12 }
  0xe2   :  { %1326 = vrot.lane.b32.xlu1 %v417_v11, %s8297_s19  ;;  %609 = vrot.lane.b32.xlu0 %v417_v11, %s8298_s20  ;;  %v425_v19 = vmul.f32 0.70710677, %v417_v11 }
  0xe3   :  { %v485_v39 = vrot.slane %v426_v30, %v8422_v18  ;;  %v478_v46 = vcombine.high %v426_v30, %v426_v30 }
  0xe4   :  { %v436_v20 = vrot.slane %v425_v19, %v8422_v18  ;;  %v429_v22 = vcombine.high %v425_v19, %v425_v19 }
  0xe5   :  { %v493_v47 = vcombine.high %v485_v39, %v485_v39  ;;  %v501_v50 = vrot.slane %v485_v39, %v8422_v18  ;;  %v492_v54 = vrot.slane %v478_v46, %v8422_v18 }
  0xe6   :  { %1328 = vrot.lane.b32.xlu1 %v422_v12, %s8297_s19  ;;  %611 = vrot.lane.b32.xlu0 %v422_v12, %s8298_s20  ;;  %v444_v21 = vcombine.high %v436_v20, %v436_v20  ;;  %v452_v23 = vrot.slane %v436_v20, %v8422_v18  ;;  %v443_v26 = vrot.slane %v429_v22, %v8422_v18  ;;  %v61_v22 = vld [vmem:[%s10042_s3] sm:$0xf] }
  0xe7   :  { %v515_v55 = vrot.slane %v493_v47, %v8422_v18  ;;  %v523_v58 = vcombine.high %v501_v50, %v501_v50  ;;  %v562_v59 = vrot.slane %v501_v50, %v8427_v24  ;;  %v494_v62 = vcombine.high %v492_v54, %v492_v54  ;;  %7766 = vmatprep.subr.msk.mxu0 %vm1177_vm1, %v61_v22 }
  0xe8   :  { %v466_v25 = vrot.slane %v444_v21, %v8422_v18  ;;  %v474_v27 = vcombine.high %v452_v23, %v452_v23  ;;  %v530_v28 = vrot.slane %v452_v23, %v8427_v24  ;;  %v445_v31 = vcombine.high %v443_v26, %v443_v26  ;;  %7767 = vmatpush3.msk.msra.mxu0 %vm1177_vm1, %v61_v22 }
  0xe9   :  { %v459_v34 = vrot.slane %v443_v26, %v8422_v18  ;;  %v566_v63 = vrot.slane %v515_v55, %v8427_v24  ;;  %v525_v0 = vcombine.high %v515_v55, %v515_v55  ;;  %v508_v1 = vrot.slane %v492_v54, %v8422_v18 }
  0xea   :  { %v534_v29 = vrot.slane %v466_v25, %v8427_v24  ;;  %v476_v33 = vcombine.high %v466_v25, %v466_v25  ;;  %v538_v37 = vrot.slane %v474_v27, %v8427_v24  ;;  %v473_v41 = vrot.slane %v445_v31, %v8422_v18 }
  0xeb   :  { %v546_v42 = vrot.slane %v459_v34, %v8427_v24  ;;  %v475_v43 = vcombine.high %v459_v34, %v459_v34  ;;  %v570_v2 = vrot.slane %v523_v58, %v8427_v24  ;;  %v574_v7 = vrot.slane %v525_v0, %v8427_v24 }
  0xec   :  { %v542_v40 = vrot.slane %v476_v33, %v8427_v24  ;;  %v550_v48 = vrot.slane %v473_v41, %v8427_v24  ;;  %v477_v49 = vcombine.high %v473_v41, %v473_v41  ;;  %v522_v8 = vrot.slane %v494_v62, %v8422_v18 }
  0xed   :  { %v554_v51 = vrot.slane %v475_v43, %v8427_v24  ;;  %v578_v9 = vrot.slane %v508_v1, %v8427_v24  ;;  %v524_v10 = vcombine.high %v508_v1, %v508_v1 }
  0xee   :  { %v558_v57 = vrot.slane %v477_v49, %v8427_v24  ;;  %v582_v13 = vrot.slane %v522_v8, %v8427_v24  ;;  %v526_v14 = vcombine.high %v522_v8, %v522_v8 }
  0xef   :  { %v586_v15 = vrot.slane %v524_v10, %v8427_v24 }
  0xf0   :  { %v590_v20 = vrot.slane %v526_v14, %v8427_v24 }
 0x154   :  { %v610_v32 = vpop.permute.xlu0 %609 }
 0x155   :  { %v615_v35 = vmul.f32 %v610_v32, %v530_v28  ;;  %v616_v36 = vmul.f32 %v610_v32, %v534_v29  ;;  %v617_v38 = vmul.f32 %v610_v32, %v538_v37  ;;  %v618_v44 = vmul.f32 %v610_v32, %v542_v40 }
 0x156   :  { %v619_v45 = vmul.f32 %v610_v32, %v546_v42  ;;  %v620_v52 = vmul.f32 %v610_v32, %v550_v48  ;;  %v621_v53 = vmul.f32 %v610_v32, %v554_v51  ;;  %v622_v60 = vmul.f32 %v610_v32, %v558_v57 }
 0x157   :  { %7742 = vmatprep.mubr.msk.f32.mxu1 %vm343_vm0, %v615_v35 }
 0x158   :  { %7743 = vmatmul.mubr.msk.f32.vlgmr.msra.gmra.mrb[0].mxu1 %vm343_vm0, %v616_v36  ;;  %v612_v56 = vpop.permute.xlu0 %611 }
 0x159   :  { %7745 = vmatprep.mubr.msk.f32.mxu1 %vm343_vm0, %v617_v38  ;;  %v623_v61 = vmul.f32 %v612_v56, %v562_v59  ;;  %v624_v3 = vmul.f32 %v612_v56, %v566_v63  ;;  %v625_v4 = vmul.f32 %v612_v56, %v570_v2  ;;  %v626_v11 = vmul.f32 %v612_v56, %v574_v7 }
 0x15a   :  { %v627_v12 = vmul.f32 %v612_v56, %v578_v9  ;;  %v628_v16 = vmul.f32 %v612_v56, %v582_v13  ;;  %v629_v19 = vmul.f32 %v612_v56, %v586_v15  ;;  %v630_v21 = vmul.f32 %v612_v56, %v590_v20 }
 0x15c   :  { %7746 = vmatmul.mubr.msk.f32.gmra.mrb[2].mxu1 %vm343_vm0, %v618_v44 }
 0x15d   :  { %7748 = vmatprep.mubr.msk.f32.mxu1 %vm343_vm0, %v619_v45 }
 0x160   :  { %7749 = vmatmul.mubr.msk.f32.gmra.mrb[4].mxu1 %vm343_vm0, %v620_v52 }
 0x161   :  { %7751 = vmatprep.mubr.msk.f32.mxu1 %vm343_vm0, %v621_v53 }
 0x164   :  { %7752 = vmatmul.mubr.msk.f32.gmra.mrb[6].mxu1 %vm343_vm0, %v622_v60 }
 0x165   :  { %7754 = vmatprep.mubr.msk.f32.mxu1 %vm343_vm0, %v623_v61 }
 0x168   :  { %7755 = vmatmul.mubr.msk.f32.gmra.mrb[8].mxu1 %vm343_vm0, %v624_v3 }
 0x169   :  { %7757 = vmatprep.mubr.msk.f32.mxu1 %vm343_vm0, %v625_v4 }
 0x16c   :  { %7758 = vmatmul.mubr.msk.f32.gmra.mrb[10].mxu1 %vm343_vm0, %v626_v11 }
 0x16d   :  { %7760 = vmatprep.mubr.msk.f32.mxu1 %vm343_vm0, %v627_v12 }
 0x170   :  { %7761 = vmatmul.mubr.msk.f32.gmra.mrb[12].mxu1 %vm343_vm0, %v628_v16 }
 0x171   :  { %7763 = vmatprep.mubr.msk.f32.mxu1 %vm343_vm0, %v629_v19 }
 0x174   :  { %7764 = vmatmul.mubr.msk.f32.gmra.mrb[14].mxu1 %vm343_vm0, %v630_v21 }
 0x22b   :  { %v7744_v23 = vpop.f32.mrb[0].mxu1 }
 0x22c   :  { %v832_v25 = vsel %vm824_vm2, %v7744_v23, -inf  ;;  %v745_v26 = vpop.f32.mrb[1].mxu1 }
 0x22d   :  { %v833_v27 = vrot.slane %v832_v25, 4  ;;  %v825_v28 = vsel %vm824_vm2, %v745_v26, -inf }
 0x22e   :  { %v826_v29 = vrot.slane %v825_v28, 4 }
 0x22f   :  { %v834_v30 = vmax.f32 %v832_v25, %v833_v27  ;;  %v7747_v31 = vpop.f32.mrb[2].mxu1 }
 0x230   :  { %v827_v32 = vmax.f32 %v825_v28, %v826_v29  ;;  %v846_v33 = vsel %vm824_vm2, %v7747_v31, -inf  ;;  %v755_v34 = vpop.f32.mrb[3].mxu1 }
 0x231   :  { %v835_v35 = vrot.slane %v834_v30, 2  ;;  %v847_v36 = vrot.slane %v846_v33, 4  ;;  %v839_v37 = vsel %vm824_vm2, %v755_v34, -inf }
 0x232   :  { %v828_v38 = vrot.slane %v827_v32, 2  ;;  %v840_v39 = vrot.slane %v839_v37, 4 }
 0x233   :  { %v836_v40 = vmax.f32 %v834_v30, %v835_v35  ;;  %v848_v41 = vmax.f32 %v846_v33, %v847_v36  ;;  %v8480_v42 = vpop.f32.mrb[4].mxu1 }
 0x234   :  { %v829_v43 = vmax.f32 %v827_v32, %v828_v38  ;;  %v841_v44 = vmax.f32 %v839_v37, %v840_v39  ;;  %v860_v45 = vsel %vm824_vm2, %v8480_v42, -inf  ;;  %v8484_v46 = vpop.f32.mrb[5].mxu1 }
 0x235   :  { %v837_v47 = vrot.slane %v836_v40, 1  ;;  %v849_v48 = vrot.slane %v848_v41, 2  ;;  %v861_v49 = vrot.slane %v860_v45, 4  ;;  %v853_v50 = vsel %vm824_vm2, %v8484_v46, -inf }
 0x236   :  { %v830_v51 = vrot.slane %v829_v43, 1  ;;  %v842_v52 = vrot.slane %v841_v44, 2  ;;  %v854_v53 = vrot.slane %v853_v50, 4 }
 0x237   :  { %v838_v54 = vmax.f32 %v836_v40, %v837_v47  ;;  %v850_v55 = vmax.f32 %v848_v41, %v849_v48  ;;  %v862_v56 = vmax.f32 %v860_v45, %v861_v49  ;;  %v8488_v57 = vpop.f32.mrb[6].mxu1 }
 0x238   :  { %v831_v58 = vmax.f32 %v829_v43, %v830_v51  ;;  %v843_v59 = vmax.f32 %v841_v44, %v842_v52  ;;  %v855_v60 = vmax.f32 %v853_v50, %v854_v53  ;;  %v874_v61 = vsel %vm824_vm2, %v8488_v57, -inf  ;;  %v8492_v62 = vpop.f32.mrb[7].mxu1 }
 0x239   :  { %v938_v63 = vsub.f32 %v7744_v23, %v838_v54  ;;  %v851_v0 = vrot.slane %v850_v55, 1  ;;  %v863_v1 = vrot.slane %v862_v56, 2  ;;  %v875_v2 = vrot.slane %v874_v61, 4 }
 0x23a   :  { %v937_v3 = vsub.f32 %v745_v26, %v831_v58  ;;  %v844_v4 = vrot.slane %v843_v59, 1  ;;  %v856_v7 = vrot.slane %v855_v60, 2  ;;  %v867_v8 = vsel %vm824_vm2, %v8492_v62, -inf }
 0x23b   :  { %v955_v9 = vmul.f32 1.442695, %v938_v63  ;;  %v852_v10 = vmax.f32 %v850_v55, %v851_v0  ;;  %v864_v11 = vmax.f32 %v862_v56, %v863_v1  ;;  %v876_v12 = vmax.f32 %v874_v61, %v875_v2  ;;  %v8496_v13 = vpop.f32.mrb[8].mxu1 }
 0x23c   :  { %v953_v14 = vmul.f32 1.442695, %v937_v3  ;;  %v845_v15 = vmax.f32 %v843_v59, %v844_v4  ;;  %v857_v16 = vmax.f32 %v855_v60, %v856_v7  ;;  %v868_v19 = vrot.slane %v867_v8, 4  ;;  %v8498_v20 = vpop.f32.mrb[9].mxu1 }
 0x23d   :  { %8151 = vpow2.f32 %v955_v9  ;;  %v940_v21 = vsub.f32 %v7747_v31, %v852_v10  ;;  %v865_v22 = vrot.slane %v864_v11, 1  ;;  %v877_v23 = vrot.slane %v876_v12, 2 }
 0x23e   :  { %8153 = vpow2.f32 %v953_v14  ;;  %v939_v25 = vsub.f32 %v755_v34, %v845_v15  ;;  %v858_v26 = vrot.slane %v857_v16, 1  ;;  %v869_v27 = vmax.f32 %v867_v8, %v868_v19 }
 0x23f   :  { %v959_v28 = vmul.f32 1.442695, %v940_v21  ;;  %v866_v29 = vmax.f32 %v864_v11, %v865_v22  ;;  %v878_v30 = vmax.f32 %v876_v12, %v877_v23  ;;  %v888_v32 = vsel %vm824_vm2, %v8496_v13, -inf  ;;  %v8502_v33 = vpop.f32.mrb[10].mxu1 }
 0x240   :  { %v957_v35 = vmul.f32 1.442695, %v939_v25  ;;  %v859_v36 = vmax.f32 %v857_v16, %v858_v26  ;;  %v870_v37 = vrot.slane %v869_v27, 2  ;;  %v889_v38 = vrot.slane %v888_v32, 4  ;;  %v8504_v39 = vpop.f32.mrb[11].mxu1 }
 0x241   :  { %8155 = vpow2.f32 %v959_v28  ;;  %v942_v31 = vsub.f32 %v8480_v42, %v866_v29  ;;  %v879_v34 = vrot.slane %v878_v30, 1  ;;  %v881_v40 = vsel %vm824_vm2, %v8498_v20, -inf }
 0x242   :  { %8157 = vpow2.f32 %v957_v35  ;;  %v941_v41 = vsub.f32 %v8484_v46, %v859_v36  ;;  %v871_v43 = vmax.f32 %v869_v27, %v870_v37  ;;  %v890_v44 = vmax.f32 %v888_v32, %v889_v38 }
 0x243   :  { %v963_v45 = vmul.f32 1.442695, %v942_v31  ;;  %v880_v47 = vmax.f32 %v878_v30, %v879_v34  ;;  %v882_v48 = vrot.slane %v881_v40, 4  ;;  %v902_v49 = vsel %vm824_vm2, %v8502_v33, -inf  ;;  %v8512_v50 = vpop.f32.mrb[12].mxu1 }
 0x244   :  { %v961_v51 = vmul.f32 1.442695, %v941_v41  ;;  %v872_v52 = vrot.slane %v871_v43, 1  ;;  %v891_v42 = vrot.slane %v890_v44, 2  ;;  %v903_v53 = vrot.slane %v902_v49, 4  ;;  %v8514_v54 = vpop.f32.mrb[13].mxu1 }
 0x245   :  { %8159 = vpow2.f32 %v963_v45  ;;  %v944_v55 = vsub.f32 %v8488_v57, %v880_v47  ;;  %v883_v46 = vmax.f32 %v881_v40, %v882_v48  ;;  %v895_v0 = vsel %vm824_vm2, %v8504_v39, -inf }
 0x246   :  { %8161 = vpow2.f32 %v961_v51  ;;  %v873_v56 = vmax.f32 %v871_v43, %v872_v52  ;;  %v892_v58 = vmax.f32 %v890_v44, %v891_v42  ;;  %v904_v59 = vmax.f32 %v902_v49, %v903_v53 }
 0x247   :  { %v8517_v60 = vpop.eup %8151  ;;  %v967_v61 = vmul.f32 1.442695, %v944_v55  ;;  %v884_v63 = vrot.slane %v883_v46, 2  ;;  %v8521_v1 = vpop.f32.mrb[14].mxu1  ;;  %v896_v23 = vrot.slane %v895_v0, 4  ;;  %v916_v38 = vsel %vm824_vm2, %v8512_v50, -inf }
 0x248   :  { %v8523_v2 = vpop.eup %8153  ;;  %v992_v3 = vsel %vm824_vm2, %v8517_v60, 0.0  ;;  %v943_v57 = vsub.f32 %v8492_v62, %v873_v56  ;;  %v893_v4 = vrot.slane %v892_v58, 1  ;;  %v905_v7 = vrot.slane %v904_v59, 2  ;;  %v8528_v8 = vpop.f32.mrb[15].mxu1 }
 0x249   :  { %v993_v9 = vrot.slane %v992_v3, 4  ;;  %v985_v10 = vsel %vm824_vm2, %v8523_v2, 0.0  ;;  %8163 = vpow2.f32 %v967_v61  ;;  %v885_v11 = vmax.f32 %v883_v46, %v884_v63 }
 0x24a   :  { %v986_v12 = vrot.slane %v985_v10, 4  ;;  %v965_v14 = vmul.f32 1.442695, %v943_v57  ;;  %v894_v15 = vmax.f32 %v892_v58, %v893_v4  ;;  %v906_v22 = vmax.f32 %v904_v59, %v905_v7 }
 0x24b   :  { %v8532_v16 = vpop.eup %8155  ;;  %v994_v19 = vadd.f32 %v993_v9, %v992_v3  ;;  %v886_v21 = vrot.slane %v885_v11, 1  ;;  %v897_v47 = vmax.f32 %v895_v0, %v896_v23  ;;  %v917_v59 = vrot.slane %v916_v38, 4 }
 0x24c   :  { %v8534_v62 = vpop.eup %8157  ;;  %v987_v25 = vadd.f32 %v986_v12, %v985_v10  ;;  %v1006_v26 = vsel %vm824_vm2, %v8532_v16, 0.0  ;;  %8165 = vpow2.f32 %v965_v14  ;;  %v946_v27 = vsub.f32 %v8496_v13, %v894_v15 }
 0x24d   :  { %v995_v28 = vrot.slane %v994_v19, 2  ;;  %v1007_v29 = vrot.slane %v1006_v26, 4  ;;  %v999_v30 = vsel %vm824_vm2, %v8534_v62, 0.0  ;;  %v887_v32 = vmax.f32 %v885_v11, %v886_v21 }
 0x24e   :  { %v988_v35 = vrot.slane %v987_v25, 2  ;;  %v1000_v36 = vrot.slane %v999_v30, 4  ;;  %v971_v37 = vmul.f32 1.442695, %v946_v27  ;;  %v907_v43 = vrot.slane %v906_v22, 1 }
 0x24f   :  { %v8543_v31 = vpop.eup %8159  ;;  %v996_v34 = vadd.f32 %v995_v28, %v994_v19  ;;  %v1008_v40 = vadd.f32 %v1007_v29, %v1006_v26  ;;  %v945_v41 = vsub.f32 %v8498_v20, %v887_v32  ;;  %v898_v3 = vrot.slane %v897_v47, 2 }
 0x250   :  { %v8546_v13 = vpop.eup %8161  ;;  %v1001_v44 = vadd.f32 %v1000_v36, %v999_v30  ;;  %v1020_v45 = vsel %vm824_vm2, %v8543_v31, 0.0  ;;  %8167 = vpow2.f32 %v971_v37  ;;  %v989_v48 = vadd.f32 %v988_v35, %v987_v25 }
 0x251   :  { %v1009_v49 = vrot.slane %v1008_v40, 2  ;;  %v1021_v51 = vrot.slane %v1020_v45, 4  ;;  %v1013_v52 = vsel %vm824_vm2, %v8546_v13, 0.0  ;;  %v969_v55 = vmul.f32 1.442695, %v945_v41 }
 0x252   :  { %v1002_v42 = vrot.slane %v1001_v44, 2  ;;  %v1014_v53 = vrot.slane %v1013_v52, 4  ;;  %v997_v20 = vrot.slane %v996_v34, 1  ;;  %v908_v58 = vmax.f32 %v906_v22, %v907_v43 }
 0x253   :  { %v8552_v46 = vpop.eup %8163  ;;  %v1022_v56 = vadd.f32 %v1021_v51, %v1020_v45  ;;  %v1010_v61 = vadd.f32 %v1009_v49, %v1008_v40  ;;  %v990_v57 = vrot.slane %v989_v48, 1  ;;  %8169 = vpow2.f32 %v969_v55 }
 0x254   :  { %v1015_v63 = vadd.f32 %v1014_v53, %v1013_v52  ;;  %v1034_v0 = vsel %vm824_vm2, %v8552_v46, 0.0  ;;  %v1003_v4 = vadd.f32 %v1002_v42, %v1001_v44  ;;  %v948_v12 = vsub.f32 %v8502_v33, %v908_v58 }
 0x255   :  { %v1023_v7 = vrot.slane %v1022_v56, 2  ;;  %v1035_v9 = vrot.slane %v1034_v0, 4  ;;  %v998_v14 = vadd.f32 %v997_v20, %v996_v34  ;;  %v1011_v21 = vrot.slane %v1010_v61, 1 }
 0x256   :  { %v8556_v10 = vpop.eup %8165  ;;  %v1016_v11 = vrot.slane %v1015_v63, 2  ;;  %v975_v25 = vmul.f32 1.442695, %v948_v12  ;;  %v991_v26 = vadd.f32 %v990_v57, %v989_v48  ;;  %v1004_v27 = vrot.slane %v1003_v4, 1 }
 0x257   :  { %v1024_v15 = vadd.f32 %v1023_v7, %v1022_v56  ;;  %v1027_v19 = vsel %vm824_vm2, %v8556_v10, 0.0  ;;  %v1036_v22 = vadd.f32 %v1035_v9, %v1034_v0  ;;  %v899_v28 = vmax.f32 %v897_v47, %v898_v3 }
 0x258   :  { %v1028_v23 = vrot.slane %v1027_v19, 4  ;;  %v918_v29 = vmax.f32 %v916_v38, %v917_v59  ;;  %v1017_v32 = vadd.f32 %v1016_v11, %v1015_v63  ;;  %8171 = vpow2.f32 %v975_v25 }
 0x259   :  { %v909_v33 = vsel %vm824_vm2, %v8514_v54, -inf  ;;  %8173 = vrcp.f32 %v998_v14  ;;  %v1025_v36 = vrot.slane %v1024_v15, 1  ;;  %v900_v34 = vrot.slane %v899_v28, 1 }
 0x25a   :  { %v8561_v30 = vpop.eup %8167  ;;  %v1029_v35 = vadd.f32 %v1028_v23, %v1027_v19  ;;  %v1012_v40 = vadd.f32 %v1011_v21, %v1010_v61  ;;  %v1037_v41 = vrot.slane %v1036_v22, 2  ;;  %v919_v44 = vrot.slane %v918_v29, 2 }
 0x25b   :  { %v1048_v37 = vsel %vm824_vm2, %v8561_v30, 0.0  ;;  %v1005_v45 = vadd.f32 %v1004_v27, %v1003_v4  ;;  %v901_v38 = vmax.f32 %v899_v28, %v900_v34  ;;  %v910_v47 = vrot.slane %v909_v33, 4 }
 0x25c   :  { %v1049_v43 = vrot.slane %v1048_v37, 4  ;;  %v930_v48 = vsel %vm824_vm2, %v8521_v1, -inf  ;;  %v1018_v49 = vrot.slane %v1017_v32, 1  ;;  %v1030_v51 = vrot.slane %v1029_v35, 2 }
 0x25d   :  { %v920_v52 = vmax.f32 %v918_v29, %v919_v44  ;;  %v931_v42 = vrot.slane %v930_v48, 4  ;;  %v1026_v53 = vadd.f32 %v1025_v36, %v1024_v15  ;;  %v947_v55 = vsub.f32 %v8504_v39, %v901_v38  ;;  %v8572_v58 = vpop.eup %8169 }
 0x25e   :  { %v911_v20 = vmax.f32 %v909_v33, %v910_v47  ;;  %v923_v56 = vsel %vm824_vm2, %v8528_v8, -inf  ;;  %v1038_v59 = vadd.f32 %v1037_v41, %v1036_v22  ;;  %v1050_v61 = vadd.f32 %v1049_v43, %v1048_v37 }
 0x25f   :  { %v921_v63 = vrot.slane %v920_v52, 1  ;;  %v932_v0 = vmax.f32 %v930_v48, %v931_v42  ;;  %v1041_v3 = vsel %vm824_vm2, %v8572_v58, 0.0  ;;  %v973_v57 = vmul.f32 1.442695, %v947_v55 }
 0x260   :  { %v912_v4 = vrot.slane %v911_v20, 2  ;;  %v924_v7 = vrot.slane %v923_v56, 4  ;;  %v1019_v9 = vadd.f32 %v1018_v49, %v1017_v32  ;;  %v1031_v11 = vadd.f32 %v1030_v51, %v1029_v35 }
 0x261   :  { %v1042_v12 = vrot.slane %v1041_v3, 4  ;;  %v922_v39 = vmax.f32 %v920_v52, %v921_v63  ;;  %8175 = vpow2.f32 %v973_v57  ;;  %v933_v15 = vrot.slane %v932_v0, 2 }
 0x262   :  { %v913_v14 = vmax.f32 %v911_v20, %v912_v4  ;;  %v925_v19 = vmax.f32 %v923_v56, %v924_v7  ;;  %v8576_v21 = vpop.eup %8171  ;;  %v1051_v22 = vrot.slane %v1050_v61, 2  ;;  %8177 = vrcp.f32 %v991_v26 }
 0x263   :  { %v1043_v23 = vadd.f32 %v1042_v12, %v1041_v3  ;;  %v950_v25 = vsub.f32 %v8512_v50, %v922_v39  ;;  %v8174_v27 = vpop.eup %8173  ;;  %v1062_v28 = vsel %vm824_vm2, %v8576_v21, 0.0  ;;  %v934_v32 = vmax.f32 %v932_v0, %v933_v15 }
 0x264   :  { %v914_v29 = vrot.slane %v913_v14, 1  ;;  %v926_v35 = vrot.slane %v925_v19, 2  ;;  %v1032_v33 = vrot.slane %v1031_v11, 1  ;;  %v1063_v37 = vrot.slane %v1062_v28, 4 }
 0x265   :  { %v1044_v36 = vrot.slane %v1043_v23, 2  ;;  %v979_v34 = vmul.f32 1.442695, %v950_v25  ;;  %v1039_v41 = vrot.slane %v1038_v59, 1  ;;  %v935_v44 = vrot.slane %v934_v32, 1 }
 0x266   :  { %v915_v43 = vmax.f32 %v913_v14, %v914_v29  ;;  %v927_v38 = vmax.f32 %v925_v19, %v926_v35  ;;  %v1052_v47 = vadd.f32 %v1051_v22, %v1050_v61  ;;  %v1064_v49 = vadd.f32 %v1063_v37, %v1062_v28 }
 0x267   :  { %v1045_v48 = vadd.f32 %v1044_v36, %v1043_v23  ;;  %8179 = vpow2.f32 %v979_v34  ;;  %v936_v26 = vmax.f32 %v934_v32, %v935_v44  ;;  %v1033_v52 = vadd.f32 %v1032_v33, %v1031_v11 }
 0x268   :  { %v949_v50 = vsub.f32 %v8514_v54, %v915_v43  ;;  %v928_v51 = vrot.slane %v927_v38, 1  ;;  %8181 = vrcp.f32 %v1005_v45  ;;  %v1065_v55 = vrot.slane %v1064_v49, 2 }
 0x269   :  { %v1046_v42 = vrot.slane %v1045_v48, 1  ;;  %8183 = vrcp.f32 %v1012_v40  ;;  %v952_v56 = vsub.f32 %v8521_v1, %v936_v26  ;;  %v1040_v0 = vadd.f32 %v1039_v41, %v1038_v59 }
 0x26a   :  { %v977_v20 = vmul.f32 1.442695, %v949_v50  ;;  %v929_v63 = vmax.f32 %v927_v38, %v928_v51  ;;  %8185 = vrcp.f32 %v1019_v9  ;;  %v1053_v3 = vrot.slane %v1052_v47, 1 }
 0x26b   :  { %8187 = vrcp.f32 %v1026_v53  ;;  %v8583_v61 = vpop.eup %8175  ;;  %v983_v57 = vmul.f32 1.442695, %v952_v56  ;;  %v1047_v45 = vadd.f32 %v1046_v42, %v1045_v48  ;;  %v1066_v7 = vadd.f32 %v1065_v55, %v1064_v49 }
 0x26c   :  { %8189 = vpow2.f32 %v977_v20  ;;  %v951_v54 = vsub.f32 %v8528_v8, %v929_v63  ;;  %v8178_v4 = vpop.eup %8177  ;;  %v1055_v40 = vsel %vm824_vm2, %v8583_v61, 0.0  ;;  %v1054_v9 = vadd.f32 %v1053_v3, %v1052_v47 }
 0x26d   :  { %8191 = vrcp.f32 %v1033_v52  ;;  %v1056_v11 = vrot.slane %v1055_v40, 4  ;;  %v1113_v59 = vmul.f32 %v8178_v4, %v8523_v2  ;;  %v1114_v53 = vmul.f32 %v8174_v27, %v8517_v60 }
 0x26e   :  { %8193 = vpow2.f32 %v983_v57  ;;  %v981_v1 = vmul.f32 1.442695, %v951_v54  ;;  %v1067_v39 = vrot.slane %v1066_v7, 1 }
 0x26f   :  { %8195 = vrcp.f32 %v1040_v0  ;;  %v1057_v12 = vadd.f32 %v1056_v11, %v1055_v40  ;;  %7768 = vmatprep.mubr.msk.f32.mxu0 %vm824_vm2, %v1113_v59 }
 0x270   :  { %8197 = vpow2.f32 %v981_v1  ;;  %7769 = vmatmul.mubr.msk.f32.vlgmr.msra.gmra.mrb[2].mxu0 %vm824_vm2, %v1114_v53  ;;  %v1068_v29 = vadd.f32 %v1067_v39, %v1066_v7 }
 0x271   :  { %v8591_v8 = vpop.eup %8179  ;;  %8199 = vrcp.f32 %v1047_v45  ;;  %v1058_v15 = vrot.slane %v1057_v12, 2 }
 0x272   :  { %v8182_v14 = vpop.eup %8181  ;;  %v1076_v19 = vsel %vm824_vm2, %v8591_v8, 0.0  ;;  %8201 = vrcp.f32 %v1054_v9 }
 0x273   :  { %v8184_v2 = vpop.eup %8183  ;;  %v1077_v22 = vrot.slane %v1076_v19, 4  ;;  %v1115_v60 = vmul.f32 %v8182_v14, %v8534_v62  ;;  %v1059_v25 = vadd.f32 %v1058_v15, %v1057_v12  ;;  %8203 = vrcp.f32 %v1068_v29 }
 0x274   :  { %v8186_v23 = vpop.eup %8185  ;;  %v1116_v27 = vmul.f32 %v8184_v2, %v8532_v16 }
 0x275   :  { %v8188_v28 = vpop.eup %8187  ;;  %v1078_v32 = vadd.f32 %v1077_v22, %v1076_v19  ;;  %7771 = vmatprep.mubr.msk.f32.mxu0 %vm824_vm2, %v1115_v60  ;;  %v1117_v35 = vmul.f32 %v8186_v23, %v8546_v13  ;;  %v1060_v36 = vrot.slane %v1059_v25, 1 }
 0x276   :  { %v8190_v33 = vpop.eup %8189  ;;  %7772 = vmatmul.mubr.msk.f32.gmra.mrb[4].mxu0 %vm824_vm2, %v1116_v27  ;;  %v1118_v44 = vmul.f32 %v8188_v28, %v8543_v31 }
 0x277   :  { %v8192_v37 = vpop.eup %8191  ;;  %v1079_v34 = vrot.slane %v1078_v32, 2  ;;  %v1069_v62 = vsel %vm824_vm2, %v8190_v33, 0.0  ;;  %7774 = vmatprep.mubr.msk.f32.mxu0 %vm824_vm2, %v1117_v35  ;;  %v1061_v43 = vadd.f32 %v1060_v36, %v1059_v25  ;;  %v1327_v25 = vpop.permute.xlu1 %1326 }
 0x278   :  { %v8194_v41 = vpop.eup %8193  ;;  %v1070_v16 = vrot.slane %v1069_v62, 4  ;;  %v1119_v38 = vmul.f32 %v8192_v37, %v8556_v10 }
 0x279   :  { %v8196_v47 = vpop.eup %8195  ;;  %v1080_v48 = vadd.f32 %v1079_v34, %v1078_v32  ;;  %v1090_v13 = vsel %vm824_vm2, %v8194_v41, 0.0  ;;  %8205 = vrcp.f32 %v1061_v43 }
 0x27a   :  { %v8198_v49 = vpop.eup %8197  ;;  %v1071_v50 = vadd.f32 %v1070_v16, %v1069_v62  ;;  %v1091_v26 = vrot.slane %v1090_v13, 4  ;;  %7775 = vmatmul.mubr.msk.f32.gmra.mrb[6].mxu0 %vm824_vm2, %v1118_v44  ;;  %v1120_v31 = vmul.f32 %v8196_v47, %v8552_v46 }
 0x27b   :  { %v8200_v51 = vpop.eup %8199  ;;  %v1081_v52 = vrot.slane %v1080_v48, 1  ;;  %v1083_v42 = vsel %vm824_vm2, %v8198_v49, 0.0  ;;  %7777 = vmatprep.mubr.msk.f32.mxu0 %vm824_vm2, %v1119_v38 }
 0x27c   :  { %v1072_v10 = vrot.slane %v1071_v50, 2  ;;  %v1092_v55 = vadd.f32 %v1091_v26, %v1090_v13  ;;  %v1084_v20 = vrot.slane %v1083_v42, 4  ;;  %v1121_v56 = vmul.f32 %v8200_v51, %v8572_v58  ;;  %v8202_v63 = vpop.eup %8201 }
 0x27d   :  { %v1082_v54 = vadd.f32 %v1081_v52, %v1080_v48  ;;  %v1122_v40 = vmul.f32 %v8202_v63, %v8561_v30  ;;  %v8204_v58 = vpop.eup %8203 }
 0x27e   :  { %v1073_v0 = vadd.f32 %v1072_v10, %v1071_v50  ;;  %v1093_v3 = vrot.slane %v1092_v55, 2  ;;  %v1085_v57 = vadd.f32 %v1084_v20, %v1083_v42  ;;  %7778 = vmatmul.mubr.msk.f32.gmra.mrb[8].mxu0 %vm824_vm2, %v1120_v31  ;;  %v1124_v14 = vmul.f32 %v8204_v58, %v8576_v21  ;;  %v64_v21 = vld [vmem:[%s10043_s6] sm:$0xff] }
 0x27f   :  { %7780 = vmatprep.mubr.msk.f32.mxu0 %vm824_vm2, %v1121_v56  ;;  %8207 = vrcp.f32 %v1082_v54  ;;  %7792 = vmatprep.subr.mxu1 %v64_v21 }
 0x280   :  { %v1074_v4 = vrot.slane %v1073_v0, 1  ;;  %v1094_v45 = vadd.f32 %v1093_v3, %v1092_v55  ;;  %v1086_v7 = vrot.slane %v1085_v57, 2  ;;  %7793 = vmatpush3.msra.mxu1 %v64_v21 }
 0x282   :  { %v1075_v46 = vadd.f32 %v1074_v4, %v1073_v0  ;;  %v1095_v11 = vrot.slane %v1094_v45, 1  ;;  %v1087_v1 = vadd.f32 %v1086_v7, %v1085_v57  ;;  %7781 = vmatmul.mubr.msk.f32.gmra.mrb[10].mxu0 %vm824_vm2, %v1122_v40 }
 0x283   :  { %v8206_v59 = vpop.eup %8205 }
 0x284   :  { %v1096_v9 = vadd.f32 %v1095_v11, %v1094_v45  ;;  %v1088_v53 = vrot.slane %v1087_v1, 1  ;;  %8209 = vrcp.f32 %v1075_v46  ;;  %v1123_v12 = vmul.f32 %v8206_v59, %v8583_v61 }
 0x286   :  { %v1089_v39 = vadd.f32 %v1088_v53, %v1087_v1  ;;  %7783 = vmatprep.mubr.msk.f32.mxu0 %vm824_vm2, %v1123_v12  ;;  %8211 = vrcp.f32 %v1096_v9 }
 0x287   :  { %7784 = vmatmul.mubr.msk.f32.gmra.mrb[12].mxu0 %vm824_vm2, %v1124_v14 }
 0x288   :  { %8213 = vrcp.f32 %v1089_v39  ;;  %v8634_v39 = vpop.permute.xlu1 %1328 }
 0x289   :  { %v8208_v30 = vpop.eup %8207 }
 0x28a   :  { %v1126_v2 = vmul.f32 %v8208_v30, %v8591_v8 }
 0x28e   :  { %v8210_v15 = vpop.eup %8209 }
 0x28f   :  { %v1125_v19 = vmul.f32 %v8210_v15, %v8190_v33 }
 0x290   :  { %v8212_v22 = vpop.eup %8211 }
 0x291   :  { %7786 = vmatprep.mubr.msk.f32.mxu0 %vm824_vm2, %v1125_v19  ;;  %v1128_v23 = vmul.f32 %v8212_v22, %v8194_v41 }
 0x292   :  { %v8214_v60 = vpop.eup %8213  ;;  %7787 = vmatmul.mubr.msk.f32.gmra.mrb[14].mxu0 %vm824_vm2, %v1126_v2 }
 0x293   :  { %v1127_v61 = vmul.f32 %v8214_v60, %v8198_v49 }
 0x295   :  { %7789 = vmatprep.mubr.msk.f32.mxu0 %vm824_vm2, %v1127_v61 }
 0x296   :  { %7790 = vmatmul.mubr.msk.f32.gmra.mrb[16].mxu0 %vm824_vm2, %v1128_v23 }
 0x343   :  { %v7770_v8 = vpop.f32.mrb[2].mxu0 }
 0x344   :  { %v1333_v27 = vmul.f32 %v7770_v8, %v1327_v25  ;;  %v1247_v28 = vpop.f32.mrb[3].mxu0 }
 0x345   :  { %v1332_v29 = vmul.f32 %v1327_v25, %v1247_v28 }
 0x346   :  { %v1355_v32 = vsel %vm343_vm0, %v1333_v27, 0.0 }
 0x347   :  { %v1356_v35 = vrot.slane %v1355_v32, 4  ;;  %v1348_v33 = vsel %vm343_vm0, %v1332_v29, 0.0 }
 0x348   :  { %v1349_v36 = vrot.slane %v1348_v33, 4 }
 0x349   :  { %v7773_v37 = vpop.f32.mrb[4].mxu0  ;;  %v1357_v34 = vadd.f32 %v1356_v35, %v1355_v32 }
 0x34a   :  { %v1335_v62 = vmul.f32 %v7773_v37, %v1327_v25  ;;  %v1257_v41 = vpop.f32.mrb[5].mxu0  ;;  %v1350_v43 = vadd.f32 %v1349_v36, %v1348_v33 }
 0x34b   :  { %v1334_v16 = vmul.f32 %v1327_v25, %v1257_v41  ;;  %v1358_v44 = vrot.slane %v1357_v34, 2 }
 0x34c   :  { %v1369_v38 = vsel %vm343_vm0, %v1335_v62, 0.0  ;;  %v1351_v47 = vrot.slane %v1350_v43, 2 }
 0x34d   :  { %v1370_v48 = vrot.slane %v1369_v38, 4  ;;  %v1362_v13 = vsel %vm343_vm0, %v1334_v16, 0.0  ;;  %v7776_v49 = vpop.f32.mrb[6].mxu0  ;;  %v1359_v50 = vadd.f32 %v1358_v44, %v1357_v34 }
 0x34e   :  { %v1363_v26 = vrot.slane %v1362_v13, 4  ;;  %v1337_v51 = vmul.f32 %v7776_v49, %v1327_v25  ;;  %v1267_v52 = vpop.f32.mrb[7].mxu0  ;;  %v1352_v42 = vadd.f32 %v1351_v47, %v1350_v43 }
 0x34f   :  { %v1371_v31 = vadd.f32 %v1370_v48, %v1369_v38  ;;  %v1336_v10 = vmul.f32 %v1327_v25, %v1267_v52  ;;  %v1360_v55 = vrot.slane %v1359_v50, 1 }
 0x350   :  { %v1364_v20 = vadd.f32 %v1363_v26, %v1362_v13  ;;  %v1383_v56 = vsel %vm343_vm0, %v1337_v51, 0.0  ;;  %v1353_v63 = vrot.slane %v1352_v42, 1 }
 0x351   :  { %v1372_v0 = vrot.slane %v1371_v31, 2  ;;  %v1384_v3 = vrot.slane %v1383_v56, 4  ;;  %v1376_v57 = vsel %vm343_vm0, %v1336_v10, 0.0  ;;  %v7779_v54 = vpop.f32.mrb[8].mxu0  ;;  %v1361_v4 = vadd.f32 %v1360_v55, %v1359_v50 }
 0x352   :  { %v1365_v45 = vrot.slane %v1364_v20, 2  ;;  %v1377_v7 = vrot.slane %v1376_v57, 4  ;;  %v1339_v40 = vmul.f32 %v7779_v54, %v1327_v25  ;;  %v1277_v46 = vpop.f32.mrb[9].mxu0  ;;  %v1354_v11 = vadd.f32 %v1353_v63, %v1352_v42 }
 0x353   :  { %v1373_v1 = vadd.f32 %v1372_v0, %v1371_v31  ;;  %v1385_v58 = vadd.f32 %v1384_v3, %v1383_v56  ;;  %v1338_v59 = vmul.f32 %v1327_v25, %v1277_v46 }
 0x354   :  { %v1366_v9 = vadd.f32 %v1365_v45, %v1364_v20  ;;  %v1378_v53 = vadd.f32 %v1377_v7, %v1376_v57  ;;  %v1397_v12 = vsel %vm343_vm0, %v1339_v40, 0.0  ;;  %v1483_v14 = vsel %vm1482_vm3, %v1361_v4, %v1354_v11 }
 0x355   :  { %v1374_v30 = vrot.slane %v1373_v1, 1  ;;  %v1386_v15 = vrot.slane %v1385_v58, 2  ;;  %v1398_v19 = vrot.slane %v1397_v12, 4  ;;  %v7782_v2 = vpop.f32.mrb[10].mxu0  ;;  %v1390_v61 = vsel %vm343_vm0, %v1338_v59, 0.0 }
 0x356   :  { %v1367_v22 = vrot.slane %v1366_v9, 1  ;;  %v1379_v60 = vrot.slane %v1378_v53, 2  ;;  %v1341_v23 = vmul.f32 %v7782_v2, %v8634_v39  ;;  %v1287_v21 = vpop.f32.mrb[11].mxu0  ;;  %v1391_v27 = vrot.slane %v1390_v61, 4 }
 0x357   :  { %v1387_v25 = vadd.f32 %v1386_v15, %v1385_v58  ;;  %v1399_v8 = vadd.f32 %v1398_v19, %v1397_v12  ;;  %v1340_v35 = vmul.f32 %v8634_v39, %v1287_v21  ;;  %v1375_v62 = vadd.f32 %v1374_v30, %v1373_v1 }
 0x358   :  { %v1368_v28 = vadd.f32 %v1367_v22, %v1366_v9  ;;  %v1380_v29 = vadd.f32 %v1379_v60, %v1378_v53  ;;  %v1411_v32 = vsel %vm343_vm0, %v1341_v23, 0.0  ;;  %v1392_v37 = vadd.f32 %v1391_v27, %v1390_v61 }
 0x359   :  { %v1388_v33 = vrot.slane %v1387_v25, 1  ;;  %v1400_v36 = vrot.slane %v1399_v8, 2  ;;  %v1412_v34 = vrot.slane %v1411_v32, 4  ;;  %v1404_v16 = vsel %vm343_vm0, %v1340_v35, 0.0 }
 0x35a   :  { %v1485_v41 = vsel %vm1484_vm4, %v1368_v28, %v1483_v14  ;;  %v1381_v43 = vrot.slane %v1380_v29, 1  ;;  %v1393_v38 = vrot.slane %v1392_v37, 2  ;;  %v7785_v48 = vpop.f32.mrb[12].mxu0  ;;  %v1405_v49 = vrot.slane %v1404_v16, 4 }
 0x35b   :  { %v1401_v44 = vadd.f32 %v1400_v36, %v1399_v8  ;;  %v1413_v47 = vadd.f32 %v1412_v34, %v1411_v32  ;;  %v1343_v50 = vmul.f32 %v7785_v48, %v8634_v39  ;;  %v1297_v26 = vpop.f32.mrb[13].mxu0  ;;  %v1487_v51 = vsel %vm1486_vm5, %v1375_v62, %v1485_v41 }
 0x35c   :  { %v1382_v13 = vadd.f32 %v1381_v43, %v1380_v29  ;;  %v1389_v52 = vadd.f32 %v1388_v33, %v1387_v25  ;;  %v1394_v42 = vadd.f32 %v1393_v38, %v1392_v37  ;;  %v1342_v10 = vmul.f32 %v8634_v39, %v1297_v26 }
 0x35d   :  { %v1414_v31 = vrot.slane %v1413_v47, 2  ;;  %v1402_v55 = vrot.slane %v1401_v44, 1  ;;  %v1406_v20 = vadd.f32 %v1405_v49, %v1404_v16  ;;  %v1425_v56 = vsel %vm343_vm0, %v1343_v50, 0.0 }
 0x35e   :  { %v1489_v63 = vsel %vm1488_vm6, %v1382_v13, %v1487_v51  ;;  %v1395_v0 = vrot.slane %v1394_v42, 1  ;;  %v1426_v57 = vrot.slane %v1425_v56, 4  ;;  %v1418_v4 = vsel %vm343_vm0, %v1342_v10, 0.0 }
 0x35f   :  { %v1415_v3 = vadd.f32 %v1414_v31, %v1413_v47  ;;  %v1407_v54 = vrot.slane %v1406_v20, 2  ;;  %v1491_v45 = vsel %vm1490_vm7, %v1389_v52, %v1489_v63  ;;  %v1419_v11 = vrot.slane %v1418_v4, 4 }
 0x360   :  { %v1396_v7 = vadd.f32 %v1395_v0, %v1394_v42  ;;  %v1427_v46 = vadd.f32 %v1426_v57, %v1425_v56  ;;  %v1403_v1 = vadd.f32 %v1402_v55, %v1401_v44 }
 0x361   :  { %v1416_v40 = vrot.slane %v1415_v3, 1  ;;  %v1408_v58 = vadd.f32 %v1407_v54, %v1406_v20  ;;  %v1420_v9 = vadd.f32 %v1419_v11, %v1418_v4 }
 0x362   :  { %v1428_v59 = vrot.slane %v1427_v46, 2  ;;  %v1493_v53 = vsel %vm1492_vm8, %v1396_v7, %v1491_v45 }
 0x363   :  { %v1417_v12 = vadd.f32 %v1416_v40, %v1415_v3  ;;  %v1409_v14 = vrot.slane %v1408_v58, 1  ;;  %v1495_v30 = vsel %vm1494_vm9, %v1403_v1, %v1493_v53  ;;  %v1421_v19 = vrot.slane %v1420_v9, 2  ;;  %v6656_v1 = vld [vmem:[%s10044_s7] ss:$0 sm:$0xff] }
 0x364   :  { %v1429_v15 = vadd.f32 %v1428_v59, %v1427_v46  ;;  %7794 = vmatprep.mubr.msk.f32.mxu1 %vm343_vm0, %v1495_v30 }
 0x365   :  { %v7788_v2 = vpop.f32.mrb[14].mxu0  ;;  %v1410_v22 = vadd.f32 %v1409_v14, %v1408_v58  ;;  %v1422_v23 = vadd.f32 %v1421_v19, %v1420_v9  ;;  %v68_v19 = vld [vmem:[%s10045_s10] sm:$0xff] }
 0x366   :  { %v1345_v60 = vmul.f32 %v7788_v2, %v8634_v39  ;;  %v1307_v61 = vpop.f32.mrb[15].mxu0  ;;  %v1430_v8 = vrot.slane %v1429_v15, 1  ;;  %v6662_v2 = vcombine.high %v68_v19, %v68_v19 }
 0x367   :  { %v1344_v21 = vmul.f32 %v8634_v39, %v1307_v61  ;;  %v1496_v25 = vsel %vm1482_vm3, %v1417_v12, %v1410_v22  ;;  %v1423_v28 = vrot.slane %v1422_v23, 1  ;;  %v6661_v22 = vcombine.low %v68_v19, %v68_v19  ;;  %v7880_v19 = vld [vmem:[%s10046_s12 + $0xc0] sm:$0xff]  }
 0x368   :  { %v1439_v27 = vsel %vm343_vm0, %v1345_v60, 0.0  ;;  %v1431_v43 = vadd.f32 %v1430_v8, %v1429_v15  ;;  %6677 = vmatprep.subr.msk.bf16.mxu0 %vm1177_vm1, %v6662_v2  ;;  %v7881_v2 = vld [vmem:[%s10046_s12] sm:$0xff]  }
 0x369   :  { %v1440_v29 = vrot.slane %v1439_v27, 4  ;;  %v1432_v32 = vsel %vm343_vm0, %v1344_v21, 0.0  ;;  %v7791_v35 = vpop.f32.mrb[16].mxu0  ;;  %v1424_v34 = vadd.f32 %v1423_v28, %v1422_v23  ;;  %v1754_v60 = vsel %vm1177_vm1, %v6661_v22, 0  ;;  %v7882_v22 = vld [vmem:[%s10046_s12 + $0x80] sm:$0xff]  }
 0x36a   :  { %v1433_v33 = vrot.slane %v1432_v32, 4  ;;  %v1347_v36 = vmul.f32 %v7791_v35, %v8634_v39  ;;  %v1317_v37 = vpop.f32.mrb[17].mxu0  ;;  %1802 = vmatpush1.bf16.msra.mxu0 %v1754_v60  ;;  %v7883_v60 = vld [vmem:[%s10046_s12 + $0x48] sm:$0xff]  }
 0x36b   :  { %v1441_v62 = vadd.f32 %v1440_v29, %v1439_v27  ;;  %v1346_v41 = vmul.f32 %v8634_v39, %v1317_v37  ;;  %v1497_v38 = vsel %vm1484_vm4, %v1424_v34, %v1496_v25  ;;  %v8300_v37 = vmov 0   ;;  %v70_v34 = vld [vmem:[%s10045_s10 + $0x10] sm:$0xff] }
 0x36c   :  { %v1434_v16 = vadd.f32 %v1433_v33, %v1432_v32  ;;  %v1453_v44 = vsel %vm343_vm0, %v1347_v36, 0.0  ;;  %v1498_v50 = vsel %vm1486_vm5, %v1431_v43, %v1497_v38  ;;  %v69_v32 = vld [vmem:[%s10045_s10 + $0x8] sm:$0xff]  ;;  %1833 = vmatprep.mubr.bf16.mxu0 %v8300_v37  ;;  %v6665_v38 = vcombine.low %v70_v34, %v70_v34 }
 0x36d   :  { %v1442_v47 = vrot.slane %v1441_v62, 2  ;;  %v1454_v48 = vrot.slane %v1453_v44, 4  ;;  %v1446_v13 = vsel %vm343_vm0, %v1346_v41, 0.0  ;;  %v6664_v35 = vcombine.high %v69_v32, %v69_v32 }
 0x36e   :  { %v1435_v49 = vrot.slane %v1434_v16, 2  ;;  %v1447_v26 = vrot.slane %v1446_v13, 4  ;;  %v6663_v33 = vcombine.low %v69_v32, %v69_v32  ;;  %v6666_v41 = vcombine.high %v70_v34, %v70_v34  ;;  %v7894_v32 = vld [vmem:[%s10046_s12 + $0x98] sm:$0xff]   ;;  %v7898_v34 = vld [vmem:[%s10046_s12 + $0xa0] sm:$0xff]  }
 0x36f   :  { %v1443_v51 = vadd.f32 %v1442_v47, %v1441_v62  ;;  %v1455_v52 = vadd.f32 %v1454_v48, %v1453_v44  ;;  %6679 = vmatprep.subr.msk.bf16.mxu1 %vm1177_vm1, %v6664_v35  ;;  %v71_v62 = vld [vmem:[%s10045_s10 + $0x18] sm:$0xff]  ;;  %v73_v44 = vld [vmem:[%s10045_s10 + $0x28] sm:$0xff]  ;;  %v7895_v35 = vld [vmem:[%s10046_s12 + $0x60] sm:$0xff]  }
 0x370   :  { %v1436_v42 = vadd.f32 %v1435_v49, %v1434_v16  ;;  %v1448_v31 = vadd.f32 %v1447_v26, %v1446_v13  ;;  %v1760_v36 = vsel %vm1177_vm1, %v6663_v33, 0  ;;  %v6668_v43 = vcombine.high %v71_v62, %v71_v62  ;;  %6681 = vmatprep.subr.msk.bf16.mxu0 %vm1177_vm1, %v6666_v41  ;;  %v72_v16 = vld [vmem:[%s10045_s10 + $0x20] sm:$0xff]  ;;  %v7900_v41 = vld [vmem:[%s10046_s12 + $0xe8] sm:$0xff]  }
 0x371   :  { %v1444_v10 = vrot.slane %v1443_v51, 1  ;;  %v1456_v39 = vrot.slane %v1455_v52, 2  ;;  %v6667_v47 = vcombine.low %v71_v62, %v71_v62  ;;  %v6669_v48 = vcombine.low %v72_v16, %v72_v16  ;;  %v7896_v33 = vld [vmem:[%s10046_s12 + $0xe0] sm:$0xff]   ;;  %v7899_v62 = vld [vmem:[%s10046_s12 + $0x68] sm:$0xff]  }
 0x372   :  { %v1437_v55 = vrot.slane %v1436_v42, 1  ;;  %v1449_v20 = vrot.slane %v1448_v31, 2  ;;  %v6671_v13 = vcombine.low %v73_v44, %v73_v44  ;;  %v1766_v49 = vsel %vm1177_vm1, %v6665_v38, 0  ;;  %v7904_v38 = vld [vmem:[%s10046_s12 + $0xf0] sm:$0xff]  }
 0x373   :  { %v1457_v56 = vadd.f32 %v1456_v39, %v1455_v52  ;;  %v1445_v3 = vadd.f32 %v1444_v10, %v1443_v51  ;;  %v1778_v26 = vsel %vm1177_vm1, %v6669_v48, 0  ;;  %v74_v52 = vld [vmem:[%s10045_s10 + $0x30] sm:$0xff] }
 0x374   :  { %v1438_v63 = vadd.f32 %v1437_v55, %v1436_v42  ;;  %v1450_v0 = vadd.f32 %v1449_v20, %v1448_v31  ;;  %v1784_v51 = vsel %vm1177_vm1, %v6671_v13, 0  ;;  %v75_v42 = vld [vmem:[%s10045_s10 + $0x38] sm:$0xff]  ;;  %v6673_v31 = vcombine.low %v74_v52, %v74_v52  ;;  %v7906_v48 = vld [vmem:[%s10046_s12 + $0xb0] sm:$0xff]  }
 0x375   :  { %v1458_v57 = vrot.slane %v1457_v56, 1  ;;  %v6675_v20 = vcombine.low %v75_v42, %v75_v42  ;;  %v7907_v13 = vld [vmem:[%s10046_s12 + $0x78] sm:$0xff]  }
 0x376   :  { %v1499_v54 = vsel %vm1488_vm6, %v1438_v63, %v1498_v50  ;;  %v1451_v4 = vrot.slane %v1450_v0, 1  ;;  %v1772_v50 = vsel %vm1177_vm1, %v6667_v47, 0  ;;  %v1790_v55 = vsel %vm1177_vm1, %v6673_v31, 0  ;;  %v7905_v47 = vld [vmem:[%s10046_s12 + $0x30] sm:$0xff]   ;;  %v76_v31 = vld [vmem:[%s10049_s11] sm:$0xff] }
 0x377   :  { %v1500_v45 = vsel %vm1490_vm7, %v1445_v3, %v1499_v54  ;;  %v1459_v40 = vadd.f32 %v1458_v57, %v1457_v56  ;;  %v1796_v3 = vsel %vm1177_vm1, %v6675_v20, 0 }
 0x378   :  { %v1452_v7 = vadd.f32 %v1451_v4, %v1450_v0  ;;  %v6659_v4 = vld [vmem:[%s10047_s8] ss:$0 sm:$0xff] }
 0x37a   :  { %v1501_v46 = vsel %vm1492_vm8, %v1452_v7, %v1500_v45 }
 0x37b   :  { %v1502_v11 = vsel %vm1494_vm9, %v1459_v40, %v1501_v46  ;;  %v6660_v40 = vld [vmem:[%s10048_s9] ss:$0 sm:$0xff] }
 0x37c   :  { %7795 = vmatmul.mubr.msk.f32.vlgmr.msra.gmra.mrb[16].mxu1 %vm343_vm0, %v1502_v11 }
 0x37d   :  { %1845 = vmatpush1.bf16.msra.mxu1 %v1760_v36  ;;  %1876 = vmatprep.mubr.bf16.mxu1 %v8300_v37  ;;  %v7897_v36 = vld [vmem:[%s10046_s12 + $0x20] sm:$0xff]  }
 0x37e   :  { %6683 = vmatprep.subr.msk.bf16.mxu1 %vm1177_vm1, %v6668_v43  ;;  %v7901_v43 = vld [vmem:[%s10046_s12 + $0x28] sm:$0xff]  }
 0x44f   :  { %v7796_v58 = vpop.f32.mrb[16].mxu1 }
 0x450   :  { %v1579_v59 = vadd.f32 %v7796_v58, %v6656_v1  ;;  %v1573_v9 = vpop.f32.mrb[17].mxu1 }
 0x451   :  { %v1574_v53 = vadd.f32 %v6656_v1, %v1573_v9 }
 0x452   :  { %v1583_v12 = vadd.f32 %v1579_v59, %v8403_v6 }
 0x453   :  { %v1582_v14 = vadd.f32 %v1574_v53, %v8401_v5  ;;  %v6670_v53 = vcombine.high %v72_v16, %v72_v16  ;;  %v7902_v16 = vld [vmem:[%s10046_s12 + $0xa8] sm:$0xff]  }
 0x454   :  { %v1587_v30 = vsel %vm343_vm0, %v1583_v12, 0.0 }
 0x455   :  { %1588 = vadd.xlane.f32.xlu1 %v1587_v30  ;;  %v1584_v15 = vsel %vm343_vm0, %v1582_v14, 0.0  ;;  %v6676_v30 = vcombine.high %v75_v42, %v75_v42  ;;  %v8849_v42 = vsub.s32 2, %v8419_v17 }
 0x456   :  { %1585 = vadd.xlane.f32.xlu0 %v1584_v15  ;;  %v7879_v15 = vld [vmem:[%s10046_s12 + $0x40] sm:$0xff]  }
 0x457   :  { %v1641_v20 = vrot.slane %v76_v31, %v8849_v42 }
 0x4e2   :  { %v1589_v6 = vpop.xlane.xlu1 %1588 }
 0x4e3   :  { %v1592_v61 = vmul.f32 0.125, %v1589_v6  ;;  %v1586_v5 = vpop.xlane.xlu0 %1585  ;;  %v7884_v6 = vld [vmem:[%s10046_s12 + $0xc8] sm:$0xff]  }
 0x4e4   :  { %v1591_v23 = vmul.f32 0.125, %v1586_v5  ;;  %v7886_v5 = vld [vmem:[%s10046_s12 + $0x88] sm:$0xff]  }
 0x4e5   :  { %v1594_v21 = vsub.f32 %v1583_v12, %v1592_v61  ;;  %v6672_v12 = vcombine.high %v73_v44, %v73_v44  ;;  %v7885_v61 = vld [vmem:[%s10046_s12 + $0x8] sm:$0xff]   ;;  %v7903_v44 = vld [vmem:[%s10046_s12 + $0x70] sm:$0xff]  }
 0x4e6   :  { %v1593_v25 = vsub.f32 %v1582_v14, %v1591_v23  ;;  %v6674_v14 = vcombine.high %v74_v52, %v74_v52  ;;  %v7887_v23 = vld [vmem:[%s10046_s12 + $0x50] sm:$0xff]   ;;  %v7912_v52 = vld [vmem:[%s10046_s12 + $0x1c0] sm:$0xff]  }
 0x4e7   :  { %v1596_v28 = vmul.f32 %v1594_v21, %v1594_v21 }
 0x4e8   :  { %v1595_v8 = vmul.f32 %v1593_v25, %v1593_v25 }
 0x4e9   :  { %v1600_v29 = vsel %vm343_vm0, %v1596_v28, 0.0  ;;  %v7892_v28 = vld [vmem:[%s10046_s12 + $0xd8] sm:$0xff]  }
 0x4ea   :  { %v1597_v27 = vsel %vm343_vm0, %v1595_v8, 0.0  ;;  %v7890_v8 = vld [vmem:[%s10046_s12 + $0x90] sm:$0xff]  }
 0x4eb   :  { %1598 = vadd.xlane.f32.xlu0 %v1597_v27  ;;  %v7891_v27 = vld [vmem:[%s10046_s12 + $0x58] sm:$0xff]  }
 0x4ef   :  { %1601 = vadd.xlane.f32.xlu0 %v1600_v29  ;;  %v7893_v29 = vld [vmem:[%s10046_s12 + $0x18] sm:$0xff]  }
 0x578   :  { %v1599_v10 = vpop.xlane.xlu0 %1598 }
 0x579   :  { %v1603_v39 = vmul.f32 0.125, %v1599_v10  ;;  %v8855_v10 = vsub.s32 1, %v8419_v17 }
 0x57b   :  { %v1605_v56 = vadd.f32 1e-05, %v1603_v39  ;;  %v8858_v39 = vsub.s32 3, %v8419_v17 }
 0x57c   :  { %v1602_v63 = vpop.xlane.xlu0 %1601 }
 0x57d   :  { %8215 = vrsqrt.f32 %v1605_v56  ;;  %v1604_v0 = vmul.f32 0.125, %v1602_v63  ;;  %v1637_v56 = vrot.slane %v76_v31, %v8855_v10  ;;  %v1645_v63 = vrot.slane %v76_v31, %v8858_v39 }
 0x57f   :  { %v1606_v57 = vadd.f32 1e-05, %v1604_v0  ;;  %v8865_v0 = vsub.s32 4, %v8419_v17 }
 0x581   :  { %8217 = vrsqrt.f32 %v1606_v57 }
 0x587   :  { %v8216_v54 = vpop.eup %8215 }
 0x588   :  { %v1609_v45 = vmul.f32 %v8216_v54, %v1593_v25  ;;  %v7889_v25 = vld [vmem:[%s10046_s12 + $0x10] sm:$0xff]  }
 0x58a   :  { %v1617_v46 = vmul.f32 %v6659_v4, %v1609_v45  ;;  %v8874_v45 = vsub.s32 7, %v8419_v17 }
 0x58b   :  { %v8218_v7 = vpop.eup %8217 }
 0x58c   :  { %v1610_v11 = vmul.f32 %v8218_v7, %v1594_v21  ;;  %v8722_v58 = vadd.f32 %v6660_v40, %v1617_v46  ;;  %v7888_v21 = vld [vmem:[%s10046_s12 + $0xd0] sm:$0xff]  }
 0x58e   :  { %v1618_v1 = vmul.f32 %v6659_v4, %v1610_v11  ;;  %v8871_v4 = vsub.s32 5, %v8419_v17 }
 0x590   :  { %v8724_v59 = vadd.f32 %v6660_v40, %v1618_v1 }
 0x592   :  { %v1627_v9 = vpack.c.bf16 %v8724_v59, %v8722_v58 }
 0x594   :  { %6678 = vmatmul.mubr.msk.bf16.vlgmr.msra.gmra.mrb[20].mxu0 %vm343_vm0, %v1627_v9  ;;  %6680 = vmatmul.mubr.msk.bf16.vlgmr.msra.gmra.mrb[20].mxu1 %vm343_vm0, %v1627_v9 }
 0x595   :  { %1888 = vmatpush1.bf16.msra.mxu0 %v1766_v49  ;;  %1931 = vmatpush1.bf16.msra.mxu1 %v1772_v50  ;;  %v7908_v49 = vld [vmem:[%s10046_s12 + $0xf8] sm:$0xff]  }
 0x596   :  { %1919 = vmatprep.mubr.bf16.mxu0 %v8300_v37  ;;  %1962 = vmatprep.mubr.bf16.mxu1 %v8300_v37  ;;  %v7909_v50 = vld [vmem:[%s10046_s12 + $0x38] sm:$0xff]  }
 0x597   :  { %6685 = vmatprep.subr.msk.bf16.mxu0 %vm1177_vm1, %v6670_v53  ;;  %6687 = vmatprep.subr.msk.bf16.mxu1 %vm1177_vm1, %v6672_v12 }
 0x59c   :  { %6682 = vmatmul.mubr.msk.bf16.vlgmr.msra.gmra.mrb[24].mxu0 %vm343_vm0, %v1627_v9  ;;  %6684 = vmatmul.mubr.msk.bf16.vlgmr.msra.gmra.mrb[24].mxu1 %vm343_vm0, %v1627_v9 }
 0x59d   :  { %1974 = vmatpush1.bf16.msra.mxu0 %v1778_v26  ;;  %2017 = vmatpush1.bf16.msra.mxu1 %v1784_v51  ;;  %v7910_v26 = vld [vmem:[%s10046_s12 + $0xb8] sm:$0xff]   ;;  %v7911_v51 = vld [vmem:[%s10046_s12 + $0x140] sm:$0xff]  }
 0x59e   :  { %2005 = vmatprep.mubr.bf16.mxu0 %v8300_v37  ;;  %2048 = vmatprep.mubr.bf16.mxu1 %v8300_v37 }
 0x59f   :  { %6689 = vmatprep.subr.msk.bf16.mxu0 %vm1177_vm1, %v6674_v14  ;;  %6691 = vmatprep.subr.msk.bf16.mxu1 %vm1177_vm1, %v6676_v30 }
 0x5a4   :  { %6686 = vmatmul.mubr.msk.bf16.vlgmr.msra.gmra.mrb[28].mxu0 %vm343_vm0, %v1627_v9  ;;  %6688 = vmatmul.mubr.msk.bf16.vlgmr.msra.gmra.mrb[28].mxu1 %vm343_vm0, %v1627_v9 }
 0x5a5   :  { %2060 = vmatpush1.bf16.msra.mxu0 %v1790_v55  ;;  %2103 = vmatpush1.bf16.msra.mxu1 %v1796_v3  ;;  %v1633_v55 = vrot.slane %v76_v31, %v8427_v24  ;;  %v8868_v3 = vsub.s32 6, %v8419_v17  ;;  %v1653_v17 = vrot.slane %v76_v31, %v8871_v4 }
 0x5a6   :  { %2091 = vmatprep.mubr.bf16.mxu0 %v8300_v37  ;;  %2134 = vmatprep.mubr.bf16.mxu1 %v8300_v37 }
 0x5a7   :  { %7343 = vmatprep.subr.bf16.mxu0 %v7879_v15  ;;  %7365 = vmatprep.subr.bf16.mxu1 %v7880_v19 }
 0x5ac   :  { %6690 = vmatmul.mubr.msk.bf16.vlgmr.msra.gmra.mrb[32].mxu0 %vm343_vm0, %v1627_v9  ;;  %6692 = vmatmul.mubr.msk.bf16.vlgmr.msra.gmra.mrb[32].mxu1 %vm343_vm0, %v1627_v9 }
 0x5ad   :  { %7344 = vmatpush3.bf16.msra.mxu0 %v7881_v2  ;;  %7366 = vmatpush3.bf16.msra.mxu1 %v7882_v22  ;;  %v1649_v2 = vrot.slane %v76_v31, %v8865_v0  ;;  %v1657_v22 = vrot.slane %v76_v31, %v8868_v3 }
 0x5ae   :  { %7345 = vmatprep.subr.bf16.mxu0 %v7883_v60  ;;  %7367 = vmatprep.subr.bf16.mxu1 %v7884_v6 }
 0x5b1   :  { %7346 = vmatpush3.bf16.msra.mxu0 %v7885_v61  ;;  %7368 = vmatpush3.bf16.msra.mxu1 %v7886_v5  ;;  %v1661_v61 = vrot.slane %v76_v31, %v8874_v45 }
 0x5b2   :  { %7347 = vmatprep.subr.bf16.mxu0 %v7887_v23  ;;  %7369 = vmatprep.subr.bf16.mxu1 %v7888_v21 }
 0x5b5   :  { %7348 = vmatpush3.bf16.msra.mxu0 %v7889_v25  ;;  %7370 = vmatpush3.bf16.msra.mxu1 %v7890_v8 }
 0x5b6   :  { %7349 = vmatprep.subr.bf16.mxu0 %v7891_v27  ;;  %7371 = vmatprep.subr.bf16.mxu1 %v7892_v28 }
 0x5b9   :  { %7350 = vmatpush3.bf16.msra.mxu0 %v7893_v29  ;;  %7372 = vmatpush3.bf16.msra.mxu1 %v7894_v32  ;;  %v8883_v32 = vld [vmem:[%s10049_s11 + $0x8] sm:$0xff] }
 0x5ba   :  { %7351 = vmatprep.subr.bf16.mxu0 %v7895_v35  ;;  %7373 = vmatprep.subr.bf16.mxu1 %v7896_v33 }
 0x5bd   :  { %7352 = vmatpush3.bf16.msra.mxu0 %v7897_v36  ;;  %7374 = vmatpush3.bf16.msra.mxu1 %v7898_v34 }
 0x5be   :  { %7353 = vmatprep.subr.bf16.mxu0 %v7899_v62  ;;  %7375 = vmatprep.subr.bf16.mxu1 %v7900_v41 }
 0x5c1   :  { %7354 = vmatpush3.bf16.msra.mxu0 %v7901_v43  ;;  %7376 = vmatpush3.bf16.msra.mxu1 %v7902_v16  ;;  %v7913_v43 = vld [vmem:[%s10046_s12 + $0x100] sm:$0xff]  }
 0x5c2   :  { %7355 = vmatprep.subr.bf16.mxu0 %v7903_v44  ;;  %7377 = vmatprep.subr.bf16.mxu1 %v7904_v38  ;;  %v7914_v16 = vld [vmem:[%s10046_s12 + $0x180] sm:$0xff]  }
 0x5c5   :  { %7356 = vmatpush3.bf16.msra.mxu0 %v7905_v47  ;;  %7378 = vmatpush3.bf16.msra.mxu1 %v7906_v48 }
 0x5c6   :  { %7357 = vmatprep.subr.bf16.mxu0 %v7907_v13  ;;  %7379 = vmatprep.subr.bf16.mxu1 %v7908_v49  ;;  %v7915_v13 = vld [vmem:[%s10046_s12 + $0x148] sm:$0xff]  }
 0x5c7   :  { %v7916_v49 = vld [vmem:[%s10046_s12 + $0x1c8] sm:$0xff]  }
 0x5c9   :  { %7358 = vmatpush3.bf16.msra.mxu0 %v7909_v50  ;;  %7380 = vmatpush3.bf16.msra.mxu1 %v7910_v26  ;;  %v1665_v50 = vrot.slane %v8883_v32, %v8427_v24 }
 0x5ca   :  { %7387 = vmatprep.subr.bf16.mxu0 %v7911_v51  ;;  %7409 = vmatprep.subr.bf16.mxu1 %v7912_v52 }
 0x667   :  { %v1835_v57 = vpop.f32.mrb[20].mxu0  ;;  %v1878_v54 = vpop.f32.mrb[20].mxu1 }
 0x668   :  { %v1836_v7 = vadd.f32 %v1835_v57, %v1633_v55  ;;  %v1879_v40 = vadd.f32 %v1878_v54, %v1641_v20  ;;  %v1837_v46 = vpop.f32.mrb[21].mxu0  ;;  %v1880_v11 = vpop.f32.mrb[21].mxu1  ;;  %v1669_v54 = vrot.slane %v8883_v32, %v8855_v10 }
 0x669   :  { %v1838_v1 = vadd.f32 %v1837_v46, %v1637_v56  ;;  %v1881_v9 = vadd.f32 %v1880_v11, %v1645_v63  ;;  %v1839_v53 = vpop.f32.mrb[22].mxu0  ;;  %v1882_v12 = vpop.f32.mrb[22].mxu1  ;;  %v7917_v46 = vld [vmem:[%s10046_s12 + $0x108] sm:$0xff]  }
 0x66a   :  { %v1840_v14 = vadd.f32 %v1839_v53, %v1633_v55  ;;  %v1883_v30 = vadd.f32 %v1882_v12, %v1641_v20  ;;  %v1841_v15 = vpop.f32.mrb[23].mxu0  ;;  %v1884_v19 = vpop.f32.mrb[23].mxu1  ;;  %v2145_v5 = vmax.f32 %v1836_v7, 0.0  ;;  %v2147_v23 = vmax.f32 %v1879_v40, 0.0  ;;  %v7918_v11 = vld [vmem:[%s10046_s12 + $0x188] sm:$0xff]  }
 0x66b   :  { %v1842_v60 = vadd.f32 %v1841_v15, %v1637_v56  ;;  %v1885_v6 = vadd.f32 %v1884_v19, %v1645_v63  ;;  %v2146_v8 = vmax.f32 %v1838_v1, 0.0  ;;  %v2148_v27 = vmax.f32 %v1881_v9, 0.0  ;;  %v7920_v15 = vld [vmem:[%s10046_s12 + $0x1d0] sm:$0xff]  }
 0x66c   :  { %v2161_v21 = vmax.f32 %v1840_v14, 0.0  ;;  %v2163_v25 = vmax.f32 %v1883_v30, 0.0  ;;  %v1673_v55 = vrot.slane %v8883_v32, %v8849_v42  ;;  %v1677_v1 = vrot.slane %v8883_v32, %v8858_v39  ;;  %v7919_v30 = vld [vmem:[%s10046_s12 + $0x150] sm:$0xff]  }
 0x66d   :  { %v2162_v28 = vmax.f32 %v1842_v60, 0.0  ;;  %v2164_v29 = vmax.f32 %v1885_v6, 0.0 }
 0x66e   :  { %v2177_v35 = vpack.c.bf16 %v2161_v21, %v2145_v5  ;;  %v2179_v33 = vpack.c.bf16 %v2163_v25, %v2147_v23  ;;  %v7921_v25 = vld [vmem:[%s10046_s12 + $0x110] sm:$0xff]  }
 0x66f   :  { %v2178_v36 = vpack.c.bf16 %v2162_v28, %v2146_v8  ;;  %v2180_v34 = vpack.c.bf16 %v2164_v29, %v2148_v27  ;;  %v1921_v62 = vpop.f32.mrb[24].mxu0  ;;  %v1964_v41 = vpop.f32.mrb[24].mxu1  ;;  %v7922_v8 = vld [vmem:[%s10046_s12 + $0x190] sm:$0xff]  }
 0x670   :  { %v1922_v44 = vadd.f32 %v1921_v62, %v1649_v2  ;;  %v1965_v38 = vadd.f32 %v1964_v41, %v1657_v22  ;;  %v1923_v47 = vpop.f32.mrb[25].mxu0  ;;  %v1966_v48 = vpop.f32.mrb[25].mxu1 }
 0x671   :  { %v1924_v26 = vadd.f32 %v1923_v47, %v1653_v17  ;;  %v1967_v51 = vadd.f32 %v1966_v48, %v1661_v61  ;;  %v1925_v52 = vpop.f32.mrb[26].mxu0  ;;  %v1968_v31 = vpop.f32.mrb[26].mxu1  ;;  %2999 = vmatprep.mubr.bf16.mxu0 %v2178_v36  ;;  %3040 = vmatprep.mubr.bf16.mxu1 %v2180_v34  ;;  %v7924_v36 = vld [vmem:[%s10046_s12 + $0x1d8] sm:$0xff]  }
 0x672   :  { %v1926_v20 = vadd.f32 %v1925_v52, %v1649_v2  ;;  %v1969_v56 = vadd.f32 %v1968_v31, %v1657_v22  ;;  %v1927_v63 = vpop.f32.mrb[27].mxu0  ;;  %v1970_v57 = vpop.f32.mrb[27].mxu1  ;;  %3000 = vmatmul.mubr.bf16.vlgmr.msra.gmra.mrb[36].mxu0 %v2177_v35  ;;  %3041 = vmatmul.mubr.bf16.vlgmr.msra.gmra.mrb[36].mxu1 %v2179_v33  ;;  %v2149_v9 = vmax.f32 %v1922_v44, 0.0  ;;  %v2151_v53 = vmax.f32 %v1965_v38, 0.0  ;;  %v7923_v33 = vld [vmem:[%s10046_s12 + $0x158] sm:$0xff]  }
 0x673   :  { %v1928_v7 = vadd.f32 %v1927_v63, %v1653_v17  ;;  %v1971_v40 = vadd.f32 %v1970_v57, %v1661_v61  ;;  %7388 = vmatpush3.bf16.msra.mxu0 %v7913_v43  ;;  %7410 = vmatpush3.bf16.msra.mxu1 %v7914_v16  ;;  %v2150_v19 = vmax.f32 %v1924_v26, 0.0  ;;  %v2152_v2 = vmax.f32 %v1967_v51, 0.0  ;;  %v7925_v52 = vld [vmem:[%s10046_s12 + $0x118] sm:$0xff]   ;;  %v7927_v57 = vld [vmem:[%s10046_s12 + $0x160] sm:$0xff]  }
 0x674   :  { %v2165_v12 = vmax.f32 %v1926_v20, 0.0  ;;  %v2167_v14 = vmax.f32 %v1969_v56, 0.0  ;;  %7389 = vmatprep.subr.bf16.mxu0 %v7915_v13  ;;  %7411 = vmatprep.subr.bf16.mxu1 %v7916_v49  ;;  %v1681_v16 = vrot.slane %v8883_v32, %v8865_v0  ;;  %v1689_v13 = vrot.slane %v8883_v32, %v8868_v3 }
 0x675   :  { %v2166_v22 = vmax.f32 %v1928_v7, 0.0  ;;  %v2168_v60 = vmax.f32 %v1971_v40, 0.0  ;;  %v1685_v49 = vrot.slane %v8883_v32, %v8871_v4  ;;  %v1693_v31 = vrot.slane %v8883_v32, %v8874_v45 }
 0x676   :  { %v8917_v6 = vpack.c.bf16 %v2165_v12, %v2149_v9  ;;  %v8919_v17 = vpack.c.bf16 %v2167_v14, %v2151_v53 }
 0x677   :  { %v2182_v61 = vpack.c.bf16 %v2166_v22, %v2150_v19  ;;  %v2184_v5 = vpack.c.bf16 %v2168_v60, %v2152_v2  ;;  %7390 = vmatpush3.bf16.msra.mxu0 %v7917_v46  ;;  %7412 = vmatpush3.bf16.msra.mxu1 %v7918_v11  ;;  %v2007_v23 = vpop.f32.mrb[28].mxu0  ;;  %v2050_v21 = vpop.f32.mrb[28].mxu1 }
 0x678   :  { %v2008_v27 = vadd.f32 %v2007_v23, %v1665_v50  ;;  %v2051_v28 = vadd.f32 %v2050_v21, %v1673_v55  ;;  %v2009_v29 = vpop.f32.mrb[29].mxu0  ;;  %v2052_v35 = vpop.f32.mrb[29].mxu1  ;;  %7391 = vmatprep.subr.bf16.mxu0 %v7919_v30  ;;  %7413 = vmatprep.subr.bf16.mxu1 %v7920_v15  ;;  %v7929_v30 = vld [vmem:[%s10046_s12 + $0x120] sm:$0xff]  }
 0x679   :  { %v2010_v34 = vadd.f32 %v2009_v29, %v1669_v54  ;;  %v2053_v62 = vadd.f32 %v2052_v35, %v1677_v1  ;;  %v2011_v41 = vpop.f32.mrb[30].mxu0  ;;  %v2054_v43 = vpop.f32.mrb[30].mxu1  ;;  %3081 = vmatprep.mubr.bf16.mxu0 %v2182_v61  ;;  %3122 = vmatprep.mubr.bf16.mxu1 %v2184_v5  ;;  %v7930_v15 = vld [vmem:[%s10046_s12 + $0x1a0] sm:$0xff]   ;;  %v7931_v61 = vld [vmem:[%s10046_s12 + $0x168] sm:$0xff]  }
 0x67a   :  { %v2012_v44 = vadd.f32 %v2011_v41, %v1665_v50  ;;  %v2055_v38 = vadd.f32 %v2054_v43, %v1673_v55  ;;  %v2013_v47 = vpop.f32.mrb[31].mxu0  ;;  %v2056_v48 = vpop.f32.mrb[31].mxu1  ;;  %v7926_v50 = vld [vmem:[%s10046_s12 + $0x198] sm:$0xff]   ;;  %v2153_v55 = vmax.f32 %v2008_v27, 0.0  ;;  %v2155_v20 = vmax.f32 %v2051_v28, 0.0  ;;  %v7932_v5 = vld [vmem:[%s10046_s12 + $0x1e8] sm:$0xff]  }
 0x67b   :  { %v2014_v26 = vadd.f32 %v2013_v47, %v1669_v54  ;;  %v2057_v51 = vadd.f32 %v2056_v48, %v1677_v1  ;;  %7392 = vmatpush3.bf16.msra.mxu0 %v7921_v25  ;;  %7414 = vmatpush3.bf16.msra.mxu1 %v7922_v8  ;;  %v7928_v54 = vld [vmem:[%s10046_s12 + $0x1e0] sm:$0xff]   ;;  %v2154_v7 = vmax.f32 %v2010_v34, 0.0  ;;  %v2156_v40 = vmax.f32 %v2053_v62, 0.0  ;;  %v7933_v34 = vld [vmem:[%s10046_s12 + $0x128] sm:$0xff]   ;;  %v7936_v47 = vld [vmem:[%s10046_s12 + $0x1f0] sm:$0xff]  }
 0x67c   :  { %v2169_v56 = vmax.f32 %v2012_v44, 0.0  ;;  %v2171_v63 = vmax.f32 %v2055_v38, 0.0  ;;  %7393 = vmatprep.subr.bf16.mxu0 %v7923_v33  ;;  %7415 = vmatprep.subr.bf16.mxu1 %v7924_v36  ;;  %v7934_v62 = vld [vmem:[%s10046_s12 + $0x1a8] sm:$0xff]  }
 0x67d   :  { %v2170_v46 = vmax.f32 %v2014_v26, 0.0  ;;  %v2172_v11 = vmax.f32 %v2057_v51, 0.0 }
 0x67e   :  { %v8953_v1 = vpack.c.bf16 %v2169_v56, %v2153_v55  ;;  %v8955_v32 = vpack.c.bf16 %v2171_v63, %v2155_v20  ;;  %v7937_v55 = vld [vmem:[%s10046_s12 + $0x130] sm:$0xff]   ;;  %v7939_v56 = vld [vmem:[%s10046_s12 + $0x178] sm:$0xff]  }
 0x67f   :  { %v8957_v9 = vpack.c.bf16 %v2170_v46, %v2154_v7  ;;  %v8959_v53 = vpack.c.bf16 %v2172_v11, %v2156_v40  ;;  %7394 = vmatpush3.bf16.msra.mxu0 %v7925_v52  ;;  %7416 = vmatpush3.bf16.msra.mxu1 %v7926_v50  ;;  %v2093_v12 = vpop.f32.mrb[32].mxu0  ;;  %v2136_v14 = vpop.f32.mrb[32].mxu1  ;;  %v7938_v20 = vld [vmem:[%s10046_s12 + $0x1b0] sm:$0xff]   ;;  %v7940_v63 = vld [vmem:[%s10046_s12 + $0x1f8] sm:$0xff]   ;;  %v7943_v7 = vld [vmem:[%s10046_s12 + $0x240] sm:$0xff]  }
 0x680   :  { %v2094_v19 = vadd.f32 %v2093_v12, %v1681_v16  ;;  %v2137_v2 = vadd.f32 %v2136_v14, %v1689_v13  ;;  %v2095_v22 = vpop.f32.mrb[33].mxu0  ;;  %v2138_v60 = vpop.f32.mrb[33].mxu1  ;;  %7395 = vmatprep.subr.bf16.mxu0 %v7927_v57  ;;  %7417 = vmatprep.subr.bf16.mxu1 %v7928_v54  ;;  %v7941_v57 = vld [vmem:[%s10046_s12 + $0x138] sm:$0xff]   ;;  %v7944_v40 = vld [vmem:[%s10046_s12 + $0x2c0] sm:$0xff]   ;;  %v7947_v12 = vld [vmem:[%s10046_s12 + $0x248] sm:$0xff]  }
 0x681   :  { %v2096_v23 = vadd.f32 %v2095_v22, %v1685_v49  ;;  %v2139_v21 = vadd.f32 %v2138_v60, %v1693_v31  ;;  %v2097_v25 = vpop.f32.mrb[34].mxu0  ;;  %v2140_v8 = vpop.f32.mrb[34].mxu1  ;;  %v7942_v54 = vld [vmem:[%s10046_s12 + $0x1b8] sm:$0xff]   ;;  %v7945_v46 = vld [vmem:[%s10046_s12 + $0x200] sm:$0xff]   ;;  %v7948_v14 = vld [vmem:[%s10046_s12 + $0x2c8] sm:$0xff]  }
 0x682   :  { %v2098_v27 = vadd.f32 %v2097_v25, %v1681_v16  ;;  %v2141_v28 = vadd.f32 %v2140_v8, %v1689_v13  ;;  %v2099_v29 = vpop.f32.mrb[35].mxu0  ;;  %v2142_v35 = vpop.f32.mrb[35].mxu1  ;;  %v2157_v41 = vmax.f32 %v2094_v19, 0.0  ;;  %v2159_v43 = vmax.f32 %v2137_v2, 0.0  ;;  %v7935_v16 = vld [vmem:[%s10046_s12 + $0x170] sm:$0xff]   ;;  %v7946_v11 = vld [vmem:[%s10046_s12 + $0x280] sm:$0xff]  }
 0x683   :  { %v2100_v33 = vadd.f32 %v2099_v29, %v1685_v49  ;;  %v2143_v36 = vadd.f32 %v2142_v35, %v1693_v31  ;;  %7396 = vmatpush3.bf16.msra.mxu0 %v7929_v30  ;;  %7418 = vmatpush3.bf16.msra.mxu1 %v7930_v15  ;;  %v2158_v48 = vmax.f32 %v2096_v23, 0.0  ;;  %v2160_v13 = vmax.f32 %v2139_v21, 0.0  ;;  %v7949_v30 = vld [vmem:[%s10046_s12 + $0x208] sm:$0xff]   ;;  %v7955_v19 = vld [vmem:[%s10046_s12 + $0x258] sm:$0xff]   ;;  %v7961_v23 = vld [vmem:[%s10046_s12 + $0x220] sm:$0xff]  }
 0x684   :  { %v2173_v44 = vmax.f32 %v2098_v27, 0.0  ;;  %v2175_v38 = vmax.f32 %v2141_v28, 0.0  ;;  %7397 = vmatprep.subr.bf16.mxu0 %v7931_v61  ;;  %7419 = vmatprep.subr.bf16.mxu1 %v7932_v5  ;;  %v7950_v15 = vld [vmem:[%s10046_s12 + $0x288] sm:$0xff]   ;;  %v7956_v2 = vld [vmem:[%s10046_s12 + $0x2d8] sm:$0xff]   ;;  %v7959_v61 = vld [vmem:[%s10046_s12 + $0x260] sm:$0xff]  }
 0x685   :  { %v2174_v49 = vmax.f32 %v2100_v33, 0.0  ;;  %v2176_v26 = vmax.f32 %v2143_v36, 0.0  ;;  %v7957_v22 = vld [vmem:[%s10046_s12 + $0x218] sm:$0xff]   ;;  %v7960_v5 = vld [vmem:[%s10046_s12 + $0x2e0] sm:$0xff]   ;;  %v7963_v25 = vld [vmem:[%s10046_s12 + $0x268] sm:$0xff]  }
 0x686   :  { %v8985_v51 = vpack.c.bf16 %v2173_v44, %v2157_v41  ;;  %v8987_v52 = vpack.c.bf16 %v2175_v38, %v2159_v43  ;;  %v7958_v60 = vld [vmem:[%s10046_s12 + $0x298] sm:$0xff]   ;;  %v7962_v21 = vld [vmem:[%s10046_s12 + $0x2a0] sm:$0xff]   ;;  %v7964_v8 = vld [vmem:[%s10046_s12 + $0x2e8] sm:$0xff]  }
 0x687   :  { %v8989_v50 = vpack.c.bf16 %v2174_v49, %v2158_v48  ;;  %v8991_v31 = vpack.c.bf16 %v2176_v26, %v2160_v13  ;;  %7398 = vmatpush3.bf16.msra.mxu0 %v7933_v34  ;;  %7420 = vmatpush3.bf16.msra.mxu1 %v7934_v62  ;;  %v7965_v27 = vld [vmem:[%s10046_s12 + $0x228] sm:$0xff]   ;;  %v7967_v29 = vld [vmem:[%s10046_s12 + $0x270] sm:$0xff]   ;;  %v7971_v34 = vld [vmem:[%s10046_s12 + $0x278] sm:$0xff]  }
 0x688   :  { %7399 = vmatprep.subr.bf16.mxu0 %v7935_v16  ;;  %7421 = vmatprep.subr.bf16.mxu1 %v7936_v47  ;;  %v7966_v28 = vld [vmem:[%s10046_s12 + $0x2a8] sm:$0xff]   ;;  %v7968_v35 = vld [vmem:[%s10046_s12 + $0x2f0] sm:$0xff]   ;;  %v7972_v62 = vld [vmem:[%s10046_s12 + $0x2f8] sm:$0xff]  }
 0x689   :  { %v7969_v33 = vld [vmem:[%s10046_s12 + $0x230] sm:$0xff]   ;;  %v7973_v41 = vld [vmem:[%s10046_s12 + $0x238] sm:$0xff]   ;;  %v7975_v44 = vld [vmem:[%s10046_s12 + $0x340] sm:$0xff]  }
 0x68a   :  { %v7970_v36 = vld [vmem:[%s10046_s12 + $0x2b0] sm:$0xff]   ;;  %v7974_v43 = vld [vmem:[%s10046_s12 + $0x2b8] sm:$0xff]   ;;  %v7976_v38 = vld [vmem:[%s10046_s12 + $0x3c0] sm:$0xff]  }
 0x68b   :  { %7400 = vmatpush3.bf16.msra.mxu0 %v7937_v55  ;;  %7422 = vmatpush3.bf16.msra.mxu1 %v7938_v20  ;;  %v7977_v16 = vld [vmem:[%s10046_s12 + $0x300] sm:$0xff]   ;;  %v7979_v48 = vld [vmem:[%s10046_s12 + $0x348] sm:$0xff]   ;;  %v7986_v55 = vld [vmem:[%s10046_s12 + $0x390] sm:$0xff]  }
 0x68c   :  { %7401 = vmatprep.subr.bf16.mxu0 %v7939_v56  ;;  %7423 = vmatprep.subr.bf16.mxu1 %v7940_v63  ;;  %v7978_v47 = vld [vmem:[%s10046_s12 + $0x380] sm:$0xff]   ;;  %v7980_v13 = vld [vmem:[%s10046_s12 + $0x3c8] sm:$0xff]   ;;  %v7988_v20 = vld [vmem:[%s10046_s12 + $0x3d8] sm:$0xff]  }
 0x68d   :  { %v7981_v49 = vld [vmem:[%s10046_s12 + $0x308] sm:$0xff]   ;;  %v7989_v56 = vld [vmem:[%s10046_s12 + $0x318] sm:$0xff]  }
 0x68e   :  { %v7982_v26 = vld [vmem:[%s10046_s12 + $0x388] sm:$0xff]   ;;  %v7990_v63 = vld [vmem:[%s10046_s12 + $0x398] sm:$0xff]  }
 0x68f   :  { %7402 = vmatpush3.bf16.msra.mxu0 %v7941_v57  ;;  %7424 = vmatpush3.bf16.msra.mxu1 %v7942_v54  ;;  %v7991_v57 = vld [vmem:[%s10046_s12 + $0x360] sm:$0xff]  }
 0x690   :  { %7431 = vmatprep.subr.bf16.mxu0 %v7943_v7  ;;  %7453 = vmatprep.subr.bf16.mxu1 %v7944_v40  ;;  %v7992_v54 = vld [vmem:[%s10046_s12 + $0x3e0] sm:$0xff]  }
 0x691   :  { %v7993_v7 = vld [vmem:[%s10046_s12 + $0x320] sm:$0xff]  }
 0x692   :  { %3082 = vmatmul.mubr.bf16.vlgmr.msra.gmra.mrb[40].mxu0 %v8917_v6  ;;  %3123 = vmatmul.mubr.bf16.vlgmr.msra.gmra.mrb[40].mxu1 %v8919_v17  ;;  %v7951_v6 = vld [vmem:[%s10046_s12 + $0x250] sm:$0xff]   ;;  %v7994_v40 = vld [vmem:[%s10046_s12 + $0x3a0] sm:$0xff]  }
 0x693   :  { %7432 = vmatpush3.bf16.msra.mxu0 %v7945_v46  ;;  %3163 = vmatprep.mubr.bf16.mxu0 %v8957_v9  ;;  %v7952_v17 = vld [vmem:[%s10046_s12 + $0x2d0] sm:$0xff]   ;;  %v7995_v46 = vld [vmem:[%s10046_s12 + $0x368] sm:$0xff]  }
 0x694   :  { %7454 = vmatpush3.bf16.msra.mxu1 %v7946_v11  ;;  %3204 = vmatprep.mubr.bf16.mxu1 %v8959_v53  ;;  %v7953_v9 = vld [vmem:[%s10046_s12 + $0x210] sm:$0xff]   ;;  %v7996_v11 = vld [vmem:[%s10046_s12 + $0x3e8] sm:$0xff]  }
 0x695   :  { %7433 = vmatprep.subr.bf16.mxu0 %v7947_v12  ;;  %7455 = vmatprep.subr.bf16.mxu1 %v7948_v14  ;;  %v7954_v53 = vld [vmem:[%s10046_s12 + $0x290] sm:$0xff]   ;;  %v7997_v12 = vld [vmem:[%s10046_s12 + $0x328] sm:$0xff]  }
 0x696   :  { %v7998_v14 = vld [vmem:[%s10046_s12 + $0x3a8] sm:$0xff]  }
 0x697   :  { %7434 = vmatpush3.bf16.msra.mxu0 %v7949_v30  ;;  %v7999_v30 = vld [vmem:[%s10046_s12 + $0x370] sm:$0xff]  }
 0x698   :  { %7456 = vmatpush3.bf16.msra.mxu1 %v7950_v15  ;;  %7435 = vmatprep.subr.bf16.mxu0 %v7951_v6  ;;  %v8000_v15 = vld [vmem:[%s10046_s12 + $0x3f0] sm:$0xff]  }
 0x699   :  { %7457 = vmatprep.subr.bf16.mxu1 %v7952_v17  ;;  %v8001_v6 = vld [vmem:[%s10046_s12 + $0x330] sm:$0xff]  }
 0x69a   :  { %v8002_v17 = vld [vmem:[%s10046_s12 + $0x3b0] sm:$0xff]  }
 0x69b   :  { %7436 = vmatpush3.bf16.msra.mxu0 %v7953_v9  ;;  %v8003_v9 = vld [vmem:[%s10046_s12 + $0x378] sm:$0xff]  }
 0x69c   :  { %7458 = vmatpush3.bf16.msra.mxu1 %v7954_v53  ;;  %7437 = vmatprep.subr.bf16.mxu0 %v7955_v19  ;;  %v8004_v53 = vld [vmem:[%s10046_s12 + $0x3f8] sm:$0xff]  }
 0x69d   :  { %7459 = vmatprep.subr.bf16.mxu1 %v7956_v2  ;;  %v8005_v19 = vld [vmem:[%s10046_s12 + $0x338] sm:$0xff]  }
 0x69e   :  { %v8006_v2 = vld [vmem:[%s10046_s12 + $0x3b8] sm:$0xff]  }
 0x69f   :  { %7438 = vmatpush3.bf16.msra.mxu0 %v7957_v22  ;;  %v8295_v22 = vld [vmem:[%s10040_s2] sm:$0xff] }
 0x6a0   :  { %7460 = vmatpush3.bf16.msra.mxu1 %v7958_v60  ;;  %7439 = vmatprep.subr.bf16.mxu0 %v7959_v61 }
 0x6a1   :  { %7461 = vmatprep.subr.bf16.mxu1 %v7960_v5  ;;  %v6693_v5 = vld [vmem:[%s10050_s13] ss:$0 sm:$0xff] }
 0x6a3   :  { %7440 = vmatpush3.bf16.msra.mxu0 %v7961_v23 }
 0x6a4   :  { %7462 = vmatpush3.bf16.msra.mxu1 %v7962_v21  ;;  %7441 = vmatprep.subr.bf16.mxu0 %v7963_v25 }
 0x6a5   :  { %7463 = vmatprep.subr.bf16.mxu1 %v7964_v8 }
 0x6a7   :  { %7442 = vmatpush3.bf16.msra.mxu0 %v7965_v27 }
 0x6a8   :  { %7464 = vmatpush3.bf16.msra.mxu1 %v7966_v28  ;;  %7443 = vmatprep.subr.bf16.mxu0 %v7967_v29 }
 0x6a9   :  { %7465 = vmatprep.subr.bf16.mxu1 %v7968_v35 }
 0x6ab   :  { %7444 = vmatpush3.bf16.msra.mxu0 %v7969_v33 }
 0x6ac   :  { %7466 = vmatpush3.bf16.msra.mxu1 %v7970_v36  ;;  %7445 = vmatprep.subr.bf16.mxu0 %v7971_v34 }
 0x6ad   :  { %7467 = vmatprep.subr.bf16.mxu1 %v7972_v62 }
 0x6af   :  { %7446 = vmatpush3.bf16.msra.mxu0 %v7973_v41 }
 0x6b0   :  { %7468 = vmatpush3.bf16.msra.mxu1 %v7974_v43  ;;  %7475 = vmatprep.subr.bf16.mxu0 %v7975_v44 }
 0x6b1   :  { %7497 = vmatprep.subr.bf16.mxu1 %v7976_v38 }
 0x6b2   :  { %3164 = vmatmul.mubr.bf16.vlgmr.msra.gmra.mrb[44].mxu0 %v8953_v1  ;;  %v7983_v1 = vld [vmem:[%s10046_s12 + $0x350] sm:$0xff]  }
 0x6b3   :  { %3205 = vmatmul.mubr.bf16.vlgmr.msra.gmra.mrb[44].mxu1 %v8955_v32  ;;  %7476 = vmatpush3.bf16.msra.mxu0 %v7977_v16  ;;  %v7984_v32 = vld [vmem:[%s10046_s12 + $0x3d0] sm:$0xff]  }
 0x6b4   :  { %3245 = vmatprep.mubr.bf16.mxu0 %v8989_v50  ;;  %7498 = vmatpush3.bf16.msra.mxu1 %v7978_v47  ;;  %v7985_v50 = vld [vmem:[%s10046_s12 + $0x310] sm:$0xff]  }
 0x6b5   :  { %3286 = vmatprep.mubr.bf16.mxu1 %v8991_v31  ;;  %7477 = vmatprep.subr.bf16.mxu0 %v7979_v48  ;;  %v7987_v31 = vld [vmem:[%s10046_s12 + $0x358] sm:$0xff]  }
 0x6b6   :  { %7499 = vmatprep.subr.bf16.mxu1 %v7980_v13 }
 0x6b7   :  { %7478 = vmatpush3.bf16.msra.mxu0 %v7981_v49 }
 0x6b8   :  { %7500 = vmatpush3.bf16.msra.mxu1 %v7982_v26  ;;  %7479 = vmatprep.subr.bf16.mxu0 %v7983_v1 }
 0x6b9   :  { %7501 = vmatprep.subr.bf16.mxu1 %v7984_v32 }
 0x6bb   :  { %7480 = vmatpush3.bf16.msra.mxu0 %v7985_v50 }
 0x6bc   :  { %7502 = vmatpush3.bf16.msra.mxu1 %v7986_v55  ;;  %7481 = vmatprep.subr.bf16.mxu0 %v7987_v31 }
 0x6bd   :  { %7503 = vmatprep.subr.bf16.mxu1 %v7988_v20 }
 0x6bf   :  { %7482 = vmatpush3.bf16.msra.mxu0 %v7989_v56 }
 0x6c0   :  { %7504 = vmatpush3.bf16.msra.mxu1 %v7990_v63  ;;  %7483 = vmatprep.subr.bf16.mxu0 %v7991_v57 }
 0x6c1   :  { %7505 = vmatprep.subr.bf16.mxu1 %v7992_v54 }
 0x6c3   :  { %7484 = vmatpush3.bf16.msra.mxu0 %v7993_v7 }
 0x6c4   :  { %7506 = vmatpush3.bf16.msra.mxu1 %v7994_v40  ;;  %7485 = vmatprep.subr.bf16.mxu0 %v7995_v46 }
 0x6c5   :  { %7507 = vmatprep.subr.bf16.mxu1 %v7996_v11 }
 0x6c7   :  { %7486 = vmatpush3.bf16.msra.mxu0 %v7997_v12 }
 0x6c8   :  { %7508 = vmatpush3.bf16.msra.mxu1 %v7998_v14  ;;  %7487 = vmatprep.subr.bf16.mxu0 %v7999_v30 }
 0x6c9   :  { %7509 = vmatprep.subr.bf16.mxu1 %v8000_v15 }
 0x6cb   :  { %7488 = vmatpush3.bf16.msra.mxu0 %v8001_v6 }
 0x6cc   :  { %7510 = vmatpush3.bf16.msra.mxu1 %v8002_v17  ;;  %7489 = vmatprep.subr.bf16.mxu0 %v8003_v9 }
 0x6cd   :  { %7511 = vmatprep.subr.bf16.mxu1 %v8004_v53 }
 0x6cf   :  { %7490 = vmatpush3.bf16.msra.mxu0 %v8005_v19 }
 0x6d0   :  { %7512 = vmatpush3.bf16.msra.mxu1 %v8006_v2 }
 0x6d1   :  { %7802 = vmatprep.subr.mxu1 %v8295_v22 }
 0x6d2   :  { %3246 = vmatmul.mubr.bf16.vlgmr.msra.gmra.mrb[48].mxu0 %v8985_v51 }
 0x6d3   :  { %3287 = vmatmul.mubr.bf16.vlgmr.msra.gmra.mrb[48].mxu1 %v8987_v52 }
 0x6d4   :  { %7803 = vmatpush3.msra.mxu1 %v8295_v22 }
 0x745   :  { %v7359_v60 = vpop.f32.mrb[36].mxu0  ;;  %v7381_v61 = vpop.f32.mrb[36].mxu1 }
 0x746   :  { %v7360_v23 = vpop.f32.mrb[37].mxu0  ;;  %v7382_v21 = vpop.f32.mrb[37].mxu1 }
 0x747   :  { %v7361_v25 = vadd.f32 %v7360_v23, %v7359_v60  ;;  %v7383_v8 = vadd.f32 %v7382_v21, %v7381_v61  ;;  %v7362_v27 = vpop.f32.mrb[38].mxu0  ;;  %v7384_v28 = vpop.f32.mrb[38].mxu1 }
 0x748   :  { %v7363_v29 = vpop.f32.mrb[39].mxu0  ;;  %v7385_v35 = vpop.f32.mrb[39].mxu1 }
 0x749   :  { %v3002_v33 = vadd.f32 %v7361_v25, %v6693_v5  ;;  %v7364_v36 = vadd.f32 %v7363_v29, %v7362_v27  ;;  %v7386_v51 = vadd.f32 %v7385_v35, %v7384_v28 }
 0x74b   :  { %v3043_v34 = vadd.f32 %v7383_v8, %v3002_v33  ;;  %v3005_v52 = vadd.f32 %v7364_v36, %v6693_v5 }
 0x74d   :  { %v3046_v62 = vadd.f32 %v7386_v51, %v3005_v52 }
 0x765   :  { %v7403_v41 = vpop.f32.mrb[40].mxu0  ;;  %v7425_v43 = vpop.f32.mrb[40].mxu1 }
 0x766   :  { %v7404_v44 = vpop.f32.mrb[41].mxu0  ;;  %v7426_v38 = vpop.f32.mrb[41].mxu1 }
 0x767   :  { %v7405_v16 = vadd.f32 %v7404_v44, %v7403_v41  ;;  %v7427_v47 = vadd.f32 %v7426_v38, %v7425_v43  ;;  %v7406_v48 = vpop.f32.mrb[42].mxu0  ;;  %v7428_v13 = vpop.f32.mrb[42].mxu1 }
 0x768   :  { %v7407_v49 = vpop.f32.mrb[43].mxu0  ;;  %v7429_v26 = vpop.f32.mrb[43].mxu1 }
 0x769   :  { %v3084_v1 = vadd.f32 %v7405_v16, %v3043_v34  ;;  %v7408_v32 = vadd.f32 %v7407_v49, %v7406_v48  ;;  %v7430_v50 = vadd.f32 %v7429_v26, %v7428_v13  ;;  %v8296_v26 = vld [vmem:[%s10042_s3] sm:$0xf] }
 0x76b   :  { %v3125_v55 = vadd.f32 %v7427_v47, %v3084_v1  ;;  %v3087_v31 = vadd.f32 %v7408_v32, %v3046_v62 }
 0x76d   :  { %v3128_v20 = vadd.f32 %v7430_v50, %v3087_v31 }
 0x785   :  { %v7447_v56 = vpop.f32.mrb[44].mxu0 }
 0x786   :  { %v7469_v63 = vpop.f32.mrb[44].mxu1  ;;  %v7448_v57 = vpop.f32.mrb[45].mxu0 }
 0x787   :  { %v7449_v54 = vadd.f32 %v7448_v57, %v7447_v56  ;;  %v7470_v7 = vpop.f32.mrb[45].mxu1  ;;  %v7450_v40 = vpop.f32.mrb[46].mxu0 }
 0x788   :  { %v7471_v46 = vadd.f32 %v7470_v7, %v7469_v63  ;;  %v7472_v11 = vpop.f32.mrb[46].mxu1  ;;  %v7451_v12 = vpop.f32.mrb[47].mxu0  ;;  %v6822_v63 = vld [vmem:[%s10051_s14] ss:$0 sm:$0xff] }
 0x789   :  { %v3166_v14 = vadd.f32 %v7449_v54, %v3125_v55  ;;  %v7452_v30 = vadd.f32 %v7451_v12, %v7450_v40  ;;  %v7473_v15 = vpop.f32.mrb[47].mxu1  ;;  %v6823_v7 = vld [vmem:[%s10052_s15] ss:$0 sm:$0xff] }
 0x78a   :  { %v7474_v6 = vadd.f32 %v7473_v15, %v7472_v11 }
 0x78b   :  { %v3207_v17 = vadd.f32 %v7471_v46, %v3166_v14  ;;  %v3169_v9 = vadd.f32 %v7452_v30, %v3128_v20  ;;  %v7099_v30 = vld [vmem:[%s10041_s5 + $0x1] ss:$0 sm:$0xff] }
 0x78d   :  { %v3210_v53 = vadd.f32 %v7474_v6, %v3169_v9 }
 0x7a5   :  { %v7491_v19 = vpop.f32.mrb[48].mxu0 }
 0x7a6   :  { %v7513_v2 = vpop.f32.mrb[48].mxu1  ;;  %v7492_v22 = vpop.f32.mrb[49].mxu0 }
 0x7a7   :  { %v7493_v60 = vadd.f32 %v7492_v22, %v7491_v19  ;;  %v7514_v61 = vpop.f32.mrb[49].mxu1  ;;  %v7494_v5 = vpop.f32.mrb[50].mxu0 }
 0x7a8   :  { %v7515_v23 = vadd.f32 %v7514_v61, %v7513_v2  ;;  %v7516_v21 = vpop.f32.mrb[50].mxu1  ;;  %v7495_v25 = vpop.f32.mrb[51].mxu0 }
 0x7a9   :  { %v3248_v8 = vadd.f32 %v7493_v60, %v3207_v17  ;;  %v7496_v27 = vadd.f32 %v7495_v25, %v7494_v5  ;;  %v7517_v28 = vpop.f32.mrb[51].mxu1 }
 0x7aa   :  { %v7518_v29 = vadd.f32 %v7517_v28, %v7516_v21 }
 0x7ab   :  { %v3289_v35 = vadd.f32 %v7515_v23, %v3248_v8  ;;  %v3251_v33 = vadd.f32 %v7496_v27, %v3210_v53 }
 0x7ad   :  { %v3292_v36 = vadd.f32 %v7518_v29, %v3251_v33  ;;  %v3295_v51 = vadd.f32 %v3289_v35, %v8722_v58 }
 0x7af   :  { %v3297_v34 = vsel %vm343_vm0, %v3295_v51, 0.0  ;;  %v3296_v52 = vadd.f32 %v3292_v36, %v8724_v59  ;;  %v6824_v59 = vld [vmem:[%s10056_s23 + $0x8] sm:$0xff] }
 0x7b0   :  { %3298 = vadd.xlane.f32.xlu1 %v3297_v34  ;;  %7797 = vmatprep.subr.mxu0 %v6824_v59 }
 0x7b1   :  { %v3300_v62 = vsel %vm343_vm0, %v3296_v52, 0.0  ;;  %7798 = vmatpush3.msra.mxu0 %v6824_v59 }
 0x7b2   :  { %3301 = vadd.xlane.f32.xlu0 %v3300_v62  ;;  %7828 = vmatprep.subr.msk.mxu0 %vm1177_vm1, %v8296_v26 }
 0x83d   :  { %v3299_v41 = vpop.xlane.xlu1 %3298 }
 0x83e   :  { %v3303_v43 = vmul.f32 0.125, %v3299_v41 }
 0x83f   :  { %v3302_v44 = vpop.xlane.xlu0 %3301 }
 0x840   :  { %v3305_v38 = vsub.f32 %v3295_v51, %v3303_v43  ;;  %v3304_v16 = vmul.f32 0.125, %v3302_v44 }
 0x842   :  { %v3306_v47 = vsub.f32 %v3296_v52, %v3304_v16  ;;  %v3307_v48 = vmul.f32 %v3305_v38, %v3305_v38 }
 0x844   :  { %v3309_v13 = vsel %vm343_vm0, %v3307_v48, 0.0  ;;  %v3308_v49 = vmul.f32 %v3306_v47, %v3306_v47 }
 0x845   :  { %3310 = vadd.xlane.f32.xlu1 %v3309_v13 }
 0x846   :  { %v3312_v58 = vsel %vm343_vm0, %v3308_v49, 0.0 }
 0x847   :  { %3313 = vadd.xlane.f32.xlu0 %v3312_v58 }
 0x8d2   :  { %v3311_v1 = vpop.xlane.xlu1 %3310 }
 0x8d3   :  { %v3315_v32 = vmul.f32 0.125, %v3311_v1 }
 0x8d4   :  { %v3314_v50 = vpop.xlane.xlu0 %3313 }
 0x8d5   :  { %v3317_v55 = vadd.f32 1e-05, %v3315_v32  ;;  %v3316_v31 = vmul.f32 0.125, %v3314_v50 }
 0x8d7   :  { %8219 = vrsqrt.f32 %v3317_v55  ;;  %v3318_v20 = vadd.f32 1e-05, %v3316_v31 }
 0x8d9   :  { %8221 = vrsqrt.f32 %v3318_v20 }
 0x8e1   :  { %v8220_v56 = vpop.eup %8219 }
 0x8e2   :  { %v3321_v57 = vmul.f32 %v8220_v56, %v3305_v38 }
 0x8e3   :  { %v8222_v54 = vpop.eup %8221 }
 0x8e4   :  { %v3322_v40 = vmul.f32 %v8222_v54, %v3306_v47  ;;  %v3329_v46 = vmul.f32 %v6822_v63, %v3321_v57 }
 0x8e6   :  { %v3330_v11 = vmul.f32 %v6822_v63, %v3322_v40  ;;  %v9238_v12 = vadd.f32 %v6823_v7, %v3329_v46 }
 0x8e8   :  { %v9240_v14 = vadd.f32 %v6823_v7, %v3330_v11  ;;  %7799 = vmatprep.mubr.msk.f32.mxu0 %vm343_vm0, %v9238_v12 }
 0x8ea   :  { %7800 = vmatmul.mubr.msk.f32.vlgmr.msra.gmra.mrb[18].mxu0 %vm343_vm0, %v9240_v14 }
 0x8eb   :  { %7829 = vmatpush3.msk.msra.mxu0 %vm1177_vm1, %v8296_v26 }
 0x9bd   :  { %v7801_v15 = vpop.f32.mrb[18].mxu0 }
 0x9be   :  { %v3710_v6 = vadd.f32 %v7801_v15, %v7099_v30  ;;  %v3704_v17 = vpop.f32.mrb[19].mxu0 }
 0x9bf   :  { %v3705_v9 = vadd.f32 %v7099_v30, %v3704_v17 }
 0x9c0   :  { %3899 = vrot.lane.b32.xlu0 %v3710_v6, %s8298_s20  ;;  %v3714_v8 = vmul.f32 0.70710677, %v3710_v6 }
 0x9c1   :  { %3897 = vrot.lane.b32.xlu1 %v3705_v9, %s8298_s20  ;;  %v3713_v53 = vmul.f32 0.70710677, %v3705_v9 }
 0x9c2   :  { %v3773_v52 = vrot.slane %v3714_v8, %v8422_v18  ;;  %v3766_v47 = vcombine.high %v3714_v8, %v3714_v8 }
 0x9c3   :  { %v3724_v19 = vrot.slane %v3713_v53, %v8422_v18  ;;  %v3717_v22 = vcombine.high %v3713_v53, %v3713_v53 }
 0x9c4   :  { %v3781_v48 = vcombine.high %v3773_v52, %v3773_v52  ;;  %v3789_v58 = vrot.slane %v3773_v52, %v8422_v18  ;;  %v3780_v32 = vrot.slane %v3766_v47, %v8422_v18 }
 0x9c5   :  { %4609 = vrot.lane.b32.xlu1 %v3705_v9, %s8297_s19  ;;  %v3732_v2 = vcombine.high %v3724_v19, %v3724_v19  ;;  %v3740_v60 = vrot.slane %v3724_v19, %v8422_v18  ;;  %v3731_v5 = vrot.slane %v3717_v22, %v8422_v18 }
 0x9c6   :  { %v3803_v50 = vrot.slane %v3781_v48, %v8422_v18  ;;  %v3811_v20 = vcombine.high %v3789_v58, %v3789_v58  ;;  %v3850_v56 = vrot.slane %v3789_v58, %v8427_v24  ;;  %v3782_v54 = vcombine.high %v3780_v32, %v3780_v32 }
 0x9c7   :  { %v3754_v61 = vrot.slane %v3732_v2, %v8422_v18  ;;  %v3762_v23 = vcombine.high %v3740_v60, %v3740_v60  ;;  %v3818_v25 = vrot.slane %v3740_v60, %v8427_v24  ;;  %v3733_v27 = vcombine.high %v3731_v5, %v3731_v5 }
 0x9c8   :  { %v3747_v35 = vrot.slane %v3731_v5, %v8422_v18  ;;  %v3854_v7 = vrot.slane %v3803_v50, %v8427_v24  ;;  %v3813_v40 = vcombine.high %v3803_v50, %v3803_v50  ;;  %v3796_v46 = vrot.slane %v3780_v32, %v8422_v18 }
 0x9c9   :  { %4611 = vrot.lane.b32.xlu1 %v3710_v6, %s8297_s19  ;;  %v3822_v21 = vrot.slane %v3754_v61, %v8427_v24  ;;  %v3764_v29 = vcombine.high %v3754_v61, %v3754_v61  ;;  %v3826_v51 = vrot.slane %v3762_v23, %v8427_v24  ;;  %v3761_v41 = vrot.slane %v3733_v27, %v8422_v18 }
 0x9ca   :  { %v3834_v43 = vrot.slane %v3747_v35, %v8427_v24  ;;  %v3763_v44 = vcombine.high %v3747_v35, %v3747_v35  ;;  %v3858_v11 = vrot.slane %v3811_v20, %v8427_v24  ;;  %v3862_v6 = vrot.slane %v3813_v40, %v8427_v24 }
 0x9cb   :  { %v3830_v62 = vrot.slane %v3764_v29, %v8427_v24  ;;  %v3838_v13 = vrot.slane %v3761_v41, %v8427_v24  ;;  %v3765_v49 = vcombine.high %v3761_v41, %v3761_v41  ;;  %v3810_v17 = vrot.slane %v3782_v54, %v8422_v18 }
 0x9cc   :  { %v3842_v59 = vrot.slane %v3763_v44, %v8427_v24  ;;  %v3866_v9 = vrot.slane %v3796_v46, %v8427_v24  ;;  %v3812_v53 = vcombine.high %v3796_v46, %v3796_v46 }
 0x9cd   :  { %v3846_v31 = vrot.slane %v3765_v49, %v8427_v24  ;;  %v3870_v22 = vrot.slane %v3810_v17, %v8427_v24  ;;  %v3814_v60 = vcombine.high %v3810_v17, %v3810_v17 }
 0x9ce   :  { %v3874_v61 = vrot.slane %v3812_v53, %v8427_v24 }
 0x9cf   :  { %v3878_v18 = vrot.slane %v3814_v60, %v8427_v24 }
 0xa32   :  { %v3900_v55 = vpop.permute.xlu0 %3899 }
 0xa33   :  { %v3898_v28 = vpop.permute.xlu1 %3897  ;;  %v3911_v57 = vmul.f32 %v3900_v55, %v3850_v56  ;;  %v3912_v30 = vmul.f32 %v3900_v55, %v3854_v7  ;;  %v3913_v15 = vmul.f32 %v3900_v55, %v3858_v11  ;;  %v3914_v19 = vmul.f32 %v3900_v55, %v3862_v6 }
 0xa34   :  { %v3903_v33 = vmul.f32 %v3898_v28, %v3818_v25  ;;  %v3904_v36 = vmul.f32 %v3898_v28, %v3822_v21  ;;  %v3905_v34 = vmul.f32 %v3898_v28, %v3826_v51  ;;  %v3906_v38 = vmul.f32 %v3898_v28, %v3830_v62 }
 0xa35   :  { %v3907_v16 = vmul.f32 %v3898_v28, %v3834_v43  ;;  %v3908_v26 = vmul.f32 %v3898_v28, %v3838_v13  ;;  %v3909_v1 = vmul.f32 %v3898_v28, %v3842_v59  ;;  %v3910_v63 = vmul.f32 %v3898_v28, %v3846_v31 }
 0xa36   :  { %7804 = vmatprep.mubr.msk.f32.mxu1 %vm343_vm0, %v3903_v33  ;;  %v3915_v2 = vmul.f32 %v3900_v55, %v3866_v9  ;;  %v3916_v5 = vmul.f32 %v3900_v55, %v3870_v22  ;;  %v3917_v23 = vmul.f32 %v3900_v55, %v3874_v61  ;;  %v3918_v21 = vmul.f32 %v3900_v55, %v3878_v18 }
 0xa37   :  { %7805 = vmatmul.mubr.msk.f32.vlgmr.msra.gmra.mrb[18].mxu1 %vm343_vm0, %v3904_v36 }
 0xa38   :  { %7807 = vmatprep.mubr.msk.f32.mxu1 %vm343_vm0, %v3905_v34 }
 0xa3b   :  { %7808 = vmatmul.mubr.msk.f32.gmra.mrb[52].mxu1 %vm343_vm0, %v3906_v38 }
 0xa3c   :  { %7810 = vmatprep.mubr.msk.f32.mxu1 %vm343_vm0, %v3907_v16 }
 0xa3f   :  { %7811 = vmatmul.mubr.msk.f32.gmra.mrb[54].mxu1 %vm343_vm0, %v3908_v26 }
 0xa40   :  { %7813 = vmatprep.mubr.msk.f32.mxu1 %vm343_vm0, %v3909_v1 }
 0xa43   :  { %7814 = vmatmul.mubr.msk.f32.gmra.mrb[56].mxu1 %vm343_vm0, %v3910_v63 }
 0xa44   :  { %7816 = vmatprep.mubr.msk.f32.mxu1 %vm343_vm0, %v3911_v57 }
 0xa47   :  { %7817 = vmatmul.mubr.msk.f32.gmra.mrb[58].mxu1 %vm343_vm0, %v3912_v30 }
 0xa48   :  { %7819 = vmatprep.mubr.msk.f32.mxu1 %vm343_vm0, %v3913_v15 }
 0xa4b   :  { %7820 = vmatmul.mubr.msk.f32.gmra.mrb[60].mxu1 %vm343_vm0, %v3914_v19 }
 0xa4c   :  { %7822 = vmatprep.mubr.msk.f32.mxu1 %vm343_vm0, %v3915_v2 }
 0xa4f   :  { %7823 = vmatmul.mubr.msk.f32.gmra.mrb[62].mxu1 %vm343_vm0, %v3916_v5 }
 0xa50   :  { %7825 = vmatprep.mubr.msk.f32.mxu1 %vm343_vm0, %v3917_v23 }
 0xa53   :  { %7826 = vmatmul.mubr.msk.f32.gmra.mrb[64].mxu1 %vm343_vm0, %v3918_v21 }
 0xb0a   :  { %v7806_v25 = vpop.f32.mrb[18].mxu1 }
 0xb0b   :  { %v4119_v8 = vsel %vm824_vm2, %v7806_v25, -inf  ;;  %v4033_v27 = vpop.f32.mrb[19].mxu1 }
 0xb0c   :  { %v4120_v28 = vrot.slane %v4119_v8, 4  ;;  %v4112_v29 = vsel %vm824_vm2, %v4033_v27, -inf }
 0xb0d   :  { %v4113_v35 = vrot.slane %v4112_v29, 4 }
 0xb0e   :  { %v4121_v33 = vmax.f32 %v4119_v8, %v4120_v28  ;;  %v7809_v36 = vpop.f32.mrb[52].mxu1 }
 0xb0f   :  { %v4114_v51 = vmax.f32 %v4112_v29, %v4113_v35  ;;  %v4133_v34 = vsel %vm824_vm2, %v7809_v36, -inf  ;;  %v4043_v52 = vpop.f32.mrb[53].mxu1 }
 0xb10   :  { %v4122_v62 = vrot.slane %v4121_v33, 2  ;;  %v4134_v41 = vrot.slane %v4133_v34, 4  ;;  %v4126_v43 = vsel %vm824_vm2, %v4043_v52, -inf }
 0xb11   :  { %v4115_v44 = vrot.slane %v4114_v51, 2  ;;  %v4127_v38 = vrot.slane %v4126_v43, 4 }
 0xb12   :  { %v4123_v16 = vmax.f32 %v4121_v33, %v4122_v62  ;;  %v4135_v47 = vmax.f32 %v4133_v34, %v4134_v41  ;;  %v9302_v48 = vpop.f32.mrb[54].mxu1 }
 0xb13   :  { %v4116_v13 = vmax.f32 %v4114_v51, %v4115_v44  ;;  %v4128_v49 = vmax.f32 %v4126_v43, %v4127_v38  ;;  %v4147_v58 = vsel %vm824_vm2, %v9302_v48, -inf  ;;  %v9306_v59 = vpop.f32.mrb[55].mxu1 }
 0xb14   :  { %v4124_v26 = vrot.slane %v4123_v16, 1  ;;  %v4136_v1 = vrot.slane %v4135_v47, 2  ;;  %v4148_v32 = vrot.slane %v4147_v58, 4  ;;  %v4140_v50 = vsel %vm824_vm2, %v9306_v59, -inf }
 0xb15   :  { %v4117_v55 = vrot.slane %v4116_v13, 1  ;;  %v4129_v31 = vrot.slane %v4128_v49, 2  ;;  %v4141_v20 = vrot.slane %v4140_v50, 4 }
 0xb16   :  { %v4125_v56 = vmax.f32 %v4123_v16, %v4124_v26  ;;  %v4137_v63 = vmax.f32 %v4135_v47, %v4136_v1  ;;  %v4149_v57 = vmax.f32 %v4147_v58, %v4148_v32  ;;  %v9310_v54 = vpop.f32.mrb[56].mxu1 }
 0xb17   :  { %v4118_v7 = vmax.f32 %v4116_v13, %v4117_v55  ;;  %v4130_v40 = vmax.f32 %v4128_v49, %v4129_v31  ;;  %v4142_v46 = vmax.f32 %v4140_v50, %v4141_v20  ;;  %v4161_v11 = vsel %vm824_vm2, %v9310_v54, -inf  ;;  %v9314_v30 = vpop.f32.mrb[57].mxu1 }
 0xb18   :  { %v4225_v15 = vsub.f32 %v7806_v25, %v4125_v56  ;;  %v4138_v6 = vrot.slane %v4137_v63, 1  ;;  %v4150_v17 = vrot.slane %v4149_v57, 2  ;;  %v4162_v9 = vrot.slane %v4161_v11, 4 }
 0xb19   :  { %v4224_v53 = vsub.f32 %v4033_v27, %v4118_v7  ;;  %v4131_v19 = vrot.slane %v4130_v40, 1  ;;  %v4143_v2 = vrot.slane %v4142_v46, 2  ;;  %v4154_v22 = vsel %vm824_vm2, %v9314_v30, -inf }
 0xb1a   :  { %v4242_v60 = vmul.f32 1.442695, %v4225_v15  ;;  %v4139_v61 = vmax.f32 %v4137_v63, %v4138_v6  ;;  %v4151_v5 = vmax.f32 %v4149_v57, %v4150_v17  ;;  %v4163_v23 = vmax.f32 %v4161_v11, %v4162_v9  ;;  %v9318_v18 = vpop.f32.mrb[58].mxu1 }
 0xb1b   :  { %v4240_v21 = vmul.f32 1.442695, %v4224_v53  ;;  %v4132_v8 = vmax.f32 %v4130_v40, %v4131_v19  ;;  %v4144_v28 = vmax.f32 %v4142_v46, %v4143_v2  ;;  %v4155_v29 = vrot.slane %v4154_v22, 4  ;;  %v9320_v25 = vpop.f32.mrb[59].mxu1 }
 0xb1c   :  { %8223 = vpow2.f32 %v4242_v60  ;;  %v4227_v35 = vsub.f32 %v7809_v36, %v4139_v61  ;;  %v4152_v27 = vrot.slane %v4151_v5, 1  ;;  %v4164_v33 = vrot.slane %v4163_v23, 2 }
 0xb1d   :  { %8225 = vpow2.f32 %v4240_v21  ;;  %v4226_v51 = vsub.f32 %v4043_v52, %v4132_v8  ;;  %v4145_v34 = vrot.slane %v4144_v28, 1  ;;  %v4156_v62 = vmax.f32 %v4154_v22, %v4155_v29 }
 0xb1e   :  { %v4246_v41 = vmul.f32 1.442695, %v4227_v35  ;;  %v4153_v43 = vmax.f32 %v4151_v5, %v4152_v27  ;;  %v4165_v44 = vmax.f32 %v4163_v23, %v4164_v33  ;;  %v4175_v38 = vsel %vm824_vm2, %v9318_v18, -inf  ;;  %v9324_v16 = vpop.f32.mrb[60].mxu1 }
 0xb1f   :  { %v4244_v47 = vmul.f32 1.442695, %v4226_v51  ;;  %v4146_v13 = vmax.f32 %v4144_v28, %v4145_v34  ;;  %v4157_v49 = vrot.slane %v4156_v62, 2  ;;  %v4176_v58 = vrot.slane %v4175_v38, 4  ;;  %v9326_v26 = vpop.f32.mrb[61].mxu1 }
 0xb20   :  { %8227 = vpow2.f32 %v4246_v41  ;;  %v4229_v36 = vsub.f32 %v9302_v48, %v4153_v43  ;;  %v4166_v52 = vrot.slane %v4165_v44, 1  ;;  %v4168_v1 = vsel %vm824_vm2, %v9320_v25, -inf }
 0xb21   :  { %8229 = vpow2.f32 %v4244_v47  ;;  %v4228_v32 = vsub.f32 %v9306_v59, %v4146_v13  ;;  %v4158_v50 = vmax.f32 %v4156_v62, %v4157_v49  ;;  %v4177_v55 = vmax.f32 %v4175_v38, %v4176_v58 }
 0xb22   :  { %v4250_v31 = vmul.f32 1.442695, %v4229_v36  ;;  %v4167_v20 = vmax.f32 %v4165_v44, %v4166_v52  ;;  %v4169_v56 = vrot.slane %v4168_v1, 4  ;;  %v4189_v63 = vsel %vm824_vm2, %v9324_v16, -inf  ;;  %v9334_v57 = vpop.f32.mrb[62].mxu1 }
 0xb23   :  { %v4248_v7 = vmul.f32 1.442695, %v4228_v32  ;;  %v4159_v40 = vrot.slane %v4158_v50, 1  ;;  %v4178_v48 = vrot.slane %v4177_v55, 2  ;;  %v4190_v46 = vrot.slane %v4189_v63, 4  ;;  %v9336_v11 = vpop.f32.mrb[63].mxu1 }
 0xb24   :  { %8231 = vpow2.f32 %v4250_v31  ;;  %v4231_v15 = vsub.f32 %v9310_v54, %v4167_v20  ;;  %v4170_v59 = vmax.f32 %v4168_v1, %v4169_v56  ;;  %v4182_v22 = vsel %vm824_vm2, %v9326_v26, -inf }
 0xb25   :  { %8233 = vpow2.f32 %v4248_v7  ;;  %v4160_v6 = vmax.f32 %v4158_v50, %v4159_v40  ;;  %v4179_v17 = vmax.f32 %v4177_v55, %v4178_v48  ;;  %v4191_v9 = vmax.f32 %v4189_v63, %v4190_v46 }
 0xb26   :  { %v9339_v53 = vpop.eup %8223  ;;  %v4254_v19 = vmul.f32 1.442695, %v4231_v15  ;;  %v4171_v2 = vrot.slane %v4170_v59, 2  ;;  %v9343_v60 = vpop.f32.mrb[64].mxu1  ;;  %v4183_v44 = vrot.slane %v4182_v22, 4  ;;  %v4203_v55 = vsel %vm824_vm2, %v9334_v57, -inf }
 0xb27   :  { %v9345_v61 = vpop.eup %8225  ;;  %v4279_v5 = vsel %vm824_vm2, %v9339_v53, 0.0  ;;  %v4230_v54 = vsub.f32 %v9314_v30, %v4160_v6  ;;  %v4180_v23 = vrot.slane %v4179_v17, 1  ;;  %v4192_v21 = vrot.slane %v4191_v9, 2  ;;  %v9350_v8 = vpop.f32.mrb[65].mxu1 }
 0xb28   :  { %v4280_v28 = vrot.slane %v4279_v5, 4  ;;  %v4272_v29 = vsel %vm824_vm2, %v9345_v61, 0.0  ;;  %8235 = vpow2.f32 %v4254_v19  ;;  %v4172_v35 = vmax.f32 %v4170_v59, %v4171_v2 }
 0xb29   :  { %v4273_v27 = vrot.slane %v4272_v29, 4  ;;  %v4252_v33 = vmul.f32 1.442695, %v4230_v54  ;;  %v4181_v51 = vmax.f32 %v4179_v17, %v4180_v23  ;;  %v4193_v43 = vmax.f32 %v4191_v9, %v4192_v21 }
 0xb2a   :  { %v9354_v34 = vpop.eup %8227  ;;  %v4281_v62 = vadd.f32 %v4280_v28, %v4279_v5  ;;  %v4173_v41 = vrot.slane %v4172_v35, 1  ;;  %v4184_v46 = vmax.f32 %v4182_v22, %v4183_v44  ;;  %v4204_v21 = vrot.slane %v4203_v55, 4 }
 0xb2b   :  { %v9356_v30 = vpop.eup %8229  ;;  %v4274_v38 = vadd.f32 %v4273_v27, %v4272_v29  ;;  %v4293_v47 = vsel %vm824_vm2, %v9354_v34, 0.0  ;;  %8237 = vpow2.f32 %v4252_v33  ;;  %v4233_v13 = vsub.f32 %v9318_v18, %v4181_v51 }
 0xb2c   :  { %v4282_v49 = vrot.slane %v4281_v62, 2  ;;  %v4294_v58 = vrot.slane %v4293_v47, 4  ;;  %v4286_v36 = vsel %vm824_vm2, %v9356_v30, 0.0  ;;  %v4174_v52 = vmax.f32 %v4172_v35, %v4173_v41 }
 0xb2d   :  { %v4275_v1 = vrot.slane %v4274_v38, 2  ;;  %v4287_v32 = vrot.slane %v4286_v36, 4  ;;  %v4258_v50 = vmul.f32 1.442695, %v4233_v13  ;;  %v4194_v7 = vrot.slane %v4193_v43, 1 }
 0xb2e   :  { %v9365_v31 = vpop.eup %8231  ;;  %v4283_v20 = vadd.f32 %v4282_v49, %v4281_v62  ;;  %v4295_v56 = vadd.f32 %v4294_v58, %v4293_v47  ;;  %v4232_v63 = vsub.f32 %v9320_v25, %v4174_v52  ;;  %v4185_v35 = vrot.slane %v4184_v46, 2 }
 0xb2f   :  { %v9368_v18 = vpop.eup %8233  ;;  %v4288_v40 = vadd.f32 %v4287_v32, %v4286_v36  ;;  %v4307_v48 = vsel %vm824_vm2, %v9365_v31, 0.0  ;;  %8239 = vpow2.f32 %v4258_v50  ;;  %v4276_v15 = vadd.f32 %v4275_v1, %v4274_v38 }
 0xb30   :  { %v4296_v59 = vrot.slane %v4295_v56, 2  ;;  %v4308_v6 = vrot.slane %v4307_v48, 4  ;;  %v4300_v17 = vsel %vm824_vm2, %v9368_v18, 0.0  ;;  %v4256_v2 = vmul.f32 1.442695, %v4232_v63 }
 0xb31   :  { %v4289_v9 = vrot.slane %v4288_v40, 2  ;;  %v4301_v19 = vrot.slane %v4300_v17, 4  ;;  %v4284_v25 = vrot.slane %v4283_v20, 1  ;;  %v4195_v23 = vmax.f32 %v4193_v43, %v4194_v7 }
 0xb32   :  { %v9374_v5 = vpop.eup %8235  ;;  %v4309_v54 = vadd.f32 %v4308_v6, %v4307_v48  ;;  %v4297_v28 = vadd.f32 %v4296_v59, %v4295_v56  ;;  %v4277_v27 = vrot.slane %v4276_v15, 1  ;;  %8241 = vpow2.f32 %v4256_v2 }
 0xb33   :  { %v4302_v29 = vadd.f32 %v4301_v19, %v4300_v17  ;;  %v4321_v22 = vsel %vm824_vm2, %v9374_v5, 0.0  ;;  %v4290_v33 = vadd.f32 %v4289_v9, %v4288_v40  ;;  %v4235_v38 = vsub.f32 %v9324_v16, %v4195_v23 }
 0xb34   :  { %v4310_v51 = vrot.slane %v4309_v54, 2  ;;  %v4322_v62 = vrot.slane %v4321_v22, 4  ;;  %v4285_v47 = vadd.f32 %v4284_v25, %v4283_v20  ;;  %v4298_v49 = vrot.slane %v4297_v28, 1 }
 0xb35   :  { %v9378_v41 = vpop.eup %8237  ;;  %v4303_v44 = vrot.slane %v4302_v29, 2  ;;  %v4262_v52 = vmul.f32 1.442695, %v4235_v38  ;;  %v4278_v1 = vadd.f32 %v4277_v27, %v4276_v15  ;;  %v4291_v32 = vrot.slane %v4290_v33, 1 }
 0xb36   :  { %v4311_v13 = vadd.f32 %v4310_v51, %v4309_v54  ;;  %v4314_v43 = vsel %vm824_vm2, %v9378_v41, 0.0  ;;  %v4323_v58 = vadd.f32 %v4322_v62, %v4321_v22  ;;  %v4186_v50 = vmax.f32 %v4184_v46, %v4185_v35 }
 0xb37   :  { %v4315_v36 = vrot.slane %v4314_v43, 4  ;;  %v4205_v56 = vmax.f32 %v4203_v55, %v4204_v21  ;;  %v4304_v7 = vadd.f32 %v4303_v44, %v4302_v29  ;;  %8243 = vpow2.f32 %v4262_v52 }
 0xb38   :  { %v4196_v16 = vsel %vm824_vm2, %v9336_v11, -inf  ;;  %8245 = vrcp.f32 %v4285_v47  ;;  %v4312_v20 = vrot.slane %v4311_v13, 1  ;;  %v4187_v59 = vrot.slane %v4186_v50, 1 }
 0xb39   :  { %v9383_v63 = vpop.eup %8239  ;;  %v4316_v40 = vadd.f32 %v4315_v36, %v4314_v43  ;;  %v4299_v6 = vadd.f32 %v4298_v49, %v4297_v28  ;;  %v4324_v17 = vrot.slane %v4323_v58, 2  ;;  %v4206_v9 = vrot.slane %v4205_v56, 2 }
 0xb3a   :  { %v4335_v48 = vsel %vm824_vm2, %v9383_v63, 0.0  ;;  %v4292_v46 = vadd.f32 %v4291_v32, %v4290_v33  ;;  %v4188_v55 = vmax.f32 %v4186_v50, %v4187_v59  ;;  %v4197_v19 = vrot.slane %v4196_v16, 4 }
 0xb3b   :  { %v4336_v15 = vrot.slane %v4335_v48, 4  ;;  %v4217_v2 = vsel %vm824_vm2, %v9343_v60, -inf  ;;  %v4305_v25 = vrot.slane %v4304_v7, 1  ;;  %v4317_v54 = vrot.slane %v4316_v40, 2 }
 0xb3c   :  { %v4207_v23 = vmax.f32 %v4205_v56, %v4206_v9  ;;  %v4218_v21 = vrot.slane %v4217_v2, 4  ;;  %v4313_v29 = vadd.f32 %v4312_v20, %v4311_v13  ;;  %v4234_v22 = vsub.f32 %v9326_v26, %v4188_v55  ;;  %v9394_v27 = vpop.eup %8241 }
 0xb3d   :  { %v4198_v35 = vmax.f32 %v4196_v16, %v4197_v19  ;;  %v4210_v28 = vsel %vm824_vm2, %v9350_v8, -inf  ;;  %v4325_v51 = vadd.f32 %v4324_v17, %v4323_v58  ;;  %v4337_v33 = vadd.f32 %v4336_v15, %v4335_v48 }
 0xb3e   :  { %v4208_v62 = vrot.slane %v4207_v23, 1  ;;  %v4219_v44 = vmax.f32 %v4217_v2, %v4218_v21  ;;  %v4328_v38 = vsel %vm824_vm2, %v9394_v27, 0.0  ;;  %v4260_v47 = vmul.f32 1.442695, %v4234_v22 }
 0xb3f   :  { %v4199_v43 = vrot.slane %v4198_v35, 2  ;;  %v4211_v49 = vrot.slane %v4210_v28, 4  ;;  %v4306_v36 = vadd.f32 %v4305_v25, %v4304_v7  ;;  %v4318_v13 = vadd.f32 %v4317_v54, %v4316_v40 }
 0xb40   :  { %v4329_v52 = vrot.slane %v4328_v38, 4  ;;  %v4209_v26 = vmax.f32 %v4207_v23, %v4208_v62  ;;  %8247 = vpow2.f32 %v4260_v47  ;;  %v4220_v50 = vrot.slane %v4219_v44, 2 }
 0xb41   :  { %v4200_v32 = vmax.f32 %v4198_v35, %v4199_v43  ;;  %v4212_v56 = vmax.f32 %v4210_v28, %v4211_v49  ;;  %v9398_v16 = vpop.eup %8243  ;;  %v4338_v58 = vrot.slane %v4337_v33, 2  ;;  %8249 = vrcp.f32 %v4278_v1 }
 0xb42   :  { %v4330_v20 = vadd.f32 %v4329_v52, %v4328_v38  ;;  %v4237_v48 = vsub.f32 %v9334_v57, %v4209_v26  ;;  %v8246_v59 = vpop.eup %8245  ;;  %v4349_v17 = vsel %vm824_vm2, %v9398_v16, 0.0  ;;  %v4221_v7 = vmax.f32 %v4219_v44, %v4220_v50 }
 0xb43   :  { %v4201_v15 = vrot.slane %v4200_v32, 1  ;;  %v4213_v40 = vrot.slane %v4212_v56, 2  ;;  %v4319_v9 = vrot.slane %v4318_v13, 1  ;;  %v4350_v19 = vrot.slane %v4349_v17, 4 }
 0xb44   :  { %v4331_v55 = vrot.slane %v4330_v20, 2  ;;  %v4266_v2 = vmul.f32 1.442695, %v4237_v48  ;;  %v4326_v25 = vrot.slane %v4325_v51, 1  ;;  %v4222_v23 = vrot.slane %v4221_v7, 1 }
 0xb45   :  { %v4202_v54 = vmax.f32 %v4200_v32, %v4201_v15  ;;  %v4214_v21 = vmax.f32 %v4212_v56, %v4213_v40  ;;  %v4339_v22 = vadd.f32 %v4338_v58, %v4337_v33  ;;  %v4351_v28 = vadd.f32 %v4350_v19, %v4349_v17 }
 0xb46   :  { %v4332_v35 = vadd.f32 %v4331_v55, %v4330_v20  ;;  %8251 = vpow2.f32 %v4266_v2  ;;  %v4223_v1 = vmax.f32 %v4221_v7, %v4222_v23  ;;  %v4320_v38 = vadd.f32 %v4319_v9, %v4318_v13 }
 0xb47   :  { %v4236_v57 = vsub.f32 %v9336_v11, %v4202_v54  ;;  %v4215_v62 = vrot.slane %v4214_v21, 1  ;;  %8253 = vrcp.f32 %v4292_v46  ;;  %v4352_v47 = vrot.slane %v4351_v28, 2 }
 0xb48   :  { %v4333_v44 = vrot.slane %v4332_v35, 1  ;;  %8255 = vrcp.f32 %v4299_v6  ;;  %v4239_v49 = vsub.f32 %v9343_v60, %v4223_v1  ;;  %v4327_v26 = vadd.f32 %v4326_v25, %v4325_v51 }
 0xb49   :  { %v4264_v43 = vmul.f32 1.442695, %v4236_v57  ;;  %v4216_v52 = vmax.f32 %v4214_v21, %v4215_v62  ;;  %8257 = vrcp.f32 %v4306_v36  ;;  %v4340_v32 = vrot.slane %v4339_v22, 1 }
 0xb4a   :  { %8259 = vrcp.f32 %v4313_v29  ;;  %v9405_v33 = vpop.eup %8247  ;;  %v4270_v50 = vmul.f32 1.442695, %v4239_v49  ;;  %v4334_v46 = vadd.f32 %v4333_v44, %v4332_v35  ;;  %v4353_v13 = vadd.f32 %v4352_v47, %v4351_v28 }
 0xb4b   :  { %8261 = vpow2.f32 %v4264_v43  ;;  %v4238_v11 = vsub.f32 %v9350_v8, %v4216_v52  ;;  %v8250_v56 = vpop.eup %8249  ;;  %v4342_v6 = vsel %vm824_vm2, %v9405_v33, 0.0  ;;  %v4341_v36 = vadd.f32 %v4340_v32, %v4339_v22 }
 0xb4c   :  { %8263 = vrcp.f32 %v4320_v38  ;;  %v4343_v58 = vrot.slane %v4342_v6, 4  ;;  %v4400_v51 = vmul.f32 %v8250_v56, %v9345_v61  ;;  %v4401_v29 = vmul.f32 %v8246_v59, %v9339_v53 }
 0xb4d   :  { %8265 = vpow2.f32 %v4270_v50  ;;  %v4268_v60 = vmul.f32 1.442695, %v4238_v11  ;;  %v4354_v48 = vrot.slane %v4353_v13, 1 }
 0xb4e   :  { %8267 = vrcp.f32 %v4327_v26  ;;  %v4344_v20 = vadd.f32 %v4343_v58, %v4342_v6  ;;  %7830 = vmatprep.mubr.msk.f32.mxu0 %vm824_vm2, %v4400_v51 }
 0xb4f   :  { %8269 = vpow2.f32 %v4268_v60  ;;  %7831 = vmatmul.mubr.msk.f32.vlgmr.msra.gmra.mrb[52].mxu0 %vm824_vm2, %v4401_v29  ;;  %v4355_v2 = vadd.f32 %v4354_v48, %v4353_v13 }
 0xb50   :  { %v9413_v8 = vpop.eup %8251  ;;  %8271 = vrcp.f32 %v4334_v46  ;;  %v4345_v15 = vrot.slane %v4344_v20, 2 }
 0xb51   :  { %v8254_v17 = vpop.eup %8253  ;;  %v4363_v7 = vsel %vm824_vm2, %v9413_v8, 0.0  ;;  %8273 = vrcp.f32 %v4341_v36 }
 0xb52   :  { %v8256_v61 = vpop.eup %8255  ;;  %v4364_v40 = vrot.slane %v4363_v7, 4  ;;  %v4402_v53 = vmul.f32 %v8254_v17, %v9356_v30  ;;  %v4346_v9 = vadd.f32 %v4345_v15, %v4344_v20  ;;  %8275 = vrcp.f32 %v4355_v2 }
 0xb53   :  { %v8258_v59 = vpop.eup %8257  ;;  %v4403_v55 = vmul.f32 %v8256_v61, %v9354_v34 }
 0xb54   :  { %v8260_v19 = vpop.eup %8259  ;;  %v4365_v25 = vadd.f32 %v4364_v40, %v4363_v7  ;;  %7833 = vmatprep.mubr.msk.f32.mxu0 %vm824_vm2, %v4402_v53  ;;  %v4404_v54 = vmul.f32 %v8258_v59, %v9368_v18  ;;  %v4347_v21 = vrot.slane %v4346_v9, 1 }
 0xb55   :  { %v8262_v23 = vpop.eup %8261  ;;  %7834 = vmatmul.mubr.msk.f32.gmra.mrb[54].mxu0 %vm824_vm2, %v4403_v55  ;;  %v4405_v1 = vmul.f32 %v8260_v19, %v9365_v31 }
 0xb56   :  { %v8264_v22 = vpop.eup %8263  ;;  %v4366_v35 = vrot.slane %v4365_v25, 2  ;;  %v4356_v30 = vsel %vm824_vm2, %v8262_v23, 0.0  ;;  %7836 = vmatprep.mubr.msk.f32.mxu0 %vm824_vm2, %v4404_v54  ;;  %v4348_v57 = vadd.f32 %v4347_v21, %v4346_v9 }
 0xb57   :  { %v8266_v28 = vpop.eup %8265  ;;  %v4357_v34 = vrot.slane %v4356_v30, 4  ;;  %v4406_v62 = vmul.f32 %v8264_v22, %v9378_v41 }
 0xb58   :  { %v8268_v38 = vpop.eup %8267  ;;  %v4367_v44 = vadd.f32 %v4366_v35, %v4365_v25  ;;  %v4377_v18 = vsel %vm824_vm2, %v8266_v28, 0.0  ;;  %8277 = vrcp.f32 %v4348_v57 }
 0xb59   :  { %v8270_v47 = vpop.eup %8269  ;;  %v4358_v43 = vadd.f32 %v4357_v34, %v4356_v30  ;;  %v4378_v49 = vrot.slane %v4377_v18, 4  ;;  %7837 = vmatmul.mubr.msk.f32.gmra.mrb[56].mxu0 %vm824_vm2, %v4405_v1  ;;  %v4407_v31 = vmul.f32 %v8268_v38, %v9374_v5 }
 0xb5a   :  { %v8272_v52 = vpop.eup %8271  ;;  %v4368_v26 = vrot.slane %v4367_v44, 1  ;;  %v4370_v32 = vsel %vm824_vm2, %v8270_v47, 0.0  ;;  %7839 = vmatprep.mubr.msk.f32.mxu0 %vm824_vm2, %v4406_v62 }
 0xb5b   :  { %v4359_v41 = vrot.slane %v4358_v43, 2  ;;  %v4379_v50 = vadd.f32 %v4378_v49, %v4377_v18  ;;  %v4371_v11 = vrot.slane %v4370_v32, 4  ;;  %v4408_v56 = vmul.f32 %v8272_v52, %v9394_v27  ;;  %v8274_v46 = vpop.eup %8273 }
 0xb5c   :  { %v4369_v60 = vadd.f32 %v4368_v26, %v4367_v44  ;;  %v4409_v20 = vmul.f32 %v8274_v46, %v9383_v63  ;;  %v8276_v27 = vpop.eup %8275 }
 0xb5d   :  { %v4360_v13 = vadd.f32 %v4359_v41, %v4358_v43  ;;  %v4380_v6 = vrot.slane %v4379_v50, 2  ;;  %v4372_v58 = vadd.f32 %v4371_v11, %v4370_v32  ;;  %7840 = vmatmul.mubr.msk.f32.gmra.mrb[58].mxu0 %vm824_vm2, %v4407_v31  ;;  %v4411_v59 = vmul.f32 %v8276_v27, %v9398_v16  ;;  %v6826_v16 = vld [vmem:[%s10043_s6 + $0x8] sm:$0xff] }
 0xb5e   :  { %7842 = vmatprep.mubr.msk.f32.mxu0 %vm824_vm2, %v4408_v56  ;;  %8279 = vrcp.f32 %v4369_v60  ;;  %7854 = vmatprep.subr.mxu1 %v6826_v16 }
 0xb5f   :  { %v4361_v51 = vrot.slane %v4360_v13, 1  ;;  %v4381_v36 = vadd.f32 %v4380_v6, %v4379_v50  ;;  %v4373_v29 = vrot.slane %v4372_v58, 2  ;;  %7855 = vmatpush3.msra.mxu1 %v6826_v16 }
 0xb61   :  { %v4362_v5 = vadd.f32 %v4361_v51, %v4360_v13  ;;  %v4382_v48 = vrot.slane %v4381_v36, 1  ;;  %v4374_v17 = vadd.f32 %v4373_v29, %v4372_v58  ;;  %7843 = vmatmul.mubr.msk.f32.gmra.mrb[60].mxu0 %vm824_vm2, %v4409_v20 }
 0xb62   :  { %v8278_v15 = vpop.eup %8277 }
 0xb63   :  { %v4383_v7 = vadd.f32 %v4382_v48, %v4381_v36  ;;  %v4375_v61 = vrot.slane %v4374_v17, 1  ;;  %8281 = vrcp.f32 %v4362_v5  ;;  %v4410_v40 = vmul.f32 %v8278_v15, %v9405_v33 }
 0xb65   :  { %v4376_v53 = vadd.f32 %v4375_v61, %v4374_v17  ;;  %7845 = vmatprep.mubr.msk.f32.mxu0 %vm824_vm2, %v4410_v40  ;;  %8283 = vrcp.f32 %v4383_v7 }
 0xb66   :  { %7846 = vmatmul.mubr.msk.f32.gmra.mrb[62].mxu0 %vm824_vm2, %v4411_v59 }
 0xb67   :  { %8285 = vrcp.f32 %v4376_v53 }
 0xb68   :  { %v8280_v63 = vpop.eup %8279 }
 0xb69   :  { %v4413_v19 = vmul.f32 %v8280_v63, %v9413_v8  ;;  %v4610_v8 = vpop.permute.xlu1 %4609 }
 0xb6d   :  { %v8282_v9 = vpop.eup %8281 }
 0xb6e   :  { %v4412_v55 = vmul.f32 %v8282_v9, %v8262_v23 }
 0xb6f   :  { %v8284_v2 = vpop.eup %8283 }
 0xb70   :  { %7848 = vmatprep.mubr.msk.f32.mxu0 %vm824_vm2, %v4412_v55  ;;  %v4415_v54 = vmul.f32 %v8284_v2, %v8266_v28  ;;  %v9457_v2 = vpop.permute.xlu1 %4611 }
 0xb71   :  { %v8286_v25 = vpop.eup %8285  ;;  %7849 = vmatmul.mubr.msk.f32.gmra.mrb[64].mxu0 %vm824_vm2, %v4413_v19 }
 0xb72   :  { %v4414_v33 = vmul.f32 %v8286_v25, %v8270_v47 }
 0xb74   :  { %7851 = vmatprep.mubr.msk.f32.mxu0 %vm824_vm2, %v4414_v33 }
 0xb75   :  { %7852 = vmatmul.mubr.msk.f32.gmra.mrb[66].mxu0 %vm824_vm2, %v4415_v54 }
 0xb76   :  { %5108 = vmatprep.mubr.bf16.mxu0 %v8300_v37 }
 0xc22   :  { %v7832_v23 = vpop.f32.mrb[52].mxu0 }
 0xc23   :  { %v4616_v21 = vmul.f32 %v7832_v23, %v4610_v8  ;;  %v4530_v22 = vpop.f32.mrb[53].mxu0 }
 0xc24   :  { %v4615_v35 = vmul.f32 %v4610_v8, %v4530_v22 }
 0xc25   :  { %v4638_v30 = vsel %vm343_vm0, %v4616_v21, 0.0 }
 0xc26   :  { %v4639_v28 = vrot.slane %v4638_v30, 4  ;;  %v4631_v57 = vsel %vm343_vm0, %v4615_v35, 0.0 }
 0xc27   :  { %v4632_v34 = vrot.slane %v4631_v57, 4 }
 0xc28   :  { %v7835_v1 = vpop.f32.mrb[54].mxu0  ;;  %v4640_v62 = vadd.f32 %v4639_v28, %v4638_v30 }
 0xc29   :  { %v4618_v38 = vmul.f32 %v7835_v1, %v4610_v8  ;;  %v4540_v44 = vpop.f32.mrb[55].mxu0  ;;  %v4633_v18 = vadd.f32 %v4632_v34, %v4631_v57 }
 0xc2a   :  { %v4617_v47 = vmul.f32 %v4610_v8, %v4540_v44  ;;  %v4641_v43 = vrot.slane %v4640_v62, 2 }
 0xc2b   :  { %v4652_v49 = vsel %vm343_vm0, %v4618_v38, 0.0  ;;  %v4634_v52 = vrot.slane %v4633_v18, 2 }
 0xc2c   :  { %v4653_v26 = vrot.slane %v4652_v49, 4  ;;  %v4645_v32 = vsel %vm343_vm0, %v4617_v47, 0.0  ;;  %v7838_v31 = vpop.f32.mrb[56].mxu0  ;;  %v4642_v41 = vadd.f32 %v4641_v43, %v4640_v62 }
 0xc2d   :  { %v4646_v50 = vrot.slane %v4645_v32, 4  ;;  %v4620_v11 = vmul.f32 %v7838_v31, %v4610_v8  ;;  %v4550_v56 = vpop.f32.mrb[57].mxu0  ;;  %v4635_v46 = vadd.f32 %v4634_v52, %v4633_v18 }
 0xc2e   :  { %v4654_v13 = vadd.f32 %v4653_v26, %v4652_v49  ;;  %v4619_v6 = vmul.f32 %v4610_v8, %v4550_v56  ;;  %v4643_v58 = vrot.slane %v4642_v41, 1 }
 0xc2f   :  { %v4647_v60 = vadd.f32 %v4646_v50, %v4645_v32  ;;  %v4666_v51 = vsel %vm343_vm0, %v4620_v11, 0.0  ;;  %v4636_v36 = vrot.slane %v4635_v46, 1 }
 0xc30   :  { %v4655_v29 = vrot.slane %v4654_v13, 2  ;;  %v4667_v20 = vrot.slane %v4666_v51, 4  ;;  %v4659_v5 = vsel %vm343_vm0, %v4619_v6, 0.0  ;;  %v7841_v48 = vpop.f32.mrb[58].mxu0  ;;  %v4644_v17 = vadd.f32 %v4643_v58, %v4642_v41 }
 0xc31   :  { %v4648_v27 = vrot.slane %v4647_v60, 2  ;;  %v4660_v15 = vrot.slane %v4659_v5, 4  ;;  %v4622_v7 = vmul.f32 %v7841_v48, %v4610_v8  ;;  %v4560_v61 = vpop.f32.mrb[59].mxu0  ;;  %v4637_v40 = vadd.f32 %v4636_v36, %v4635_v46 }
 0xc32   :  { %v4656_v53 = vadd.f32 %v4655_v29, %v4654_v13  ;;  %v4668_v59 = vadd.f32 %v4667_v20, %v4666_v51  ;;  %v4621_v63 = vmul.f32 %v4610_v8, %v4560_v61 }
 0xc33   :  { %v4649_v9 = vadd.f32 %v4648_v27, %v4647_v60  ;;  %v4661_v55 = vadd.f32 %v4660_v15, %v4659_v5  ;;  %v4680_v19 = vsel %vm343_vm0, %v4622_v7, 0.0  ;;  %v4765_v25 = vsel %vm1482_vm3, %v4644_v17, %v4637_v40 }
 0xc34   :  { %v4657_v33 = vrot.slane %v4656_v53, 1  ;;  %v4669_v54 = vrot.slane %v4668_v59, 2  ;;  %v4681_v16 = vrot.slane %v4680_v19, 4  ;;  %v7844_v23 = vpop.f32.mrb[60].mxu0  ;;  %v4673_v35 = vsel %vm343_vm0, %v4621_v63, 0.0 }
 0xc35   :  { %v4650_v21 = vrot.slane %v4649_v9, 1  ;;  %v4662_v22 = vrot.slane %v4661_v55, 2  ;;  %v4624_v30 = vmul.f32 %v7844_v23, %v9457_v2  ;;  %v4570_v28 = vpop.f32.mrb[61].mxu0  ;;  %v4674_v34 = vrot.slane %v4673_v35, 4 }
 0xc36   :  { %v4670_v8 = vadd.f32 %v4669_v54, %v4668_v59  ;;  %v4682_v57 = vadd.f32 %v4681_v16, %v4680_v19  ;;  %v4623_v44 = vmul.f32 %v9457_v2, %v4570_v28  ;;  %v4658_v52 = vadd.f32 %v4657_v33, %v4656_v53 }
 0xc37   :  { %v4651_v1 = vadd.f32 %v4650_v21, %v4649_v9  ;;  %v4663_v62 = vadd.f32 %v4662_v22, %v4661_v55  ;;  %v4694_v38 = vsel %vm343_vm0, %v4624_v30, 0.0  ;;  %v4675_v43 = vadd.f32 %v4674_v34, %v4673_v35 }
 0xc38   :  { %v4671_v18 = vrot.slane %v4670_v8, 1  ;;  %v4683_v47 = vrot.slane %v4682_v57, 2  ;;  %v4695_v49 = vrot.slane %v4694_v38, 4  ;;  %v4687_v31 = vsel %vm343_vm0, %v4623_v44, 0.0 }
 0xc39   :  { %v4766_v26 = vsel %vm1484_vm4, %v4651_v1, %v4765_v25  ;;  %v4664_v32 = vrot.slane %v4663_v62, 1  ;;  %v4676_v50 = vrot.slane %v4675_v43, 2  ;;  %v7847_v56 = vpop.f32.mrb[62].mxu0  ;;  %v4688_v13 = vrot.slane %v4687_v31, 4 }
 0xc3a   :  { %v4684_v41 = vadd.f32 %v4683_v47, %v4682_v57  ;;  %v4696_v11 = vadd.f32 %v4695_v49, %v4694_v38  ;;  %v4626_v6 = vmul.f32 %v7847_v56, %v9457_v2  ;;  %v4580_v58 = vpop.f32.mrb[63].mxu0  ;;  %v4767_v60 = vsel %vm1486_vm5, %v4658_v52, %v4766_v26 }
 0xc3b   :  { %v4665_v46 = vadd.f32 %v4664_v32, %v4663_v62  ;;  %v4672_v51 = vadd.f32 %v4671_v18, %v4670_v8  ;;  %v4677_v36 = vadd.f32 %v4676_v50, %v4675_v43  ;;  %v4625_v20 = vmul.f32 %v9457_v2, %v4580_v58 }
 0xc3c   :  { %v4697_v29 = vrot.slane %v4696_v11, 2  ;;  %v4685_v5 = vrot.slane %v4684_v41, 1  ;;  %v4689_v48 = vadd.f32 %v4688_v13, %v4687_v31  ;;  %v4708_v17 = vsel %vm343_vm0, %v4626_v6, 0.0 }
 0xc3d   :  { %v4768_v27 = vsel %vm1488_vm6, %v4665_v46, %v4767_v60  ;;  %v4678_v15 = vrot.slane %v4677_v36, 1  ;;  %v4709_v61 = vrot.slane %v4708_v17, 4  ;;  %v4701_v53 = vsel %vm343_vm0, %v4625_v20, 0.0 }
 0xc3e   :  { %v4698_v7 = vadd.f32 %v4697_v29, %v4696_v11  ;;  %v4690_v40 = vrot.slane %v4689_v48, 2  ;;  %v4769_v59 = vsel %vm1490_vm7, %v4672_v51, %v4768_v27  ;;  %v4702_v19 = vrot.slane %v4701_v53, 4 }
 0xc3f   :  { %v4679_v63 = vadd.f32 %v4678_v15, %v4677_v36  ;;  %v4710_v55 = vadd.f32 %v4709_v61, %v4708_v17  ;;  %v4686_v25 = vadd.f32 %v4685_v5, %v4684_v41 }
 0xc40   :  { %v4699_v9 = vrot.slane %v4698_v7, 1  ;;  %v4691_v33 = vadd.f32 %v4690_v40, %v4689_v48  ;;  %v4703_v16 = vadd.f32 %v4702_v19, %v4701_v53 }
 0xc41   :  { %v4711_v54 = vrot.slane %v4710_v55, 2  ;;  %v4770_v23 = vsel %vm1492_vm8, %v4679_v63, %v4769_v59 }
 0xc42   :  { %v4700_v21 = vadd.f32 %v4699_v9, %v4698_v7  ;;  %v4692_v22 = vrot.slane %v4691_v33, 1  ;;  %v4771_v35 = vsel %vm1494_vm9, %v4686_v25, %v4770_v23  ;;  %v4704_v28 = vrot.slane %v4703_v16, 2 }
 0xc43   :  { %v4712_v30 = vadd.f32 %v4711_v54, %v4710_v55  ;;  %7856 = vmatprep.mubr.msk.f32.mxu1 %vm343_vm0, %v4771_v35 }
 0xc44   :  { %v7850_v8 = vpop.f32.mrb[64].mxu0  ;;  %v4693_v57 = vadd.f32 %v4692_v22, %v4691_v33  ;;  %v4705_v62 = vadd.f32 %v4704_v28, %v4703_v16  ;;  %v7135_v22 = vld [vmem:[%s10044_s7 + $0x1] ss:$0 sm:$0xff] }
 0xc45   :  { %v4628_v34 = vmul.f32 %v7850_v8, %v9457_v2  ;;  %v4590_v1 = vpop.f32.mrb[65].mxu0  ;;  %v4713_v18 = vrot.slane %v4712_v30, 1 }
 0xc46   :  { %v4627_v38 = vmul.f32 %v9457_v2, %v4590_v1  ;;  %v4772_v44 = vsel %vm1482_vm3, %v4700_v21, %v4693_v57  ;;  %v4706_v43 = vrot.slane %v4705_v62, 1 }
 0xc47   :  { %v4722_v47 = vsel %vm343_vm0, %v4628_v34, 0.0  ;;  %v4714_v46 = vadd.f32 %v4713_v18, %v4712_v30 }
 0xc48   :  { %v4723_v49 = vrot.slane %v4722_v47, 4  ;;  %v4715_v52 = vsel %vm343_vm0, %v4627_v38, 0.0  ;;  %v7853_v26 = vpop.f32.mrb[66].mxu0  ;;  %v4707_v50 = vadd.f32 %v4706_v43, %v4705_v62  ;;  %v6830_v38 = vld [vmem:[%s10045_s10 + $0x40] sm:$0xff] }
 0xc49   :  { %v4716_v32 = vrot.slane %v4715_v52, 4  ;;  %v4630_v31 = vmul.f32 %v7853_v26, %v9457_v2  ;;  %v4600_v41 = vpop.f32.mrb[67].mxu0  ;;  %v7140_v18 = vcombine.low %v6830_v38, %v6830_v38 }
 0xc4a   :  { %v4724_v11 = vadd.f32 %v4723_v49, %v4722_v47  ;;  %v4629_v56 = vmul.f32 %v9457_v2, %v4600_v41  ;;  %v4773_v58 = vsel %vm1484_vm4, %v4707_v50, %v4772_v44  ;;  %v7141_v44 = vcombine.high %v6830_v38, %v6830_v38 }
 0xc4b   :  { %v4717_v13 = vadd.f32 %v4716_v32, %v4715_v52  ;;  %v4736_v6 = vsel %vm343_vm0, %v4630_v31, 0.0  ;;  %v4774_v20 = vsel %vm1486_vm5, %v4714_v46, %v4773_v58  ;;  %v5029_v47 = vsel %vm1177_vm1, %v7140_v18, 0  ;;  %v6833_v58 = vld [vmem:[%s10045_s10 + $0x58] sm:$0xff] }
 0xc4c   :  { %v4725_v60 = vrot.slane %v4724_v11, 2  ;;  %v4737_v51 = vrot.slane %v4736_v6, 4  ;;  %v4729_v36 = vsel %vm343_vm0, %v4629_v56, 0.0  ;;  %7156 = vmatprep.subr.msk.bf16.mxu0 %vm1177_vm1, %v7141_v44 }
 0xc4d   :  { %v4718_v29 = vrot.slane %v4717_v13, 2  ;;  %v4730_v5 = vrot.slane %v4729_v36, 4  ;;  %5077 = vmatpush1.bf16.msra.mxu0 %v5029_v47 }
 0xc4e   :  { %v4726_v48 = vadd.f32 %v4725_v60, %v4724_v11  ;;  %v4738_v17 = vadd.f32 %v4737_v51, %v4736_v6  ;;  %v6831_v11 = vld [vmem:[%s10045_s10 + $0x48] sm:$0xff]  ;;  %v6832_v6 = vld [vmem:[%s10045_s10 + $0x50] sm:$0xff]  ;;  %v7147_v51 = vcombine.high %v6833_v58, %v6833_v58 }
 0xc4f   :  { %v4719_v27 = vadd.f32 %v4718_v29, %v4717_v13  ;;  %v4731_v15 = vadd.f32 %v4730_v5, %v4729_v36  ;;  %v7143_v56 = vcombine.high %v6831_v11, %v6831_v11  ;;  %v7142_v46 = vcombine.low %v6831_v11, %v6831_v11  ;;  %v8034_v11 = vld [vmem:[%s10046_s12 + $0x490] sm:$0xff]  }
 0xc50   :  { %v4727_v7 = vrot.slane %v4726_v48, 1  ;;  %v4739_v2 = vrot.slane %v4738_v17, 2  ;;  %v7145_v60 = vcombine.high %v6832_v6, %v6832_v6 }
 0xc51   :  { %v4720_v61 = vrot.slane %v4719_v27, 1  ;;  %v4732_v40 = vrot.slane %v4731_v15, 2  ;;  %7158 = vmatprep.subr.msk.bf16.mxu1 %vm1177_vm1, %v7143_v56  ;;  %v5035_v13 = vsel %vm1177_vm1, %v7142_v46, 0  ;;  %v8035_v56 = vld [vmem:[%s10046_s12 + $0x458] sm:$0xff]  }
 0xc52   :  { %v4740_v53 = vadd.f32 %v4739_v2, %v4738_v17  ;;  %v4728_v9 = vadd.f32 %v4727_v7, %v4726_v48  ;;  %7160 = vmatprep.subr.msk.bf16.mxu0 %vm1177_vm1, %v7145_v60  ;;  %v7138_v7 = vld [vmem:[%s10047_s8 + $0x1] ss:$0 sm:$0xff]  ;;  %v8036_v46 = vld [vmem:[%s10046_s12 + $0x4d8] sm:$0xff]  }
 0xc53   :  { %v4721_v59 = vadd.f32 %v4720_v61, %v4719_v27  ;;  %v4733_v63 = vadd.f32 %v4732_v40, %v4731_v15  ;;  %v8040_v60 = vld [vmem:[%s10046_s12 + $0x4e0] sm:$0xff]  }
 0xc54   :  { %v4741_v55 = vrot.slane %v4740_v53, 1 }
 0xc55   :  { %v4775_v19 = vsel %vm1488_vm6, %v4721_v59, %v4774_v20  ;;  %v4734_v25 = vrot.slane %v4733_v63, 1 }
 0xc56   :  { %v4776_v33 = vsel %vm1490_vm7, %v4728_v9, %v4775_v19  ;;  %v4742_v16 = vadd.f32 %v4741_v55, %v4740_v53  ;;  %v7139_v53 = vld [vmem:[%s10048_s9 + $0x1] ss:$0 sm:$0xff]  ;;  %v7146_v9 = vcombine.low %v6833_v58, %v6833_v58 }
 0xc57   :  { %v4735_v54 = vadd.f32 %v4734_v25, %v4733_v63  ;;  %v7144_v63 = vcombine.low %v6832_v6, %v6832_v6  ;;  %v6834_v25 = vld [vmem:[%s10045_s10 + $0x60] sm:$0xff]  ;;  %v8038_v6 = vld [vmem:[%s10046_s12 + $0x498] sm:$0xff]  }
 0xc58   :  { %v8039_v58 = vld [vmem:[%s10046_s12 + $0x460] sm:$0xff]  }
 0xc59   :  { %v4777_v23 = vsel %vm1492_vm8, %v4735_v54, %v4776_v33  ;;  %v6835_v33 = vld [vmem:[%s10045_s10 + $0x68] sm:$0xff] }
 0xc5a   :  { %v4778_v21 = vsel %vm1494_vm9, %v4742_v16, %v4777_v23  ;;  %v5041_v16 = vsel %vm1177_vm1, %v7144_v63, 0  ;;  %v5047_v23 = vsel %vm1177_vm1, %v7146_v9, 0  ;;  %v8056_v63 = vld [vmem:[%s10046_s12 + $0x5c0] sm:$0xff]   ;;  %v6838_v9 = vld [vmem:[%s10049_s11 + $0x10] sm:$0xff] }
 0xc5b   :  { %7857 = vmatmul.mubr.msk.f32.vlgmr.msra.gmra.mrb[66].mxu1 %vm343_vm0, %v4778_v21  ;;  %v7149_v21 = vcombine.high %v6834_v25, %v6834_v25 }
 0xc5c   :  { %5151 = vmatprep.mubr.bf16.mxu1 %v8300_v37  ;;  %5120 = vmatpush1.bf16.msra.mxu1 %v5035_v13  ;;  %v8037_v13 = vld [vmem:[%s10046_s12 + $0x418] sm:$0xff]  }
 0xc5d   :  { %7162 = vmatprep.subr.msk.bf16.mxu1 %vm1177_vm1, %v7147_v51  ;;  %v8041_v51 = vld [vmem:[%s10046_s12 + $0x420] sm:$0xff]  }
 0xd2e   :  { %v7858_v35 = vpop.f32.mrb[66].mxu1 }
 0xd2f   :  { %v4855_v30 = vadd.f32 %v7858_v35, %v7135_v22  ;;  %v4849_v28 = vpop.f32.mrb[67].mxu1  ;;  %v7148_v35 = vcombine.low %v6834_v25, %v6834_v25  ;;  %v4908_v25 = vrot.slane %v6838_v9, %v8427_v24 }
 0xd30   :  { %v4850_v8 = vadd.f32 %v7135_v22, %v4849_v28  ;;  %v7151_v22 = vcombine.high %v6835_v33, %v6835_v33  ;;  %v6836_v28 = vld [vmem:[%s10045_s10 + $0x70] sm:$0xff] }
 0xd31   :  { %v4859_v57 = vadd.f32 %v4855_v30, %v9240_v14  ;;  %v7150_v30 = vcombine.low %v6835_v33, %v6835_v33  ;;  %v7152_v38 = vcombine.low %v6836_v28, %v6836_v28  ;;  %v4916_v33 = vrot.slane %v6838_v9, %v8849_v42 }
 0xd32   :  { %v4858_v34 = vadd.f32 %v4850_v8, %v9238_v12  ;;  %v6837_v8 = vld [vmem:[%s10045_s10 + $0x78] sm:$0xff] }
 0xd33   :  { %v4863_v1 = vsel %vm343_vm0, %v4859_v57, 0.0  ;;  %v7154_v44 = vcombine.low %v6837_v8, %v6837_v8  ;;  %v5065_v18 = vsel %vm1177_vm1, %v7152_v38, 0 }
 0xd34   :  { %4864 = vadd.xlane.f32.xlu1 %v4863_v1  ;;  %v4860_v62 = vsel %vm343_vm0, %v4858_v34, 0.0  ;;  %v7153_v1 = vcombine.high %v6836_v28, %v6836_v28 }
 0xd35   :  { %4861 = vadd.xlane.f32.xlu0 %v4860_v62  ;;  %v7155_v62 = vcombine.high %v6837_v8, %v6837_v8  ;;  %v5071_v47 = vsel %vm1177_vm1, %v7154_v44, 0 }
 0xdc1   :  { %v4865_v14 = vpop.xlane.xlu1 %4864 }
 0xdc2   :  { %v4867_v43 = vmul.f32 0.125, %v4865_v14  ;;  %v4862_v12 = vpop.xlane.xlu0 %4861  ;;  %v8023_v14 = vld [vmem:[%s10046_s12 + $0x440] sm:$0xff]  }
 0xdc3   :  { %v4866_v49 = vmul.f32 0.125, %v4862_v12  ;;  %v8025_v12 = vld [vmem:[%s10046_s12 + $0x400] sm:$0xff]  }
 0xdc4   :  { %v4869_v52 = vsub.f32 %v4859_v57, %v4867_v43  ;;  %v5053_v57 = vsel %vm1177_vm1, %v7148_v35, 0  ;;  %v8024_v43 = vld [vmem:[%s10046_s12 + $0x4c0] sm:$0xff]  }
 0xdc5   :  { %v4868_v26 = vsub.f32 %v4858_v34, %v4866_v49  ;;  %v5059_v34 = vsel %vm1177_vm1, %v7150_v30, 0  ;;  %v8026_v49 = vld [vmem:[%s10046_s12 + $0x480] sm:$0xff]  }
 0xdc6   :  { %v4871_v41 = vmul.f32 %v4869_v52, %v4869_v52 }
 0xdc7   :  { %v4870_v32 = vmul.f32 %v4868_v26, %v4868_v26 }
 0xdc8   :  { %v4875_v50 = vsel %vm343_vm0, %v4871_v41, 0.0  ;;  %v8032_v41 = vld [vmem:[%s10046_s12 + $0x4d0] sm:$0xff]  }
 0xdc9   :  { %v4872_v31 = vsel %vm343_vm0, %v4870_v32, 0.0  ;;  %v8030_v32 = vld [vmem:[%s10046_s12 + $0x488] sm:$0xff]  }
 0xdca   :  { %4873 = vadd.xlane.f32.xlu0 %v4872_v31  ;;  %v8031_v31 = vld [vmem:[%s10046_s12 + $0x450] sm:$0xff]  }
 0xdce   :  { %4876 = vadd.xlane.f32.xlu0 %v4875_v50  ;;  %v8033_v50 = vld [vmem:[%s10046_s12 + $0x410] sm:$0xff]  }
 0xe57   :  { %v4874_v36 = vpop.xlane.xlu0 %4873 }
 0xe58   :  { %v4878_v29 = vmul.f32 0.125, %v4874_v36  ;;  %v8042_v36 = vld [vmem:[%s10046_s12 + $0x4a0] sm:$0xff]  }
 0xe5a   :  { %v4880_v20 = vadd.f32 1e-05, %v4878_v29  ;;  %v8043_v29 = vld [vmem:[%s10046_s12 + $0x468] sm:$0xff]  }
 0xe5b   :  { %v4877_v5 = vpop.xlane.xlu0 %4876 }
 0xe5c   :  { %8287 = vrsqrt.f32 %v4880_v20  ;;  %v4879_v48 = vmul.f32 0.125, %v4877_v5  ;;  %v8044_v20 = vld [vmem:[%s10046_s12 + $0x4e8] sm:$0xff]  }
 0xe5d   :  { %v8045_v5 = vld [vmem:[%s10046_s12 + $0x428] sm:$0xff]  }
 0xe5e   :  { %v4881_v17 = vadd.f32 1e-05, %v4879_v48  ;;  %v8046_v48 = vld [vmem:[%s10046_s12 + $0x4a8] sm:$0xff]  }
 0xe60   :  { %8289 = vrsqrt.f32 %v4881_v17  ;;  %v8047_v17 = vld [vmem:[%s10046_s12 + $0x470] sm:$0xff]  }
 0xe66   :  { %v8288_v27 = vpop.eup %8287 }
 0xe67   :  { %v4884_v15 = vmul.f32 %v8288_v27, %v4868_v26  ;;  %v8028_v26 = vld [vmem:[%s10046_s12 + $0x4c8] sm:$0xff]   ;;  %v8048_v27 = vld [vmem:[%s10046_s12 + $0x4f0] sm:$0xff]  }
 0xe69   :  { %v4892_v61 = vmul.f32 %v7138_v7, %v4884_v15  ;;  %v8049_v15 = vld [vmem:[%s10046_s12 + $0x430] sm:$0xff]  }
 0xe6a   :  { %v8290_v2 = vpop.eup %8289 }
 0xe6b   :  { %v4885_v40 = vmul.f32 %v8290_v2, %v4869_v52  ;;  %v9526_v55 = vadd.f32 %v7139_v53, %v4892_v61  ;;  %v8027_v52 = vld [vmem:[%s10046_s12 + $0x448] sm:$0xff]   ;;  %v8051_v2 = vld [vmem:[%s10046_s12 + $0x478] sm:$0xff]  }
 0xe6c   :  { %v8052_v61 = vld [vmem:[%s10046_s12 + $0x4f8] sm:$0xff]  }
 0xe6d   :  { %v4893_v59 = vmul.f32 %v7138_v7, %v4885_v40  ;;  %v8050_v7 = vld [vmem:[%s10046_s12 + $0x4b0] sm:$0xff]   ;;  %v8053_v40 = vld [vmem:[%s10046_s12 + $0x438] sm:$0xff]  }
 0xe6f   :  { %v9528_v19 = vadd.f32 %v7139_v53, %v4893_v59  ;;  %v8054_v53 = vld [vmem:[%s10046_s12 + $0x4b8] sm:$0xff]   ;;  %v8055_v59 = vld [vmem:[%s10046_s12 + $0x540] sm:$0xff]  }
 0xe71   :  { %v4902_v54 = vpack.c.bf16 %v9528_v19, %v9526_v55 }
 0xe73   :  { %7157 = vmatmul.mubr.msk.bf16.vlgmr.msra.gmra.mrb[68].mxu0 %vm343_vm0, %v4902_v54  ;;  %7159 = vmatmul.mubr.msk.bf16.vlgmr.msra.gmra.mrb[68].mxu1 %vm343_vm0, %v4902_v54 }
 0xe74   :  { %5163 = vmatpush1.bf16.msra.mxu0 %v5041_v16  ;;  %5206 = vmatpush1.bf16.msra.mxu1 %v5047_v23  ;;  %v4920_v16 = vrot.slane %v6838_v9, %v8858_v39 }
 0xe75   :  { %5194 = vmatprep.mubr.bf16.mxu0 %v8300_v37  ;;  %5237 = vmatprep.mubr.bf16.mxu1 %v8300_v37 }
 0xe76   :  { %7164 = vmatprep.subr.msk.bf16.mxu0 %vm1177_vm1, %v7149_v21  ;;  %7166 = vmatprep.subr.msk.bf16.mxu1 %vm1177_vm1, %v7151_v22 }
 0xe7b   :  { %7161 = vmatmul.mubr.msk.bf16.vlgmr.msra.gmra.mrb[72].mxu0 %vm343_vm0, %v4902_v54  ;;  %7163 = vmatmul.mubr.msk.bf16.vlgmr.msra.gmra.mrb[72].mxu1 %vm343_vm0, %v4902_v54 }
 0xe7c   :  { %5249 = vmatpush1.bf16.msra.mxu0 %v5053_v57  ;;  %5292 = vmatpush1.bf16.msra.mxu1 %v5059_v34 }
 0xe7d   :  { %5280 = vmatprep.mubr.bf16.mxu0 %v8300_v37  ;;  %5323 = vmatprep.mubr.bf16.mxu1 %v8300_v37 }
 0xe7e   :  { %7168 = vmatprep.subr.msk.bf16.mxu0 %vm1177_vm1, %v7153_v1  ;;  %7170 = vmatprep.subr.msk.bf16.mxu1 %vm1177_vm1, %v7155_v62 }
 0xe83   :  { %7165 = vmatmul.mubr.msk.bf16.vlgmr.msra.gmra.mrb[76].mxu0 %vm343_vm0, %v4902_v54  ;;  %7167 = vmatmul.mubr.msk.bf16.vlgmr.msra.gmra.mrb[76].mxu1 %vm343_vm0, %v4902_v54 }
 0xe84   :  { %5335 = vmatpush1.bf16.msra.mxu0 %v5065_v18  ;;  %5378 = vmatpush1.bf16.msra.mxu1 %v5071_v47  ;;  %v4924_v47 = vrot.slane %v6838_v9, %v8865_v0 }
 0xe85   :  { %5366 = vmatprep.mubr.bf16.mxu0 %v8300_v37  ;;  %5409 = vmatprep.mubr.bf16.mxu1 %v8300_v37  ;;  %v8029_v37 = vld [vmem:[%s10046_s12 + $0x408] sm:$0xff]  }
 0xe86   :  { %7559 = vmatprep.subr.bf16.mxu0 %v8023_v14  ;;  %7581 = vmatprep.subr.bf16.mxu1 %v8024_v43  ;;  %v4932_v14 = vrot.slane %v6838_v9, %v8868_v3 }
 0xe8b   :  { %7169 = vmatmul.mubr.msk.bf16.vlgmr.msra.gmra.mrb[80].mxu0 %vm343_vm0, %v4902_v54  ;;  %7171 = vmatmul.mubr.msk.bf16.vlgmr.msra.gmra.mrb[80].mxu1 %vm343_vm0, %v4902_v54  ;;  %v4912_v54 = vrot.slane %v6838_v9, %v8855_v10 }
 0xe8c   :  { %7560 = vmatpush3.bf16.msra.mxu0 %v8025_v12  ;;  %7582 = vmatpush3.bf16.msra.mxu1 %v8026_v49  ;;  %v4928_v49 = vrot.slane %v6838_v9, %v8871_v4 }
 0xe8d   :  { %7561 = vmatprep.subr.bf16.mxu0 %v8027_v52  ;;  %7583 = vmatprep.subr.bf16.mxu1 %v8028_v26  ;;  %v4936_v52 = vrot.slane %v6838_v9, %v8874_v45 }
 0xe90   :  { %7562 = vmatpush3.bf16.msra.mxu0 %v8029_v37  ;;  %7584 = vmatpush3.bf16.msra.mxu1 %v8030_v32 }
 0xe91   :  { %7563 = vmatprep.subr.bf16.mxu0 %v8031_v31  ;;  %7585 = vmatprep.subr.bf16.mxu1 %v8032_v41 }
 0xe94   :  { %7564 = vmatpush3.bf16.msra.mxu0 %v8033_v50  ;;  %7586 = vmatpush3.bf16.msra.mxu1 %v8034_v11 }
 0xe95   :  { %7565 = vmatprep.subr.bf16.mxu0 %v8035_v56  ;;  %7587 = vmatprep.subr.bf16.mxu1 %v8036_v46  ;;  %v9684_v46 = vld [vmem:[%s10049_s11 + $0x18] sm:$0xff] }
 0xe98   :  { %7566 = vmatpush3.bf16.msra.mxu0 %v8037_v13  ;;  %7588 = vmatpush3.bf16.msra.mxu1 %v8038_v6 }
 0xe99   :  { %7567 = vmatprep.subr.bf16.mxu0 %v8039_v58  ;;  %7589 = vmatprep.subr.bf16.mxu1 %v8040_v60 }
 0xe9c   :  { %7568 = vmatpush3.bf16.msra.mxu0 %v8041_v51  ;;  %7590 = vmatpush3.bf16.msra.mxu1 %v8042_v36 }
 0xe9d   :  { %7569 = vmatprep.subr.bf16.mxu0 %v8043_v29  ;;  %7591 = vmatprep.subr.bf16.mxu1 %v8044_v20  ;;  %v8057_v29 = vld [vmem:[%s10046_s12 + $0x500] sm:$0xff]  }
 0xe9e   :  { %v8058_v20 = vld [vmem:[%s10046_s12 + $0x580] sm:$0xff]  }
 0xea0   :  { %7570 = vmatpush3.bf16.msra.mxu0 %v8045_v5  ;;  %7592 = vmatpush3.bf16.msra.mxu1 %v8046_v48 }
 0xea1   :  { %7571 = vmatprep.subr.bf16.mxu0 %v8047_v17  ;;  %7593 = vmatprep.subr.bf16.mxu1 %v8048_v27 }
 0xea4   :  { %7572 = vmatpush3.bf16.msra.mxu0 %v8049_v15  ;;  %7594 = vmatpush3.bf16.msra.mxu1 %v8050_v7  ;;  %v8059_v15 = vld [vmem:[%s10046_s12 + $0x548] sm:$0xff]  }
 0xea5   :  { %7573 = vmatprep.subr.bf16.mxu0 %v8051_v2  ;;  %7595 = vmatprep.subr.bf16.mxu1 %v8052_v61  ;;  %v8060_v7 = vld [vmem:[%s10046_s12 + $0x5c8] sm:$0xff]   ;;  %v4940_v2 = vrot.slane %v9684_v46, %v8427_v24 }
 0xea8   :  { %7574 = vmatpush3.bf16.msra.mxu0 %v8053_v40  ;;  %7596 = vmatpush3.bf16.msra.mxu1 %v8054_v53 }
 0xea9   :  { %7603 = vmatprep.subr.bf16.mxu0 %v8055_v59  ;;  %7625 = vmatprep.subr.bf16.mxu1 %v8056_v63  ;;  %v4948_v63 = vrot.slane %v9684_v46, %v8849_v42  ;;  %v8062_v42 = vld [vmem:[%s10046_s12 + $0x588] sm:$0xff]  }
 0xf46   :  { %v5110_v23 = vpop.f32.mrb[68].mxu0  ;;  %v5153_v21 = vpop.f32.mrb[68].mxu1 }
 0xf47   :  { %v5111_v22 = vadd.f32 %v5110_v23, %v4908_v25  ;;  %v5154_v35 = vadd.f32 %v5153_v21, %v4916_v33  ;;  %v5112_v30 = vpop.f32.mrb[69].mxu0  ;;  %v5155_v28 = vpop.f32.mrb[69].mxu1  ;;  %v8061_v21 = vld [vmem:[%s10046_s12 + $0x508] sm:$0xff]  }
 0xf48   :  { %v5113_v8 = vadd.f32 %v5112_v30, %v4912_v54  ;;  %v5156_v57 = vadd.f32 %v5155_v28, %v4920_v16  ;;  %v5114_v34 = vpop.f32.mrb[70].mxu0  ;;  %v5157_v1 = vpop.f32.mrb[70].mxu1 }
 0xf49   :  { %v5115_v62 = vadd.f32 %v5114_v34, %v4908_v25  ;;  %v5158_v38 = vadd.f32 %v5157_v1, %v4916_v33  ;;  %v5116_v44 = vpop.f32.mrb[71].mxu0  ;;  %v5159_v18 = vpop.f32.mrb[71].mxu1  ;;  %v5420_v26 = vmax.f32 %v5111_v22, 0.0  ;;  %v5422_v37 = vmax.f32 %v5154_v35, 0.0 }
 0xf4a   :  { %v5117_v43 = vadd.f32 %v5116_v44, %v4912_v54  ;;  %v5160_v12 = vadd.f32 %v5159_v18, %v4920_v16  ;;  %v5421_v41 = vmax.f32 %v5113_v8, 0.0  ;;  %v5423_v50 = vmax.f32 %v5156_v57, 0.0  ;;  %v8064_v57 = vld [vmem:[%s10046_s12 + $0x5d0] sm:$0xff]  }
 0xf4b   :  { %v5436_v32 = vmax.f32 %v5115_v62, 0.0  ;;  %v5438_v31 = vmax.f32 %v5158_v38, 0.0  ;;  %v4944_v16 = vrot.slane %v9684_v46, %v8855_v10  ;;  %v4952_v22 = vrot.slane %v9684_v46, %v8858_v39  ;;  %v8063_v10 = vld [vmem:[%s10046_s12 + $0x550] sm:$0xff]  }
 0xf4c   :  { %v5437_v11 = vmax.f32 %v5117_v43, 0.0  ;;  %v5439_v56 = vmax.f32 %v5160_v12, 0.0  ;;  %v8065_v12 = vld [vmem:[%s10046_s12 + $0x510] sm:$0xff]  }
 0xf4d   :  { %v5452_v13 = vpack.c.bf16 %v5436_v32, %v5420_v26  ;;  %v5454_v6 = vpack.c.bf16 %v5438_v31, %v5422_v37  ;;  %v8067_v31 = vld [vmem:[%s10046_s12 + $0x558] sm:$0xff]  }
 0xf4e   :  { %v5453_v58 = vpack.c.bf16 %v5437_v11, %v5421_v41  ;;  %v5455_v60 = vpack.c.bf16 %v5439_v56, %v5423_v50  ;;  %v5196_v51 = vpop.f32.mrb[72].mxu0  ;;  %v5239_v36 = vpop.f32.mrb[72].mxu1  ;;  %v8068_v41 = vld [vmem:[%s10046_s12 + $0x5d8] sm:$0xff]  }
 0xf4f   :  { %v5197_v5 = vadd.f32 %v5196_v51, %v4924_v47  ;;  %v5240_v48 = vadd.f32 %v5239_v36, %v4932_v14  ;;  %v5198_v17 = vpop.f32.mrb[73].mxu0  ;;  %v5241_v27 = vpop.f32.mrb[73].mxu1 }
 0xf50   :  { %v5199_v61 = vadd.f32 %v5198_v17, %v4928_v49  ;;  %v5242_v40 = vadd.f32 %v5241_v27, %v4936_v52  ;;  %v5200_v53 = vpop.f32.mrb[74].mxu0  ;;  %v5243_v59 = vpop.f32.mrb[74].mxu1  ;;  %6274 = vmatprep.mubr.bf16.mxu0 %v5453_v58  ;;  %6315 = vmatprep.mubr.bf16.mxu1 %v5455_v60  ;;  %v8069_v17 = vld [vmem:[%s10046_s12 + $0x518] sm:$0xff]   ;;  %v4968_v27 = vrot.slane %v9684_v46, %v8874_v45 }
 0xf51   :  { %v5201_v9 = vadd.f32 %v5200_v53, %v4924_v47  ;;  %v5244_v25 = vadd.f32 %v5243_v59, %v4932_v14  ;;  %v5202_v33 = vpop.f32.mrb[75].mxu0  ;;  %v5245_v54 = vpop.f32.mrb[75].mxu1  ;;  %6275 = vmatmul.mubr.bf16.vlgmr.msra.gmra.mrb[84].mxu0 %v5452_v13  ;;  %6316 = vmatmul.mubr.bf16.vlgmr.msra.gmra.mrb[84].mxu1 %v5454_v6  ;;  %v5424_v35 = vmax.f32 %v5197_v5, 0.0  ;;  %v5426_v30 = vmax.f32 %v5240_v48, 0.0 }
 0xf52   :  { %v5203_v23 = vadd.f32 %v5202_v33, %v4928_v49  ;;  %v5246_v24 = vadd.f32 %v5245_v54, %v4936_v52  ;;  %7604 = vmatpush3.bf16.msra.mxu0 %v8057_v29  ;;  %7626 = vmatpush3.bf16.msra.mxu1 %v8058_v20  ;;  %v5425_v34 = vmax.f32 %v5199_v61, 0.0  ;;  %v5427_v1 = vmax.f32 %v5242_v40, 0.0  ;;  %v8066_v49 = vld [vmem:[%s10046_s12 + $0x590] sm:$0xff]   ;;  %v8072_v61 = vld [vmem:[%s10046_s12 + $0x5e0] sm:$0xff]  }
 0xf53   :  { %v5440_v28 = vmax.f32 %v5201_v9, 0.0  ;;  %v5442_v8 = vmax.f32 %v5244_v25, 0.0  ;;  %7605 = vmatprep.subr.bf16.mxu0 %v8059_v15  ;;  %7627 = vmatprep.subr.bf16.mxu1 %v8060_v7  ;;  %v4956_v6 = vrot.slane %v9684_v46, %v8865_v0  ;;  %v4964_v29 = vrot.slane %v9684_v46, %v8868_v3  ;;  %v8070_v0 = vld [vmem:[%s10046_s12 + $0x598] sm:$0xff]  }
 0xf54   :  { %v5441_v62 = vmax.f32 %v5203_v23, 0.0  ;;  %v5443_v38 = vmax.f32 %v5246_v24, 0.0  ;;  %v4960_v20 = vrot.slane %v9684_v46, %v8871_v4  ;;  %v8071_v4 = vld [vmem:[%s10046_s12 + $0x560] sm:$0xff]  }
 0xf55   :  { %v9718_v44 = vpack.c.bf16 %v5440_v28, %v5424_v35  ;;  %v9720_v39 = vpack.c.bf16 %v5442_v8, %v5426_v30  ;;  %v8074_v23 = vld [vmem:[%s10046_s12 + $0x5a0] sm:$0xff]   ;;  %v8075_v35 = vld [vmem:[%s10046_s12 + $0x568] sm:$0xff]  }
 0xf56   :  { %v5457_v18 = vpack.c.bf16 %v5441_v62, %v5425_v34  ;;  %v5459_v47 = vpack.c.bf16 %v5443_v38, %v5427_v1  ;;  %7606 = vmatpush3.bf16.msra.mxu0 %v8061_v21  ;;  %7628 = vmatpush3.bf16.msra.mxu1 %v8062_v42  ;;  %v5282_v14 = vpop.f32.mrb[76].mxu0  ;;  %v5325_v43 = vpop.f32.mrb[76].mxu1  ;;  %v8076_v30 = vld [vmem:[%s10046_s12 + $0x5e8] sm:$0xff]  }
 0xf57   :  { %v5283_v52 = vadd.f32 %v5282_v14, %v4940_v2  ;;  %v5326_v26 = vadd.f32 %v5325_v43, %v4948_v63  ;;  %v5284_v37 = vpop.f32.mrb[77].mxu0  ;;  %v5327_v32 = vpop.f32.mrb[77].mxu1  ;;  %7607 = vmatprep.subr.bf16.mxu0 %v8063_v10  ;;  %7629 = vmatprep.subr.bf16.mxu1 %v8064_v57  ;;  %v8077_v14 = vld [vmem:[%s10046_s12 + $0x528] sm:$0xff]  }
 0xf58   :  { %v5285_v50 = vadd.f32 %v5284_v37, %v4944_v16  ;;  %v5328_v11 = vadd.f32 %v5327_v32, %v4952_v22  ;;  %v5286_v56 = vpop.f32.mrb[78].mxu0  ;;  %v5329_v13 = vpop.f32.mrb[78].mxu1  ;;  %6356 = vmatprep.mubr.bf16.mxu0 %v5457_v18  ;;  %6397 = vmatprep.mubr.bf16.mxu1 %v5459_v47  ;;  %v8078_v43 = vld [vmem:[%s10046_s12 + $0x5a8] sm:$0xff]   ;;  %v8079_v37 = vld [vmem:[%s10046_s12 + $0x570] sm:$0xff]  }
 0xf59   :  { %v5287_v58 = vadd.f32 %v5286_v56, %v4940_v2  ;;  %v5330_v60 = vadd.f32 %v5329_v13, %v4948_v63  ;;  %v5288_v51 = vpop.f32.mrb[79].mxu0  ;;  %v5331_v36 = vpop.f32.mrb[79].mxu1  ;;  %v5428_v15 = vmax.f32 %v5283_v52, 0.0  ;;  %v5430_v3 = vmax.f32 %v5326_v26, 0.0  ;;  %v8080_v32 = vld [vmem:[%s10046_s12 + $0x5f0] sm:$0xff]  }
 0xf5a   :  { %v5289_v5 = vadd.f32 %v5288_v51, %v4944_v16  ;;  %v5332_v48 = vadd.f32 %v5331_v36, %v4952_v22  ;;  %7608 = vmatpush3.bf16.msra.mxu0 %v8065_v12  ;;  %7630 = vmatpush3.bf16.msra.mxu1 %v8066_v49  ;;  %v5429_v40 = vmax.f32 %v5285_v50, 0.0  ;;  %v5431_v53 = vmax.f32 %v5328_v11, 0.0  ;;  %v8073_v16 = vld [vmem:[%s10046_s12 + $0x520] sm:$0xff]   ;;  %v8082_v51 = vld [vmem:[%s10046_s12 + $0x5b0] sm:$0xff]   ;;  %v8083_v36 = vld [vmem:[%s10046_s12 + $0x578] sm:$0xff]  }
 0xf5b   :  { %v5444_v7 = vmax.f32 %v5287_v58, 0.0  ;;  %v5446_v2 = vmax.f32 %v5330_v60, 0.0  ;;  %7609 = vmatprep.subr.bf16.mxu0 %v8067_v31  ;;  %7631 = vmatprep.subr.bf16.mxu1 %v8068_v41  ;;  %v8081_v60 = vld [vmem:[%s10046_s12 + $0x530] sm:$0xff]  }
 0xf5c   :  { %v5445_v59 = vmax.f32 %v5289_v5, 0.0  ;;  %v5447_v63 = vmax.f32 %v5332_v48, 0.0  ;;  %v8086_v5 = vld [vmem:[%s10046_s12 + $0x5b8] sm:$0xff]   ;;  %v8087_v48 = vld [vmem:[%s10046_s12 + $0x640] sm:$0xff]  }
 0xf5d   :  { %v9754_v9 = vpack.c.bf16 %v5444_v7, %v5428_v15  ;;  %v9756_v45 = vpack.c.bf16 %v5446_v2, %v5430_v3  ;;  %v8091_v15 = vld [vmem:[%s10046_s12 + $0x648] sm:$0xff]  }
 0xf5e   :  { %v9758_v46 = vpack.c.bf16 %v5445_v59, %v5429_v40  ;;  %v9760_v25 = vpack.c.bf16 %v5447_v63, %v5431_v53  ;;  %7610 = vmatpush3.bf16.msra.mxu0 %v8069_v17  ;;  %7632 = vmatpush3.bf16.msra.mxu1 %v8070_v0  ;;  %v5368_v33 = vpop.f32.mrb[80].mxu0  ;;  %v5411_v54 = vpop.f32.mrb[80].mxu1  ;;  %v8088_v17 = vld [vmem:[%s10046_s12 + $0x6c0] sm:$0xff]   ;;  %v8092_v3 = vld [vmem:[%s10046_s12 + $0x6c8] sm:$0xff]   ;;  %v8099_v40 = vld [vmem:[%s10046_s12 + $0x658] sm:$0xff]  }
 0xf5f   :  { %v5369_v24 = vadd.f32 %v5368_v33, %v4956_v6  ;;  %v5412_v21 = vadd.f32 %v5411_v54, %v4964_v29  ;;  %v5370_v42 = vpop.f32.mrb[81].mxu0  ;;  %v5413_v22 = vpop.f32.mrb[81].mxu1  ;;  %7611 = vmatprep.subr.bf16.mxu0 %v8071_v4  ;;  %7633 = vmatprep.subr.bf16.mxu1 %v8072_v61  ;;  %v8089_v0 = vld [vmem:[%s10046_s12 + $0x600] sm:$0xff]   ;;  %v8093_v7 = vld [vmem:[%s10046_s12 + $0x608] sm:$0xff]   ;;  %v8097_v4 = vld [vmem:[%s10046_s12 + $0x610] sm:$0xff]  }
 0xf60   :  { %v5371_v28 = vadd.f32 %v5370_v42, %v4960_v20  ;;  %v5414_v8 = vadd.f32 %v5413_v22, %v4968_v27  ;;  %v5372_v10 = vpop.f32.mrb[82].mxu0  ;;  %v5415_v57 = vpop.f32.mrb[82].mxu1  ;;  %v8094_v2 = vld [vmem:[%s10046_s12 + $0x688] sm:$0xff]   ;;  %v8098_v61 = vld [vmem:[%s10046_s12 + $0x690] sm:$0xff]   ;;  %v8100_v53 = vld [vmem:[%s10046_s12 + $0x6d8] sm:$0xff]  }
 0xf61   :  { %v5373_v34 = vadd.f32 %v5372_v10, %v4956_v6  ;;  %v5416_v1 = vadd.f32 %v5415_v57, %v4964_v29  ;;  %v5374_v62 = vpop.f32.mrb[83].mxu0  ;;  %v5417_v38 = vpop.f32.mrb[83].mxu1  ;;  %v5432_v12 = vmax.f32 %v5369_v24, 0.0  ;;  %v5434_v49 = vmax.f32 %v5412_v21, 0.0  ;;  %v8084_v29 = vld [vmem:[%s10046_s12 + $0x5f8] sm:$0xff]   ;;  %v8105_v33 = vld [vmem:[%s10046_s12 + $0x620] sm:$0xff]  }
 0xf62   :  { %v5375_v18 = vadd.f32 %v5374_v62, %v4960_v20  ;;  %v5418_v47 = vadd.f32 %v5417_v38, %v4968_v27  ;;  %7612 = vmatpush3.bf16.msra.mxu0 %v8073_v16  ;;  %7634 = vmatpush3.bf16.msra.mxu1 %v8074_v23  ;;  %v5433_v31 = vmax.f32 %v5371_v28, 0.0  ;;  %v5435_v41 = vmax.f32 %v5414_v8, 0.0  ;;  %v8085_v20 = vld [vmem:[%s10046_s12 + $0x538] sm:$0xff]   ;;  %v8090_v27 = vld [vmem:[%s10046_s12 + $0x680] sm:$0xff]   ;;  %v8107_v16 = vld [vmem:[%s10046_s12 + $0x668] sm:$0xff]  }
 0xf63   :  { %v5448_v52 = vmax.f32 %v5373_v34, 0.0  ;;  %v5450_v26 = vmax.f32 %v5416_v1, 0.0  ;;  %7613 = vmatprep.subr.bf16.mxu0 %v8075_v35  ;;  %7635 = vmatprep.subr.bf16.mxu1 %v8076_v30  ;;  %v8101_v59 = vld [vmem:[%s10046_s12 + $0x618] sm:$0xff]   ;;  %v8106_v54 = vld [vmem:[%s10046_s12 + $0x6a0] sm:$0xff]   ;;  %v8108_v23 = vld [vmem:[%s10046_s12 + $0x6e8] sm:$0xff]  }
 0xf64   :  { %v5449_v50 = vmax.f32 %v5375_v18, 0.0  ;;  %v5451_v11 = vmax.f32 %v5418_v47, 0.0  ;;  %v8102_v63 = vld [vmem:[%s10046_s12 + $0x698] sm:$0xff]   ;;  %v8109_v24 = vld [vmem:[%s10046_s12 + $0x628] sm:$0xff]   ;;  %v8111_v42 = vld [vmem:[%s10046_s12 + $0x670] sm:$0xff]  }
 0xf65   :  { %v9786_v56 = vpack.c.bf16 %v5448_v52, %v5432_v12  ;;  %v9788_v13 = vpack.c.bf16 %v5450_v26, %v5434_v49  ;;  %v8110_v21 = vld [vmem:[%s10046_s12 + $0x6a8] sm:$0xff]   ;;  %v8112_v22 = vld [vmem:[%s10046_s12 + $0x6f0] sm:$0xff]   ;;  %v8115_v28 = vld [vmem:[%s10046_s12 + $0x678] sm:$0xff]  }
 0xf66   :  { %v9790_v6 = vpack.c.bf16 %v5449_v50, %v5433_v31  ;;  %v9792_v58 = vpack.c.bf16 %v5451_v11, %v5435_v41  ;;  %7614 = vmatpush3.bf16.msra.mxu0 %v8077_v14  ;;  %7636 = vmatpush3.bf16.msra.mxu1 %v8078_v43  ;;  %v8113_v35 = vld [vmem:[%s10046_s12 + $0x630] sm:$0xff]   ;;  %v8116_v8 = vld [vmem:[%s10046_s12 + $0x6f8] sm:$0xff]   ;;  %v8119_v34 = vld [vmem:[%s10046_s12 + $0x740] sm:$0xff]  }
 0xf67   :  { %7615 = vmatprep.subr.bf16.mxu0 %v8079_v37  ;;  %7637 = vmatprep.subr.bf16.mxu1 %v8080_v32  ;;  %v8114_v30 = vld [vmem:[%s10046_s12 + $0x6b0] sm:$0xff]   ;;  %v8117_v10 = vld [vmem:[%s10046_s12 + $0x638] sm:$0xff]   ;;  %v8120_v1 = vld [vmem:[%s10046_s12 + $0x7c0] sm:$0xff]  }
 0xf68   :  { %v8118_v57 = vld [vmem:[%s10046_s12 + $0x6b8] sm:$0xff]   ;;  %v8121_v62 = vld [vmem:[%s10046_s12 + $0x700] sm:$0xff]   ;;  %v8123_v18 = vld [vmem:[%s10046_s12 + $0x748] sm:$0xff]  }
 0xf69   :  { %v8122_v38 = vld [vmem:[%s10046_s12 + $0x780] sm:$0xff]   ;;  %v8124_v47 = vld [vmem:[%s10046_s12 + $0x7c8] sm:$0xff]   ;;  %v8129_v12 = vld [vmem:[%s10046_s12 + $0x710] sm:$0xff]  }
 0xf6a   :  { %7616 = vmatpush3.bf16.msra.mxu0 %v8081_v60  ;;  %7638 = vmatpush3.bf16.msra.mxu1 %v8082_v51  ;;  %v8125_v14 = vld [vmem:[%s10046_s12 + $0x708] sm:$0xff]   ;;  %v8130_v49 = vld [vmem:[%s10046_s12 + $0x790] sm:$0xff]   ;;  %v8131_v52 = vld [vmem:[%s10046_s12 + $0x758] sm:$0xff]  }
 0xf6b   :  { %7617 = vmatprep.subr.bf16.mxu0 %v8083_v36  ;;  %7639 = vmatprep.subr.bf16.mxu1 %v8084_v29  ;;  %v8126_v43 = vld [vmem:[%s10046_s12 + $0x788] sm:$0xff]   ;;  %v8132_v26 = vld [vmem:[%s10046_s12 + $0x7d8] sm:$0xff]   ;;  %v8135_v31 = vld [vmem:[%s10046_s12 + $0x760] sm:$0xff]  }
 0xf6c   :  { %v8133_v37 = vld [vmem:[%s10046_s12 + $0x718] sm:$0xff]   ;;  %v8136_v41 = vld [vmem:[%s10046_s12 + $0x7e0] sm:$0xff]   ;;  %v8141_v60 = vld [vmem:[%s10046_s12 + $0x728] sm:$0xff]  }
 0xf6d   :  { %v8134_v32 = vld [vmem:[%s10046_s12 + $0x798] sm:$0xff]   ;;  %v8137_v50 = vld [vmem:[%s10046_s12 + $0x720] sm:$0xff]   ;;  %v8142_v51 = vld [vmem:[%s10046_s12 + $0x7a8] sm:$0xff]  }
 0xf6e   :  { %7618 = vmatpush3.bf16.msra.mxu0 %v8085_v20  ;;  %7640 = vmatpush3.bf16.msra.mxu1 %v8086_v5  ;;  %v8138_v11 = vld [vmem:[%s10046_s12 + $0x7a0] sm:$0xff]   ;;  %v8143_v36 = vld [vmem:[%s10046_s12 + $0x770] sm:$0xff]  }
 0xf6f   :  { %7647 = vmatprep.subr.bf16.mxu0 %v8087_v48  ;;  %7669 = vmatprep.subr.bf16.mxu1 %v8088_v17  ;;  %v8144_v29 = vld [vmem:[%s10046_s12 + $0x7f0] sm:$0xff]   ;;  %v8147_v48 = vld [vmem:[%s10046_s12 + $0x778] sm:$0xff]  }
 0xf70   :  { %v8145_v20 = vld [vmem:[%s10046_s12 + $0x730] sm:$0xff]   ;;  %v8148_v17 = vld [vmem:[%s10046_s12 + $0x7f8] sm:$0xff]  }
 0xf71   :  { %6357 = vmatmul.mubr.bf16.vlgmr.msra.gmra.mrb[88].mxu0 %v9718_v44  ;;  %6398 = vmatmul.mubr.bf16.vlgmr.msra.gmra.mrb[88].mxu1 %v9720_v39  ;;  %v8095_v44 = vld [vmem:[%s10046_s12 + $0x650] sm:$0xff]  }
 0xf72   :  { %7648 = vmatpush3.bf16.msra.mxu0 %v8089_v0  ;;  %6438 = vmatprep.mubr.bf16.mxu0 %v9758_v46  ;;  %v8096_v39 = vld [vmem:[%s10046_s12 + $0x6d0] sm:$0xff]   ;;  %v8103_v46 = vld [vmem:[%s10046_s12 + $0x660] sm:$0xff]   ;;  %v8149_v0 = vld [vmem:[%s10046_s12 + $0x738] sm:$0xff]  }
 0xf73   :  { %7670 = vmatpush3.bf16.msra.mxu1 %v8090_v27  ;;  %6479 = vmatprep.mubr.bf16.mxu1 %v9760_v25  ;;  %v8104_v25 = vld [vmem:[%s10046_s12 + $0x6e0] sm:$0xff]   ;;  %v8146_v5 = vld [vmem:[%s10046_s12 + $0x7b0] sm:$0xff]   ;;  %v8150_v27 = vld [vmem:[%s10046_s12 + $0x7b8] sm:$0xff]  }
 0xf74   :  { %7649 = vmatprep.subr.bf16.mxu0 %v8091_v15  ;;  %7671 = vmatprep.subr.bf16.mxu1 %v8092_v3 }
 0xf76   :  { %7650 = vmatpush3.bf16.msra.mxu0 %v8093_v7  ;;  %v7172_v7 = vld [vmem:[%s10050_s13 + $0x1] ss:$0 sm:$0xff] }
 0xf77   :  { %7672 = vmatpush3.bf16.msra.mxu1 %v8094_v2  ;;  %7651 = vmatprep.subr.bf16.mxu0 %v8095_v44 }
 0xf78   :  { %7673 = vmatprep.subr.bf16.mxu1 %v8096_v39 }
 0xf7a   :  { %7652 = vmatpush3.bf16.msra.mxu0 %v8097_v4 }
 0xf7b   :  { %7674 = vmatpush3.bf16.msra.mxu1 %v8098_v61  ;;  %7653 = vmatprep.subr.bf16.mxu0 %v8099_v40 }
 0xf7c   :  { %7675 = vmatprep.subr.bf16.mxu1 %v8100_v53 }
 0xf7e   :  { %7654 = vmatpush3.bf16.msra.mxu0 %v8101_v59 }
 0xf7f   :  { %7676 = vmatpush3.bf16.msra.mxu1 %v8102_v63  ;;  %7655 = vmatprep.subr.bf16.mxu0 %v8103_v46 }
 0xf80   :  { %7677 = vmatprep.subr.bf16.mxu1 %v8104_v25 }
 0xf82   :  { %7656 = vmatpush3.bf16.msra.mxu0 %v8105_v33 }
 0xf83   :  { %7678 = vmatpush3.bf16.msra.mxu1 %v8106_v54  ;;  %7657 = vmatprep.subr.bf16.mxu0 %v8107_v16 }
 0xf84   :  { %7679 = vmatprep.subr.bf16.mxu1 %v8108_v23 }
 0xf86   :  { %7658 = vmatpush3.bf16.msra.mxu0 %v8109_v24 }
 0xf87   :  { %7680 = vmatpush3.bf16.msra.mxu1 %v8110_v21  ;;  %7659 = vmatprep.subr.bf16.mxu0 %v8111_v42 }
 0xf88   :  { %7681 = vmatprep.subr.bf16.mxu1 %v8112_v22 }
 0xf8a   :  { %7660 = vmatpush3.bf16.msra.mxu0 %v8113_v35 }
 0xf8b   :  { %7682 = vmatpush3.bf16.msra.mxu1 %v8114_v30  ;;  %7661 = vmatprep.subr.bf16.mxu0 %v8115_v28 }
 0xf8c   :  { %7683 = vmatprep.subr.bf16.mxu1 %v8116_v8 }
 0xf8e   :  { %7662 = vmatpush3.bf16.msra.mxu0 %v8117_v10 }
 0xf8f   :  { %7684 = vmatpush3.bf16.msra.mxu1 %v8118_v57  ;;  %7691 = vmatprep.subr.bf16.mxu0 %v8119_v34 }
 0xf90   :  { %7713 = vmatprep.subr.bf16.mxu1 %v8120_v1 }
 0xf91   :  { %6439 = vmatmul.mubr.bf16.vlgmr.msra.gmra.mrb[92].mxu0 %v9754_v9  ;;  %v8127_v9 = vld [vmem:[%s10046_s12 + $0x750] sm:$0xff]  }
 0xf92   :  { %6480 = vmatmul.mubr.bf16.vlgmr.msra.gmra.mrb[92].mxu1 %v9756_v45  ;;  %7692 = vmatpush3.bf16.msra.mxu0 %v8121_v62  ;;  %v8128_v45 = vld [vmem:[%s10046_s12 + $0x7d0] sm:$0xff]  }
 0xf93   :  { %6520 = vmatprep.mubr.bf16.mxu0 %v9790_v6  ;;  %7714 = vmatpush3.bf16.msra.mxu1 %v8122_v38  ;;  %v8139_v6 = vld [vmem:[%s10046_s12 + $0x768] sm:$0xff]  }
 0xf94   :  { %6561 = vmatprep.mubr.bf16.mxu1 %v9792_v58  ;;  %7693 = vmatprep.subr.bf16.mxu0 %v8123_v18  ;;  %v8140_v58 = vld [vmem:[%s10046_s12 + $0x7e8] sm:$0xff]  }
 0xf95   :  { %7715 = vmatprep.subr.bf16.mxu1 %v8124_v47 }
 0xf96   :  { %7694 = vmatpush3.bf16.msra.mxu0 %v8125_v14 }
 0xf97   :  { %7716 = vmatpush3.bf16.msra.mxu1 %v8126_v43  ;;  %7695 = vmatprep.subr.bf16.mxu0 %v8127_v9 }
 0xf98   :  { %7717 = vmatprep.subr.bf16.mxu1 %v8128_v45 }
 0xf9a   :  { %7696 = vmatpush3.bf16.msra.mxu0 %v8129_v12 }
 0xf9b   :  { %7718 = vmatpush3.bf16.msra.mxu1 %v8130_v49  ;;  %7697 = vmatprep.subr.bf16.mxu0 %v8131_v52 }
 0xf9c   :  { %7719 = vmatprep.subr.bf16.mxu1 %v8132_v26 }
 0xf9e   :  { %7698 = vmatpush3.bf16.msra.mxu0 %v8133_v37 }
 0xf9f   :  { %7720 = vmatpush3.bf16.msra.mxu1 %v8134_v32  ;;  %7699 = vmatprep.subr.bf16.mxu0 %v8135_v31 }
 0xfa0   :  { %7721 = vmatprep.subr.bf16.mxu1 %v8136_v41 }
 0xfa2   :  { %7700 = vmatpush3.bf16.msra.mxu0 %v8137_v50 }
 0xfa3   :  { %7722 = vmatpush3.bf16.msra.mxu1 %v8138_v11  ;;  %7701 = vmatprep.subr.bf16.mxu0 %v8139_v6 }
 0xfa4   :  { %7723 = vmatprep.subr.bf16.mxu1 %v8140_v58 }
 0xfa6   :  { %7702 = vmatpush3.bf16.msra.mxu0 %v8141_v60 }
 0xfa7   :  { %7724 = vmatpush3.bf16.msra.mxu1 %v8142_v51  ;;  %7703 = vmatprep.subr.bf16.mxu0 %v8143_v36 }
 0xfa8   :  { %7725 = vmatprep.subr.bf16.mxu1 %v8144_v29 }
 0xfaa   :  { %7704 = vmatpush3.bf16.msra.mxu0 %v8145_v20 }
 0xfab   :  { %7726 = vmatpush3.bf16.msra.mxu1 %v8146_v5  ;;  %7705 = vmatprep.subr.bf16.mxu0 %v8147_v48 }
 0xfac   :  { %7727 = vmatprep.subr.bf16.mxu1 %v8148_v17 }
 0xfae   :  { %7706 = vmatpush3.bf16.msra.mxu0 %v8149_v0 }
 0xfaf   :  { %7728 = vmatpush3.bf16.msra.mxu1 %v8150_v27 }
 0xfb1   :  { %6521 = vmatmul.mubr.bf16.vlgmr.msra.gmra.mrb[96].mxu0 %v9786_v56 }
 0xfb2   :  { %6562 = vmatmul.mubr.bf16.vlgmr.msra.gmra.mrb[96].mxu1 %v9788_v13 }
0x1024   :  { %v7575_v15 = vpop.f32.mrb[84].mxu0  ;;  %v7597_v3 = vpop.f32.mrb[84].mxu1 }
0x1025   :  { %v7576_v2 = vpop.f32.mrb[85].mxu0  ;;  %v7598_v44 = vpop.f32.mrb[85].mxu1 }
0x1026   :  { %v7577_v39 = vadd.f32 %v7576_v2, %v7575_v15  ;;  %v7599_v4 = vadd.f32 %v7598_v44, %v7597_v3  ;;  %v7578_v61 = vpop.f32.mrb[86].mxu0  ;;  %v7600_v40 = vpop.f32.mrb[86].mxu1 }
0x1027   :  { %v7579_v53 = vpop.f32.mrb[87].mxu0  ;;  %v7601_v59 = vpop.f32.mrb[87].mxu1 }
0x1028   :  { %v6277_v63 = vadd.f32 %v7577_v39, %v7172_v7  ;;  %v7580_v46 = vadd.f32 %v7579_v53, %v7578_v61  ;;  %v7602_v25 = vadd.f32 %v7601_v59, %v7600_v40 }
0x102a   :  { %v6318_v56 = vadd.f32 %v7599_v4, %v6277_v63  ;;  %v6280_v33 = vadd.f32 %v7580_v46, %v7172_v7 }
0x102c   :  { %v6321_v13 = vadd.f32 %v7602_v25, %v6280_v33 }
0x1044   :  { %v7619_v54 = vpop.f32.mrb[88].mxu0  ;;  %v7641_v16 = vpop.f32.mrb[88].mxu1 }
0x1045   :  { %v7620_v23 = vpop.f32.mrb[89].mxu0  ;;  %v7642_v24 = vpop.f32.mrb[89].mxu1 }
0x1046   :  { %v7621_v21 = vadd.f32 %v7620_v23, %v7619_v54  ;;  %v7643_v42 = vadd.f32 %v7642_v24, %v7641_v16  ;;  %v7622_v22 = vpop.f32.mrb[90].mxu0  ;;  %v7644_v35 = vpop.f32.mrb[90].mxu1 }
0x1047   :  { %v7623_v30 = vpop.f32.mrb[91].mxu0  ;;  %v7645_v28 = vpop.f32.mrb[91].mxu1 }
0x1048   :  { %v6359_v8 = vadd.f32 %v7621_v21, %v6318_v56  ;;  %v7624_v10 = vadd.f32 %v7623_v30, %v7622_v22  ;;  %v7646_v57 = vadd.f32 %v7645_v28, %v7644_v35  ;;  %v7302_v30 = vld [vmem:[%s10052_s15 + $0x1] ss:$0 sm:$0xff] }
0x104a   :  { %v6400_v34 = vadd.f32 %v7643_v42, %v6359_v8  ;;  %v6362_v1 = vadd.f32 %v7624_v10, %v6321_v13  ;;  %v7301_v42 = vld [vmem:[%s10051_s14 + $0x1] ss:$0 sm:$0xff] }
0x104c   :  { %v6403_v62 = vadd.f32 %v7646_v57, %v6362_v1 }
0x1064   :  { %v7663_v38 = vpop.f32.mrb[92].mxu0 }
0x1065   :  { %v7685_v18 = vpop.f32.mrb[92].mxu1  ;;  %v7664_v47 = vpop.f32.mrb[93].mxu0 }
0x1066   :  { %v7665_v14 = vadd.f32 %v7664_v47, %v7663_v38  ;;  %v7686_v43 = vpop.f32.mrb[93].mxu1  ;;  %v7666_v9 = vpop.f32.mrb[94].mxu0 }
0x1067   :  { %v7687_v45 = vadd.f32 %v7686_v43, %v7685_v18  ;;  %v7688_v12 = vpop.f32.mrb[94].mxu1  ;;  %v7667_v49 = vpop.f32.mrb[95].mxu0 }
0x1068   :  { %v6441_v52 = vadd.f32 %v7665_v14, %v6400_v34  ;;  %v7668_v26 = vadd.f32 %v7667_v49, %v7666_v9  ;;  %v7689_v37 = vpop.f32.mrb[95].mxu1 }
0x1069   :  { %v7690_v32 = vadd.f32 %v7689_v37, %v7688_v12 }
0x106a   :  { %v6482_v31 = vadd.f32 %v7687_v45, %v6441_v52  ;;  %v6444_v41 = vadd.f32 %v7668_v26, %v6403_v62 }
0x106c   :  { %v6485_v50 = vadd.f32 %v7690_v32, %v6444_v41 }
0x1084   :  { %v7707_v11 = vpop.f32.mrb[96].mxu0 }
0x1085   :  { %v7729_v6 = vpop.f32.mrb[96].mxu1  ;;  %v7708_v58 = vpop.f32.mrb[97].mxu0 }
0x1086   :  { %v7709_v60 = vadd.f32 %v7708_v58, %v7707_v11  ;;  %v7730_v51 = vpop.f32.mrb[97].mxu1  ;;  %v7710_v36 = vpop.f32.mrb[98].mxu0 }
0x1087   :  { %v7731_v29 = vadd.f32 %v7730_v51, %v7729_v6  ;;  %v7732_v20 = vpop.f32.mrb[98].mxu1  ;;  %v7711_v5 = vpop.f32.mrb[99].mxu0 }
0x1088   :  { %v6523_v48 = vadd.f32 %v7709_v60, %v6482_v31  ;;  %v7712_v17 = vadd.f32 %v7711_v5, %v7710_v36  ;;  %v7733_v0 = vpop.f32.mrb[99].mxu1 }
0x1089   :  { %v7734_v27 = vadd.f32 %v7733_v0, %v7732_v20 }
0x108a   :  { %v6564_v15 = vadd.f32 %v7731_v29, %v6523_v48  ;;  %v6526_v3 = vadd.f32 %v7712_v17, %v6485_v50 }
0x108c   :  { %v6567_v7 = vadd.f32 %v7734_v27, %v6526_v3  ;;  %v6570_v2 = vadd.f32 %v6564_v15, %v9526_v55 }
0x108e   :  { %v6572_v44 = vsel %vm343_vm0, %v6570_v2, 0.0  ;;  %v6571_v39 = vadd.f32 %v6567_v7, %v9528_v19 }
0x108f   :  { %6573 = vadd.xlane.f32.xlu1 %v6572_v44 }
0x1090   :  { %v6575_v4 = vsel %vm343_vm0, %v6571_v39, 0.0 }
0x1091   :  { %6576 = vadd.xlane.f32.xlu0 %v6575_v4 }
0x111c   :  { %v6574_v61 = vpop.xlane.xlu1 %6573 }
0x111d   :  { %v6578_v40 = vmul.f32 0.125, %v6574_v61 }
0x111e   :  { %v6577_v53 = vpop.xlane.xlu0 %6576 }
0x111f   :  { %v6580_v59 = vsub.f32 %v6570_v2, %v6578_v40  ;;  %v6579_v63 = vmul.f32 0.125, %v6577_v53 }
0x1121   :  { %v6581_v46 = vsub.f32 %v6571_v39, %v6579_v63  ;;  %v6582_v25 = vmul.f32 %v6580_v59, %v6580_v59 }
0x1123   :  { %v6584_v56 = vsel %vm343_vm0, %v6582_v25, 0.0  ;;  %v6583_v33 = vmul.f32 %v6581_v46, %v6581_v46 }
0x1124   :  { %6585 = vadd.xlane.f32.xlu1 %v6584_v56 }
0x1125   :  { %v6587_v55 = vsel %vm343_vm0, %v6583_v33, 0.0 }
0x1126   :  { %6588 = vadd.xlane.f32.xlu0 %v6587_v55 }
0x11b1   :  { %v6586_v13 = vpop.xlane.xlu1 %6585 }
0x11b2   :  { %v6590_v19 = vmul.f32 0.125, %v6586_v13 }
0x11b3   :  { %v6589_v54 = vpop.xlane.xlu0 %6588 }
0x11b4   :  { %v6592_v16 = vadd.f32 1e-05, %v6590_v19  ;;  %v6591_v23 = vmul.f32 0.125, %v6589_v54 }
0x11b6   :  { %8291 = vrsqrt.f32 %v6592_v16  ;;  %v6593_v24 = vadd.f32 1e-05, %v6591_v23 }
0x11b8   :  { %8293 = vrsqrt.f32 %v6593_v24 }
0x11c0   :  { %v8292_v21 = vpop.eup %8291 }
0x11c1   :  { %v6596_v22 = vmul.f32 %v8292_v21, %v6580_v59 }
0x11c2   :  { %v8294_v35 = vpop.eup %8293 }
0x11c3   :  { %v6604_v28 = vmul.f32 %v7301_v42, %v6596_v22  ;;  %v6597_v8 = vmul.f32 %v8294_v35, %v6581_v46 }
0x11c5   :  { %v6612_v10 = vadd.f32 %v7302_v30, %v6604_v28  ;;  %v6605_v57 = vmul.f32 %v7301_v42, %v6597_v8 }
0x11c7   :  { %6614 = vst.msk [vmem:[%s10053_s16] sm:$0xff] %vm343_vm0, %v6612_v10  ;;  %v6613_v34 = vadd.f32 %v7302_v30, %v6605_v57 }
0x11c9   :  { %6615 = vst.msk [vmem:[%s10053_s16 + $0x8] sm:$0xff] %vm343_vm0, %v6613_v34 }

</bundles_post_ra>
